<compile_context>
chip_gen: v7x
topology: tpu7x:2x2x1
jax: 0.10.0
libtpu: 0.0.40
codegen_flags: <defaults>
</compile_context>

<pallas_src>
import functools

import jax
import jax.numpy as jnp
from jax.experimental import pallas as pl
from jax.experimental.pallas import tpu as pltpu

# ----- true model dims (same synthetic encoder as before) -------------------
HIDDEN = 32
FFN = 64
NUM_HEADS = 2
HEAD_DIM = HIDDEN // NUM_HEADS        # 16
NUM_LAYERS = 2

# ----- lane-dense padded dims ------------------------------------------------
HP = 128                              # hidden padded to one full lane group
FP = 128                              # FFN padded
QKV_P = 3 * HP                        # fused QKV output width (384)

LN_EPS = 1e-12
NEG_INF = -1e9
TEMPERATURE = 0.05


def _layer_norm(x, g, b, inv_h):
    """LayerNorm over the true hidden width.

    Padded lanes of `x` are provably zero (zero-padded embeddings, weights and
    biases), so unmasked sums over 128 lanes equal sums over the 32 real lanes
    and the one-pass variance E[x^2] - mu^2 is exact.  Gamma/beta are zero on
    padded lanes, so the output's padded lanes stay zero (invariant preserved
    through residuals)."""
    mu = jnp.sum(x, axis=-1, keepdims=True) * inv_h
    ex2 = jnp.sum(x * x, axis=-1, keepdims=True) * inv_h
    var = ex2 - mu * mu
    return (x - mu) * jax.lax.rsqrt(var + LN_EPS) * g + b


# ---------------------------------------------------------------------------
# Single fused Pallas kernel: embeddings-LN -> 2 encoder layers (both
# sentences in one slab) -> CLS pooling -> normalize -> logits -> CE loss.
# ---------------------------------------------------------------------------
def fused_forward_kernel(
        x_ref, neg_ref,
        emb_g_ref, emb_b_ref,
        wqkv_ref, bqkv_ref, wo_ref, bo_ref, ln1g_ref, ln1b_ref,
        w1_ref, b1_ref, w2_ref, b2_ref, ln2g_ref, ln2b_ref,
        logits_ref, loss_ref,
        *, batch, seq):
    B, S = batch, seq
    B2 = 2 * B                         # both sentences stacked on the batch axis
    M = B2 * S                         # flat-slab rows for every matmul
    inv_h = 1.0 / HIDDEN
    scale = 1.0 / (HEAD_DIM ** 0.5)

    # per-head lane masks inside the single 128-lane block (lanes 0..31 real)
    lane = jax.lax.broadcasted_iota(jnp.int32, (1, 1, HP), 2)
    head_masks = [
        ((lane >= h * HEAD_DIM) & (lane < (h + 1) * HEAD_DIM)).astype(jnp.float32)
        for h in range(NUM_HEADS)
    ]

    neg_bias = neg_ref[...]            # (2B, 1, S): 0 keep / -1e9 padded key

    # embedding LayerNorm on the merged (2*B*S, HP) slab
    x = _layer_norm(x_ref[...], emb_g_ref[...], emb_b_ref[...], inv_h)

    for l in range(NUM_LAYERS):        # weights stay resident in VMEM
        wqkv, bqkv = wqkv_ref[l], bqkv_ref[l]
        wo, bo = wo_ref[l], bo_ref[l]
        w1, b1 = w1_ref[l], b1_ref[l]
        w2, b2 = w2_ref[l], b2_ref[l]
        ln1g, ln1b = ln1g_ref[l], ln1b_ref[l]
        ln2g, ln2b = ln2g_ref[l], ln2b_ref[l]

        xb = x.astype(jnp.bfloat16)    # bf16 on the MXU, f32 accumulation
        qkv = jnp.dot(xb, wqkv, preferred_element_type=jnp.float32) + bqkv  # (M, 384)
        q = qkv[:, 0:HP].reshape(B2, S, HP)          # 128-aligned lane slices
        k = qkv[:, HP:2 * HP].reshape(B2, S, HP)
        v = qkv[:, 2 * HP:3 * HP].reshape(B2, S, HP)
        kb = k.astype(jnp.bfloat16)

        ctx = jnp.zeros((B2, S, HP), jnp.float32)
        for h in range(NUM_HEADS):
            hm = head_masks[h]
            # masking q alone restricts the 128-lane contraction to head h
            qh = (q * hm).astype(jnp.bfloat16)
            s = jnp.einsum('bqd,bkd->bqk', qh, kb,
                           preferred_element_type=jnp.float32)
            s = s * scale + neg_bias                   # mask padded keys
            s = s - jnp.max(s, axis=-1, keepdims=True)
            p = jnp.exp(s)
            p = p * pl.reciprocal(jnp.sum(p, axis=-1, keepdims=True),
                                  approx=True)
            vh = (v * hm).astype(jnp.bfloat16)         # head h's value lanes only
            ctx = ctx + jnp.einsum('bqk,bkd->bqd', p.astype(jnp.bfloat16), vh,
                                   preferred_element_type=jnp.float32)

        attn_out = jnp.dot(ctx.reshape(M, HP).astype(jnp.bfloat16), wo,
                           preferred_element_type=jnp.float32) + bo
        h1 = _layer_norm(x + attn_out, ln1g, ln1b, inv_h)

        f = jnp.dot(h1.astype(jnp.bfloat16), w1,
                    preferred_element_type=jnp.float32) + b1
        # tanh GELU (HF BERT default is the exact erf form; approx kept for a
        # guaranteed-supported EUP lowering, numerically very close)
        f = jax.nn.gelu(f, approximate=True)
        f = jnp.dot(f.astype(jnp.bfloat16), w2,
                    preferred_element_type=jnp.float32) + b2
        x = _layer_norm(h1 + f, ln2g, ln2b, inv_h)

    # [CLS] pooling, then split the merged slab back into the two sentences
    cls = x.reshape(B2, S, HP)[:, 0:1, :].reshape(B2, HP)
    e1 = cls[:B]
    e2 = cls[B:]

    # F.normalize(p=2, dim=1): exact divide — error here is amplified 20x by
    # 1/temperature, so no approx reciprocal.
    def l2_normalize(e):
        nrm = jnp.sqrt(jnp.sum(e * e, axis=-1, keepdims=True))
        return e / jnp.maximum(nrm, 1e-12)

    n1 = l2_normalize(e1)
    n2 = l2_normalize(e2)

    # tiny (B,B) similarity matmul kept in f32 for loss fidelity
    logits = (jnp.dot(n1, n2.T, preferred_element_type=jnp.float32)
              * (1.0 / TEMPERATURE))
    logits_ref[...] = logits

    # cross-entropy with labels = arange(B)
    m = jnp.max(logits, axis=-1, keepdims=True)
    lse = jnp.log(jnp.sum(jnp.exp(logits - m), axis=-1, keepdims=True)) + m
    rows = jax.lax.broadcasted_iota(jnp.int32, (B, B), 0)
    cols = jax.lax.broadcasted_iota(jnp.int32, (B, B), 1)
    diag = jnp.sum(jnp.where(rows == cols, logits, 0.0), axis=-1, keepdims=True)
    loss_ref[0] = jnp.sum(lse - diag) * (1.0 / B)      # scalar -> SMEM


def fused_forward(params, x_flat, neg, batch, seq):
    kernel = functools.partial(fused_forward_kernel, batch=batch, seq=seq)
    n_inputs = 16
    logits, loss = pl.pallas_call(
        kernel,
        out_shape=(jax.ShapeDtypeStruct((batch, batch), jnp.float32),
                   jax.ShapeDtypeStruct((1,), jnp.float32)),
        in_specs=[pl.BlockSpec(memory_space=pltpu.MemorySpace.VMEM)] * n_inputs,
        out_specs=(pl.BlockSpec(memory_space=pltpu.MemorySpace.VMEM),
                   pl.BlockSpec(memory_space=pltpu.MemorySpace.SMEM)),
    )(x_flat, neg,
      params['emb_ln_g'], params['emb_ln_b'],
      params['wqkv'], params['bqkv'], params['wo'], params['bo'],
      params['ln1_g'], params['ln1_b'],
      params['w1'], params['b1'], params['w2'], params['b2'],
      params['ln2_g'], params['ln2_b'])
    return logits, loss[0]


# ---------------------------------------------------------------------------
# Parameter init (weights generated at true dims, zero-padded to the packed
# lane-dense layout; QKV fused into one (HP, 3*HP) weight; matmul weights
# stored in bf16, everything else f32).
# ---------------------------------------------------------------------------
def init_params(key, vocab=100, max_pos=16):
    H, F, L = HIDDEN, FFN, NUM_LAYERS
    keys = jax.random.split(key, 2 + L)

    def pad_cols(w, cols):
        return jnp.zeros((w.shape[0], cols), jnp.float32).at[:, :w.shape[1]].set(w)

    def pad_mat(w, rows, cols):
        return jnp.zeros((rows, cols), jnp.float32).at[:w.shape[0], :w.shape[1]].set(w)

    tok = 0.02 * jax.random.normal(keys[0], (vocab, H), jnp.float32)
    pos = 0.02 * jax.random.normal(keys[1], (max_pos, H), jnp.float32)
    params = {
        'tok_emb': pad_cols(tok, HP),
        'pos_emb': pad_cols(pos, HP),
        'emb_ln_g': pad_cols(jnp.ones((1, H), jnp.float32), HP),
        'emb_ln_b': jnp.zeros((1, HP), jnp.float32),
    }

    names = ('wqkv', 'bqkv', 'wo', 'bo', 'ln1_g', 'ln1_b',
             'w1', 'b1', 'w2', 'b2', 'ln2_g', 'ln2_b')
    stacks = {n: [] for n in names}
    for l in range(L):
        k = jax.random.split(keys[2 + l], 6)
        wq = 0.02 * jax.random.normal(k[0], (H, H), jnp.float32)
        wk = 0.02 * jax.random.normal(k[1], (H, H), jnp.float32)
        wv = 0.02 * jax.random.normal(k[2], (H, H), jnp.float32)
        wo = 0.02 * jax.random.normal(k[3], (H, H), jnp.float32)
        w1 = 0.02 * jax.random.normal(k[4], (H, F), jnp.float32)
        w2 = 0.02 * jax.random.normal(k[5], (F, H), jnp.float32)
        # heads packed in the natural layout (head h = lanes h*16..(h+1)*16);
        # Q/K/V fused along the output dim -> one matmul per layer.
        wqkv = jnp.concatenate(
            [pad_mat(wq, HP, HP), pad_mat(wk, HP, HP), pad_mat(wv, HP, HP)],
            axis=1)                                           # (HP, 3*HP)
        stacks['wqkv'].append(wqkv)
        stacks['bqkv'].append(jnp.zeros((1, 3 * HP), jnp.float32))
        stacks['wo'].append(pad_mat(wo, HP, HP))
        stacks['bo'].append(jnp.zeros((1, HP), jnp.float32))
        stacks['ln1_g'].append(pad_cols(jnp.ones((1, H), jnp.float32), HP))
        stacks['ln1_b'].append(jnp.zeros((1, HP), jnp.float32))
        stacks['w1'].append(pad_mat(w1, HP, FP))
        stacks['b1'].append(jnp.zeros((1, FP), jnp.float32))
        stacks['w2'].append(pad_mat(w2, FP, HP))
        stacks['b2'].append(jnp.zeros((1, HP), jnp.float32))
        stacks['ln2_g'].append(pad_cols(jnp.ones((1, H), jnp.float32), HP))
        stacks['ln2_b'].append(jnp.zeros((1, HP), jnp.float32))

    bf16_names = ('wqkv', 'wo', 'w1', 'w2')
    for n in names:
        arr = jnp.stack(stacks[n], axis=0)                    # stacked over layers
        if n in bf16_names:
            arr = arr.astype(jnp.bfloat16)
        params[n] = arr
    return params


# ---------------------------------------------------------------------------
# Glue: embedding gather + additive-mask prep for BOTH sentences merged into
# one slab (plain JAX), then a single fused pallas_call.
# ---------------------------------------------------------------------------
def contrastive_sentence_forward(params, input_ids1, attention_mask1,
                                 input_ids2, attention_mask2):
    B, S = input_ids1.shape
    ids = jnp.concatenate([input_ids1, input_ids2], axis=0)          # (2B, S)
    masks = jnp.concatenate([attention_mask1, attention_mask2], axis=0)
    x = params['tok_emb'][ids] + params['pos_emb'][:S][None]         # (2B, S, HP)
    neg = (1.0 - masks.astype(jnp.float32))[:, None, :] * NEG_INF    # (2B, 1, S)
    logits, loss = fused_forward(params, x.reshape(2 * B * S, HP), neg, B, S)
    # TODO(synk): eval-loss accumulation (.item()/wandb.log in train()) is
    # host-side bookkeeping with no device-side equivalent; only the
    # {'loss', 'logits'} outputs are produced.
    return {'loss': loss, 'logits': logits}


if __name__ == "__main__":
    B, S, VOCAB = 2, 8, 100
    key = jax.random.PRNGKey(0)
    pkey, dkey = jax.random.split(key)
    params = init_params(pkey, vocab=VOCAB, max_pos=S)

    k1, k2 = jax.random.split(dkey)
    input_ids1 = jax.random.randint(k1, (B, S), 0, VOCAB, dtype=jnp.int32)
    input_ids2 = jax.random.randint(k2, (B, S), 0, VOCAB, dtype=jnp.int32)
    attention_mask1 = jnp.ones((B, S), jnp.int32)
    attention_mask2 = jnp.ones((B, S), jnp.int32).at[1, S - 2:].set(0)

    fwd = jax.jit(contrastive_sentence_forward)
    out = fwd(params, input_ids1, attention_mask1, input_ids2, attention_mask2)
    jax.block_until_ready(out)
    assert out['logits'].shape == (B, B)
    assert out['loss'].shape == ()
    print("KERNEL_OK")
</pallas_src>

<mosaic_0001>
module attributes {stable_mosaic.version = 11 : i64} {
  func.func @fused_forward_kernel(%arg0: memref<32x128xf32, #tpu.memory_space<vmem>>, %arg1: memref<4x1x8xf32, #tpu.memory_space<vmem>>, %arg2: memref<1x128xf32, #tpu.memory_space<vmem>>, %arg3: memref<1x128xf32, #tpu.memory_space<vmem>>, %arg4: memref<2x128x384xbf16, #tpu.memory_space<vmem>>, %arg5: memref<2x1x384xf32, #tpu.memory_space<vmem>>, %arg6: memref<2x128x128xbf16, #tpu.memory_space<vmem>>, %arg7: memref<2x1x128xf32, #tpu.memory_space<vmem>>, %arg8: memref<2x1x128xf32, #tpu.memory_space<vmem>>, %arg9: memref<2x1x128xf32, #tpu.memory_space<vmem>>, %arg10: memref<2x128x128xbf16, #tpu.memory_space<vmem>>, %arg11: memref<2x1x128xf32, #tpu.memory_space<vmem>>, %arg12: memref<2x128x128xbf16, #tpu.memory_space<vmem>>, %arg13: memref<2x1x128xf32, #tpu.memory_space<vmem>>, %arg14: memref<2x1x128xf32, #tpu.memory_space<vmem>>, %arg15: memref<2x1x128xf32, #tpu.memory_space<vmem>>, %arg16: memref<2x2xf32, #tpu.memory_space<vmem>>, %arg17: memref<1xf32, #tpu.memory_space<smem>>) attributes {dimension_semantics = [], scalar_prefetch = 0 : i64, scratch_operands = 0 : i64, tpu.core_type = #tpu.core_type<tc>} {
    %0 = tpu.iota {dimensions = array<i32: 2>} : vector<1x1x128xi32>
    %c0_i32 = arith.constant 0 : i32
    %1 = vector.broadcast %c0_i32 : i32 to vector<1x1x128xi32>
    %2 = arith.cmpi sge, %0, %1 : vector<1x1x128xi32>
    %c16_i32 = arith.constant 16 : i32
    %3 = vector.broadcast %c16_i32 : i32 to vector<1x1x128xi32>
    %4 = arith.cmpi slt, %0, %3 : vector<1x1x128xi32>
    %5 = arith.andi %2, %4 : vector<1x1x128xi1>
    %6 = arith.extui %5 : vector<1x1x128xi1> to vector<1x1x128xi32>
    %7 = arith.sitofp %6 : vector<1x1x128xi32> to vector<1x1x128xf32>
    %c16_i32_0 = arith.constant 16 : i32
    %8 = vector.broadcast %c16_i32_0 : i32 to vector<1x1x128xi32>
    %9 = arith.cmpi sge, %0, %8 : vector<1x1x128xi32>
    %c32_i32 = arith.constant 32 : i32
    %10 = vector.broadcast %c32_i32 : i32 to vector<1x1x128xi32>
    %11 = arith.cmpi slt, %0, %10 : vector<1x1x128xi32>
    %12 = arith.andi %9, %11 : vector<1x1x128xi1>
    %13 = arith.extui %12 : vector<1x1x128xi1> to vector<1x1x128xi32>
    %14 = arith.sitofp %13 : vector<1x1x128xi32> to vector<1x1x128xf32>
    %c0 = arith.constant 0 : index
    %c0_1 = arith.constant 0 : index
    %c0_2 = arith.constant 0 : index
    %15 = vector.load %arg1[%c0, %c0_1, %c0_2] : memref<4x1x8xf32, #tpu.memory_space<vmem>>, vector<4x1x8xf32>
    %c0_3 = arith.constant 0 : index
    %c0_4 = arith.constant 0 : index
    %16 = vector.load %arg0[%c0_3, %c0_4] : memref<32x128xf32, #tpu.memory_space<vmem>>, vector<32x128xf32>
    %c0_5 = arith.constant 0 : index
    %c0_6 = arith.constant 0 : index
    %17 = vector.load %arg2[%c0_5, %c0_6] : memref<1x128xf32, #tpu.memory_space<vmem>>, vector<1x128xf32>
    %c0_7 = arith.constant 0 : index
    %c0_8 = arith.constant 0 : index
    %18 = vector.load %arg3[%c0_7, %c0_8] : memref<1x128xf32, #tpu.memory_space<vmem>>, vector<1x128xf32>
    %cst = arith.constant dense<0.000000e+00> : vector<32xf32>
    %19 = vector.multi_reduction <add>, %16, %cst [1] : vector<32x128xf32> to vector<32xf32>
    %20 = vector.shape_cast %19 : vector<32xf32> to vector<32x1xf32>
    %cst_9 = arith.constant 3.125000e-02 : f32
    %21 = vector.broadcast %cst_9 : f32 to vector<32x1xf32>
    %22 = arith.mulf %20, %21 : vector<32x1xf32>
    %23 = arith.mulf %16, %16 : vector<32x128xf32>
    %cst_10 = arith.constant dense<0.000000e+00> : vector<32xf32>
    %24 = vector.multi_reduction <add>, %23, %cst_10 [1] : vector<32x128xf32> to vector<32xf32>
    %25 = vector.shape_cast %24 : vector<32xf32> to vector<32x1xf32>
    %cst_11 = arith.constant 3.125000e-02 : f32
    %26 = vector.broadcast %cst_11 : f32 to vector<32x1xf32>
    %27 = arith.mulf %25, %26 : vector<32x1xf32>
    %28 = arith.mulf %22, %22 : vector<32x1xf32>
    %29 = arith.subf %27, %28 : vector<32x1xf32>
    %30 = vector.broadcast %22 : vector<32x1xf32> to vector<32x128xf32>
    %31 = arith.subf %16, %30 : vector<32x128xf32>
    %cst_12 = arith.constant 9.99999996E-13 : f32
    %32 = vector.broadcast %cst_12 : f32 to vector<32x1xf32>
    %33 = arith.addf %29, %32 : vector<32x1xf32>
    %34 = math.rsqrt %33 : vector<32x1xf32>
    %35 = vector.broadcast %34 : vector<32x1xf32> to vector<32x128xf32>
    %36 = arith.mulf %31, %35 : vector<32x128xf32>
    %37 = vector.broadcast %17 : vector<1x128xf32> to vector<32x128xf32>
    %38 = arith.mulf %36, %37 : vector<32x128xf32>
    %39 = vector.broadcast %18 : vector<1x128xf32> to vector<32x128xf32>
    %40 = arith.addf %38, %39 : vector<32x128xf32>
    %c0_13 = arith.constant 0 : index
    %c0_14 = arith.constant 0 : index
    %c0_15 = arith.constant 0 : index
    %41 = vector.load %arg4[%c0_13, %c0_14, %c0_15] : memref<2x128x384xbf16, #tpu.memory_space<vmem>>, vector<1x128x384xbf16>
    %42 = vector.shape_cast %41 : vector<1x128x384xbf16> to vector<128x384xbf16>
    %c0_16 = arith.constant 0 : index
    %c0_17 = arith.constant 0 : index
    %c0_18 = arith.constant 0 : index
    %43 = vector.load %arg5[%c0_16, %c0_17, %c0_18] : memref<2x1x384xf32, #tpu.memory_space<vmem>>, vector<1x1x384xf32>
    %44 = vector.shape_cast %43 : vector<1x1x384xf32> to vector<1x384xf32>
    %c0_19 = arith.constant 0 : index
    %c0_20 = arith.constant 0 : index
    %c0_21 = arith.constant 0 : index
    %45 = vector.load %arg6[%c0_19, %c0_20, %c0_21] : memref<2x128x128xbf16, #tpu.memory_space<vmem>>, vector<1x128x128xbf16>
    %46 = vector.shape_cast %45 : vector<1x128x128xbf16> to vector<128x128xbf16>
    %c0_22 = arith.constant 0 : index
    %c0_23 = arith.constant 0 : index
    %c0_24 = arith.constant 0 : index
    %47 = vector.load %arg7[%c0_22, %c0_23, %c0_24] : memref<2x1x128xf32, #tpu.memory_space<vmem>>, vector<1x1x128xf32>
    %48 = vector.shape_cast %47 : vector<1x1x128xf32> to vector<1x128xf32>
    %c0_25 = arith.constant 0 : index
    %c0_26 = arith.constant 0 : index
    %c0_27 = arith.constant 0 : index
    %49 = vector.load %arg10[%c0_25, %c0_26, %c0_27] : memref<2x128x128xbf16, #tpu.memory_space<vmem>>, vector<1x128x128xbf16>
    %50 = vector.shape_cast %49 : vector<1x128x128xbf16> to vector<128x128xbf16>
    %c0_28 = arith.constant 0 : index
    %c0_29 = arith.constant 0 : index
    %c0_30 = arith.constant 0 : index
    %51 = vector.load %arg11[%c0_28, %c0_29, %c0_30] : memref<2x1x128xf32, #tpu.memory_space<vmem>>, vector<1x1x128xf32>
    %52 = vector.shape_cast %51 : vector<1x1x128xf32> to vector<1x128xf32>
    %c0_31 = arith.constant 0 : index
    %c0_32 = arith.constant 0 : index
    %c0_33 = arith.constant 0 : index
    %53 = vector.load %arg12[%c0_31, %c0_32, %c0_33] : memref<2x128x128xbf16, #tpu.memory_space<vmem>>, vector<1x128x128xbf16>
    %54 = vector.shape_cast %53 : vector<1x128x128xbf16> to vector<128x128xbf16>
    %c0_34 = arith.constant 0 : index
    %c0_35 = arith.constant 0 : index
    %c0_36 = arith.constant 0 : index
    %55 = vector.load %arg13[%c0_34, %c0_35, %c0_36] : memref<2x1x128xf32, #tpu.memory_space<vmem>>, vector<1x1x128xf32>
    %56 = vector.shape_cast %55 : vector<1x1x128xf32> to vector<1x128xf32>
    %c0_37 = arith.constant 0 : index
    %c0_38 = arith.constant 0 : index
    %c0_39 = arith.constant 0 : index
    %57 = vector.load %arg8[%c0_37, %c0_38, %c0_39] : memref<2x1x128xf32, #tpu.memory_space<vmem>>, vector<1x1x128xf32>
    %58 = vector.shape_cast %57 : vector<1x1x128xf32> to vector<1x128xf32>
    %c0_40 = arith.constant 0 : index
    %c0_41 = arith.constant 0 : index
    %c0_42 = arith.constant 0 : index
    %59 = vector.load %arg9[%c0_40, %c0_41, %c0_42] : memref<2x1x128xf32, #tpu.memory_space<vmem>>, vector<1x1x128xf32>
    %60 = vector.shape_cast %59 : vector<1x1x128xf32> to vector<1x128xf32>
    %c0_43 = arith.constant 0 : index
    %c0_44 = arith.constant 0 : index
    %c0_45 = arith.constant 0 : index
    %61 = vector.load %arg14[%c0_43, %c0_44, %c0_45] : memref<2x1x128xf32, #tpu.memory_space<vmem>>, vector<1x1x128xf32>
    %62 = vector.shape_cast %61 : vector<1x1x128xf32> to vector<1x128xf32>
    %c0_46 = arith.constant 0 : index
    %c0_47 = arith.constant 0 : index
    %c0_48 = arith.constant 0 : index
    %63 = vector.load %arg15[%c0_46, %c0_47, %c0_48] : memref<2x1x128xf32, #tpu.memory_space<vmem>>, vector<1x1x128xf32>
    %64 = vector.shape_cast %63 : vector<1x1x128xf32> to vector<1x128xf32>
    %65 = arith.truncf %40 : vector<32x128xf32> to vector<32x128xbf16>
    %cst_49 = arith.constant dense<0.000000e+00> : vector<32x384xf32>
    %66 = tpu.matmul %65, %42, %cst_49 {dimension_numbers = #tpu.dot_dimension_numbers<[1], [0], [0], [1], [0, 0, 1, 1], [], []>} : vector<32x128xbf16>, vector<128x384xbf16>, vector<32x384xf32> -> vector<32x384xf32>
    %67 = vector.broadcast %44 : vector<1x384xf32> to vector<32x384xf32>
    %68 = arith.addf %66, %67 : vector<32x384xf32>
    %69 = vector.extract_strided_slice %68 {offsets = [0, 0], sizes = [32, 128], strides = [1, 1]} : vector<32x384xf32> to vector<32x128xf32>
    %70 = vector.shape_cast %69 : vector<32x128xf32> to vector<4x8x128xf32>
    %71 = vector.extract_strided_slice %68 {offsets = [0, 128], sizes = [32, 128], strides = [1, 1]} : vector<32x384xf32> to vector<32x128xf32>
    %72 = vector.shape_cast %71 : vector<32x128xf32> to vector<4x8x128xf32>
    %73 = vector.extract_strided_slice %68 {offsets = [0, 256], sizes = [32, 128], strides = [1, 1]} : vector<32x384xf32> to vector<32x128xf32>
    %74 = vector.shape_cast %73 : vector<32x128xf32> to vector<4x8x128xf32>
    %75 = arith.truncf %72 : vector<4x8x128xf32> to vector<4x8x128xbf16>
    %cst_50 = arith.constant 0.000000e+00 : f32
    %76 = vector.broadcast %cst_50 : f32 to vector<4x8x128xf32>
    %77 = vector.broadcast %7 : vector<1x1x128xf32> to vector<4x8x128xf32>
    %78 = arith.mulf %70, %77 : vector<4x8x128xf32>
    %79 = arith.truncf %78 : vector<4x8x128xf32> to vector<4x8x128xbf16>
    "tpu.trace_start"() <{level = 10 : i32, message = "bqd,bkd->bqk"}> : () -> ()
    %cst_51 = arith.constant dense<0.000000e+00> : vector<4x8x8xf32>
    %80 = tpu.matmul %79, %75, %cst_51 {dimension_numbers = #tpu.dot_dimension_numbers<[2], [2], [1], [1], [0, 0, 0, 1, 1, 1], [0], [0]>} : vector<4x8x128xbf16>, vector<4x8x128xbf16>, vector<4x8x8xf32> -> vector<4x8x8xf32>
    "tpu.trace_stop"() : () -> ()
    %cst_52 = arith.constant 2.500000e-01 : f32
    %81 = vector.broadcast %cst_52 : f32 to vector<4x8x8xf32>
    %82 = arith.mulf %80, %81 : vector<4x8x8xf32>
    %83 = vector.broadcast %15 : vector<4x1x8xf32> to vector<4x8x8xf32>
    %84 = arith.addf %82, %83 : vector<4x8x8xf32>
    %cst_53 = arith.constant dense<0xFF800000> : vector<4x8xf32>
    %85 = vector.multi_reduction <maximumf>, %84, %cst_53 [2] : vector<4x8x8xf32> to vector<4x8xf32>
    %86 = vector.shape_cast %85 : vector<4x8xf32> to vector<4x8x1xf32>
    %87 = vector.broadcast %86 : vector<4x8x1xf32> to vector<4x8x8xf32>
    %88 = arith.subf %84, %87 : vector<4x8x8xf32>
    %89 = math.exp %88 : vector<4x8x8xf32>
    %cst_54 = arith.constant dense<0.000000e+00> : vector<4x8xf32>
    %90 = vector.multi_reduction <add>, %89, %cst_54 [2] : vector<4x8x8xf32> to vector<4x8xf32>
    %91 = vector.shape_cast %90 : vector<4x8xf32> to vector<4x8x1xf32>
    %92 = tpu.reciprocal %91 {approx = true} : vector<4x8x1xf32> -> vector<4x8x1xf32>
    %93 = vector.broadcast %92 : vector<4x8x1xf32> to vector<4x8x8xf32>
    %94 = arith.mulf %89, %93 : vector<4x8x8xf32>
    %95 = vector.broadcast %7 : vector<1x1x128xf32> to vector<4x8x128xf32>
    %96 = arith.mulf %74, %95 : vector<4x8x128xf32>
    %97 = arith.truncf %96 : vector<4x8x128xf32> to vector<4x8x128xbf16>
    %98 = arith.truncf %94 : vector<4x8x8xf32> to vector<4x8x8xbf16>
    "tpu.trace_start"() <{level = 10 : i32, message = "bqk,bkd->bqd"}> : () -> ()
    %cst_55 = arith.constant dense<0.000000e+00> : vector<4x8x128xf32>
    %99 = tpu.matmul %98, %97, %cst_55 {dimension_numbers = #tpu.dot_dimension_numbers<[2], [1], [1], [2], [0, 0, 0, 1, 1, 2], [0], [0]>} : vector<4x8x8xbf16>, vector<4x8x128xbf16>, vector<4x8x128xf32> -> vector<4x8x128xf32>
    "tpu.trace_stop"() : () -> ()
    %100 = arith.addf %76, %99 : vector<4x8x128xf32>
    %101 = vector.broadcast %14 : vector<1x1x128xf32> to vector<4x8x128xf32>
    %102 = arith.mulf %70, %101 : vector<4x8x128xf32>
    %103 = arith.truncf %102 : vector<4x8x128xf32> to vector<4x8x128xbf16>
    "tpu.trace_start"() <{level = 10 : i32, message = "bqd,bkd->bqk"}> : () -> ()
    %cst_56 = arith.constant dense<0.000000e+00> : vector<4x8x8xf32>
    %104 = tpu.matmul %103, %75, %cst_56 {dimension_numbers = #tpu.dot_dimension_numbers<[2], [2], [1], [1], [0, 0, 0, 1, 1, 1], [0], [0]>} : vector<4x8x128xbf16>, vector<4x8x128xbf16>, vector<4x8x8xf32> -> vector<4x8x8xf32>
    "tpu.trace_stop"() : () -> ()
    %cst_57 = arith.constant 2.500000e-01 : f32
    %105 = vector.broadcast %cst_57 : f32 to vector<4x8x8xf32>
    %106 = arith.mulf %104, %105 : vector<4x8x8xf32>
    %107 = vector.broadcast %15 : vector<4x1x8xf32> to vector<4x8x8xf32>
    %108 = arith.addf %106, %107 : vector<4x8x8xf32>
    %cst_58 = arith.constant dense<0xFF800000> : vector<4x8xf32>
    %109 = vector.multi_reduction <maximumf>, %108, %cst_58 [2] : vector<4x8x8xf32> to vector<4x8xf32>
    %110 = vector.shape_cast %109 : vector<4x8xf32> to vector<4x8x1xf32>
    %111 = vector.broadcast %110 : vector<4x8x1xf32> to vector<4x8x8xf32>
    %112 = arith.subf %108, %111 : vector<4x8x8xf32>
    %113 = math.exp %112 : vector<4x8x8xf32>
    %cst_59 = arith.constant dense<0.000000e+00> : vector<4x8xf32>
    %114 = vector.multi_reduction <add>, %113, %cst_59 [2] : vector<4x8x8xf32> to vector<4x8xf32>
    %115 = vector.shape_cast %114 : vector<4x8xf32> to vector<4x8x1xf32>
    %116 = tpu.reciprocal %115 {approx = true} : vector<4x8x1xf32> -> vector<4x8x1xf32>
    %117 = vector.broadcast %116 : vector<4x8x1xf32> to vector<4x8x8xf32>
    %118 = arith.mulf %113, %117 : vector<4x8x8xf32>
    %119 = vector.broadcast %14 : vector<1x1x128xf32> to vector<4x8x128xf32>
    %120 = arith.mulf %74, %119 : vector<4x8x128xf32>
    %121 = arith.truncf %120 : vector<4x8x128xf32> to vector<4x8x128xbf16>
    %122 = arith.truncf %118 : vector<4x8x8xf32> to vector<4x8x8xbf16>
    "tpu.trace_start"() <{level = 10 : i32, message = "bqk,bkd->bqd"}> : () -> ()
    %cst_60 = arith.constant dense<0.000000e+00> : vector<4x8x128xf32>
    %123 = tpu.matmul %122, %121, %cst_60 {dimension_numbers = #tpu.dot_dimension_numbers<[2], [1], [1], [2], [0, 0, 0, 1, 1, 2], [0], [0]>} : vector<4x8x8xbf16>, vector<4x8x128xbf16>, vector<4x8x128xf32> -> vector<4x8x128xf32>
    "tpu.trace_stop"() : () -> ()
    %124 = arith.addf %100, %123 : vector<4x8x128xf32>
    %125 = vector.shape_cast %124 : vector<4x8x128xf32> to vector<32x128xf32>
    %126 = arith.truncf %125 : vector<32x128xf32> to vector<32x128xbf16>
    %cst_61 = arith.constant dense<0.000000e+00> : vector<32x128xf32>
    %127 = tpu.matmul %126, %46, %cst_61 {dimension_numbers = #tpu.dot_dimension_numbers<[1], [0], [0], [1], [0, 0, 1, 1], [], []>} : vector<32x128xbf16>, vector<128x128xbf16>, vector<32x128xf32> -> vector<32x128xf32>
    %128 = vector.broadcast %48 : vector<1x128xf32> to vector<32x128xf32>
    %129 = arith.addf %127, %128 : vector<32x128xf32>
    %130 = arith.addf %40, %129 : vector<32x128xf32>
    %cst_62 = arith.constant dense<0.000000e+00> : vector<32xf32>
    %131 = vector.multi_reduction <add>, %130, %cst_62 [1] : vector<32x128xf32> to vector<32xf32>
    %132 = vector.shape_cast %131 : vector<32xf32> to vector<32x1xf32>
    %cst_63 = arith.constant 3.125000e-02 : f32
    %133 = vector.broadcast %cst_63 : f32 to vector<32x1xf32>
    %134 = arith.mulf %132, %133 : vector<32x1xf32>
    %135 = arith.mulf %130, %130 : vector<32x128xf32>
    %cst_64 = arith.constant dense<0.000000e+00> : vector<32xf32>
    %136 = vector.multi_reduction <add>, %135, %cst_64 [1] : vector<32x128xf32> to vector<32xf32>
    %137 = vector.shape_cast %136 : vector<32xf32> to vector<32x1xf32>
    %cst_65 = arith.constant 3.125000e-02 : f32
    %138 = vector.broadcast %cst_65 : f32 to vector<32x1xf32>
    %139 = arith.mulf %137, %138 : vector<32x1xf32>
    %140 = arith.mulf %134, %134 : vector<32x1xf32>
    %141 = arith.subf %139, %140 : vector<32x1xf32>
    %142 = vector.broadcast %134 : vector<32x1xf32> to vector<32x128xf32>
    %143 = arith.subf %130, %142 : vector<32x128xf32>
    %cst_66 = arith.constant 9.99999996E-13 : f32
    %144 = vector.broadcast %cst_66 : f32 to vector<32x1xf32>
    %145 = arith.addf %141, %144 : vector<32x1xf32>
    %146 = math.rsqrt %145 : vector<32x1xf32>
    %147 = vector.broadcast %146 : vector<32x1xf32> to vector<32x128xf32>
    %148 = arith.mulf %143, %147 : vector<32x128xf32>
    %149 = vector.broadcast %58 : vector<1x128xf32> to vector<32x128xf32>
    %150 = arith.mulf %148, %149 : vector<32x128xf32>
    %151 = vector.broadcast %60 : vector<1x128xf32> to vector<32x128xf32>
    %152 = arith.addf %150, %151 : vector<32x128xf32>
    %153 = arith.truncf %152 : vector<32x128xf32> to vector<32x128xbf16>
    %cst_67 = arith.constant dense<0.000000e+00> : vector<32x128xf32>
    %154 = tpu.matmul %153, %50, %cst_67 {dimension_numbers = #tpu.dot_dimension_numbers<[1], [0], [0], [1], [0, 0, 1, 1], [], []>} : vector<32x128xbf16>, vector<128x128xbf16>, vector<32x128xf32> -> vector<32x128xf32>
    %155 = vector.broadcast %52 : vector<1x128xf32> to vector<32x128xf32>
    %156 = arith.addf %154, %155 : vector<32x128xf32>
    %157 = arith.mulf %156, %156 : vector<32x128xf32>
    %158 = arith.mulf %156, %157 : vector<32x128xf32>
    %cst_68 = arith.constant 4.471500e-02 : f32
    %159 = vector.broadcast %cst_68 : f32 to vector<32x128xf32>
    %160 = arith.mulf %159, %158 : vector<32x128xf32>
    %161 = arith.addf %156, %160 : vector<32x128xf32>
    %cst_69 = arith.constant 0.797884583 : f32
    %162 = vector.broadcast %cst_69 : f32 to vector<32x128xf32>
    %163 = arith.mulf %162, %161 : vector<32x128xf32>
    %164 = math.tanh %163 : vector<32x128xf32>
    %cst_70 = arith.constant 1.000000e+00 : f32
    %165 = vector.broadcast %cst_70 : f32 to vector<32x128xf32>
    %166 = arith.addf %165, %164 : vector<32x128xf32>
    %cst_71 = arith.constant 5.000000e-01 : f32
    %167 = vector.broadcast %cst_71 : f32 to vector<32x128xf32>
    %168 = arith.mulf %167, %166 : vector<32x128xf32>
    %169 = arith.mulf %156, %168 : vector<32x128xf32>
    %170 = arith.truncf %169 : vector<32x128xf32> to vector<32x128xbf16>
    %cst_72 = arith.constant dense<0.000000e+00> : vector<32x128xf32>
    %171 = tpu.matmul %170, %54, %cst_72 {dimension_numbers = #tpu.dot_dimension_numbers<[1], [0], [0], [1], [0, 0, 1, 1], [], []>} : vector<32x128xbf16>, vector<128x128xbf16>, vector<32x128xf32> -> vector<32x128xf32>
    %172 = vector.broadcast %56 : vector<1x128xf32> to vector<32x128xf32>
    %173 = arith.addf %171, %172 : vector<32x128xf32>
    %174 = arith.addf %152, %173 : vector<32x128xf32>
    %cst_73 = arith.constant dense<0.000000e+00> : vector<32xf32>
    %175 = vector.multi_reduction <add>, %174, %cst_73 [1] : vector<32x128xf32> to vector<32xf32>
    %176 = vector.shape_cast %175 : vector<32xf32> to vector<32x1xf32>
    %cst_74 = arith.constant 3.125000e-02 : f32
    %177 = vector.broadcast %cst_74 : f32 to vector<32x1xf32>
    %178 = arith.mulf %176, %177 : vector<32x1xf32>
    %179 = arith.mulf %174, %174 : vector<32x128xf32>
    %cst_75 = arith.constant dense<0.000000e+00> : vector<32xf32>
    %180 = vector.multi_reduction <add>, %179, %cst_75 [1] : vector<32x128xf32> to vector<32xf32>
    %181 = vector.shape_cast %180 : vector<32xf32> to vector<32x1xf32>
    %cst_76 = arith.constant 3.125000e-02 : f32
    %182 = vector.broadcast %cst_76 : f32 to vector<32x1xf32>
    %183 = arith.mulf %181, %182 : vector<32x1xf32>
    %184 = arith.mulf %178, %178 : vector<32x1xf32>
    %185 = arith.subf %183, %184 : vector<32x1xf32>
    %186 = vector.broadcast %178 : vector<32x1xf32> to vector<32x128xf32>
    %187 = arith.subf %174, %186 : vector<32x128xf32>
    %cst_77 = arith.constant 9.99999996E-13 : f32
    %188 = vector.broadcast %cst_77 : f32 to vector<32x1xf32>
    %189 = arith.addf %185, %188 : vector<32x1xf32>
    %190 = math.rsqrt %189 : vector<32x1xf32>
    %191 = vector.broadcast %190 : vector<32x1xf32> to vector<32x128xf32>
    %192 = arith.mulf %187, %191 : vector<32x128xf32>
    %193 = vector.broadcast %62 : vector<1x128xf32> to vector<32x128xf32>
    %194 = arith.mulf %192, %193 : vector<32x128xf32>
    %195 = vector.broadcast %64 : vector<1x128xf32> to vector<32x128xf32>
    %196 = arith.addf %194, %195 : vector<32x128xf32>
    %c1 = arith.constant 1 : index
    %c0_78 = arith.constant 0 : index
    %c0_79 = arith.constant 0 : index
    %197 = vector.load %arg4[%c1, %c0_78, %c0_79] : memref<2x128x384xbf16, #tpu.memory_space<vmem>>, vector<1x128x384xbf16>
    %198 = vector.shape_cast %197 : vector<1x128x384xbf16> to vector<128x384xbf16>
    %c1_80 = arith.constant 1 : index
    %c0_81 = arith.constant 0 : index
    %c0_82 = arith.constant 0 : index
    %199 = vector.load %arg5[%c1_80, %c0_81, %c0_82] : memref<2x1x384xf32, #tpu.memory_space<vmem>>, vector<1x1x384xf32>
    %200 = vector.shape_cast %199 : vector<1x1x384xf32> to vector<1x384xf32>
    %c1_83 = arith.constant 1 : index
    %c0_84 = arith.constant 0 : index
    %c0_85 = arith.constant 0 : index
    %201 = vector.load %arg6[%c1_83, %c0_84, %c0_85] : memref<2x128x128xbf16, #tpu.memory_space<vmem>>, vector<1x128x128xbf16>
    %202 = vector.shape_cast %201 : vector<1x128x128xbf16> to vector<128x128xbf16>
    %c1_86 = arith.constant 1 : index
    %c0_87 = arith.constant 0 : index
    %c0_88 = arith.constant 0 : index
    %203 = vector.load %arg7[%c1_86, %c0_87, %c0_88] : memref<2x1x128xf32, #tpu.memory_space<vmem>>, vector<1x1x128xf32>
    %204 = vector.shape_cast %203 : vector<1x1x128xf32> to vector<1x128xf32>
    %c1_89 = arith.constant 1 : index
    %c0_90 = arith.constant 0 : index
    %c0_91 = arith.constant 0 : index
    %205 = vector.load %arg10[%c1_89, %c0_90, %c0_91] : memref<2x128x128xbf16, #tpu.memory_space<vmem>>, vector<1x128x128xbf16>
    %206 = vector.shape_cast %205 : vector<1x128x128xbf16> to vector<128x128xbf16>
    %c1_92 = arith.constant 1 : index
    %c0_93 = arith.constant 0 : index
    %c0_94 = arith.constant 0 : index
    %207 = vector.load %arg11[%c1_92, %c0_93, %c0_94] : memref<2x1x128xf32, #tpu.memory_space<vmem>>, vector<1x1x128xf32>
    %208 = vector.shape_cast %207 : vector<1x1x128xf32> to vector<1x128xf32>
    %c1_95 = arith.constant 1 : index
    %c0_96 = arith.constant 0 : index
    %c0_97 = arith.constant 0 : index
    %209 = vector.load %arg12[%c1_95, %c0_96, %c0_97] : memref<2x128x128xbf16, #tpu.memory_space<vmem>>, vector<1x128x128xbf16>
    %210 = vector.shape_cast %209 : vector<1x128x128xbf16> to vector<128x128xbf16>
    %c1_98 = arith.constant 1 : index
    %c0_99 = arith.constant 0 : index
    %c0_100 = arith.constant 0 : index
    %211 = vector.load %arg13[%c1_98, %c0_99, %c0_100] : memref<2x1x128xf32, #tpu.memory_space<vmem>>, vector<1x1x128xf32>
    %212 = vector.shape_cast %211 : vector<1x1x128xf32> to vector<1x128xf32>
    %c1_101 = arith.constant 1 : index
    %c0_102 = arith.constant 0 : index
    %c0_103 = arith.constant 0 : index
    %213 = vector.load %arg8[%c1_101, %c0_102, %c0_103] : memref<2x1x128xf32, #tpu.memory_space<vmem>>, vector<1x1x128xf32>
    %214 = vector.shape_cast %213 : vector<1x1x128xf32> to vector<1x128xf32>
    %c1_104 = arith.constant 1 : index
    %c0_105 = arith.constant 0 : index
    %c0_106 = arith.constant 0 : index
    %215 = vector.load %arg9[%c1_104, %c0_105, %c0_106] : memref<2x1x128xf32, #tpu.memory_space<vmem>>, vector<1x1x128xf32>
    %216 = vector.shape_cast %215 : vector<1x1x128xf32> to vector<1x128xf32>
    %c1_107 = arith.constant 1 : index
    %c0_108 = arith.constant 0 : index
    %c0_109 = arith.constant 0 : index
    %217 = vector.load %arg14[%c1_107, %c0_108, %c0_109] : memref<2x1x128xf32, #tpu.memory_space<vmem>>, vector<1x1x128xf32>
    %218 = vector.shape_cast %217 : vector<1x1x128xf32> to vector<1x128xf32>
    %c1_110 = arith.constant 1 : index
    %c0_111 = arith.constant 0 : index
    %c0_112 = arith.constant 0 : index
    %219 = vector.load %arg15[%c1_110, %c0_111, %c0_112] : memref<2x1x128xf32, #tpu.memory_space<vmem>>, vector<1x1x128xf32>
    %220 = vector.shape_cast %219 : vector<1x1x128xf32> to vector<1x128xf32>
    %221 = arith.truncf %196 : vector<32x128xf32> to vector<32x128xbf16>
    %cst_113 = arith.constant dense<0.000000e+00> : vector<32x384xf32>
    %222 = tpu.matmul %221, %198, %cst_113 {dimension_numbers = #tpu.dot_dimension_numbers<[1], [0], [0], [1], [0, 0, 1, 1], [], []>} : vector<32x128xbf16>, vector<128x384xbf16>, vector<32x384xf32> -> vector<32x384xf32>
    %223 = vector.broadcast %200 : vector<1x384xf32> to vector<32x384xf32>
    %224 = arith.addf %222, %223 : vector<32x384xf32>
    %225 = vector.extract_strided_slice %224 {offsets = [0, 0], sizes = [32, 128], strides = [1, 1]} : vector<32x384xf32> to vector<32x128xf32>
    %226 = vector.shape_cast %225 : vector<32x128xf32> to vector<4x8x128xf32>
    %227 = vector.extract_strided_slice %224 {offsets = [0, 128], sizes = [32, 128], strides = [1, 1]} : vector<32x384xf32> to vector<32x128xf32>
    %228 = vector.shape_cast %227 : vector<32x128xf32> to vector<4x8x128xf32>
    %229 = vector.extract_strided_slice %224 {offsets = [0, 256], sizes = [32, 128], strides = [1, 1]} : vector<32x384xf32> to vector<32x128xf32>
    %230 = vector.shape_cast %229 : vector<32x128xf32> to vector<4x8x128xf32>
    %231 = arith.truncf %228 : vector<4x8x128xf32> to vector<4x8x128xbf16>
    %cst_114 = arith.constant 0.000000e+00 : f32
    %232 = vector.broadcast %cst_114 : f32 to vector<4x8x128xf32>
    %233 = vector.broadcast %7 : vector<1x1x128xf32> to vector<4x8x128xf32>
    %234 = arith.mulf %226, %233 : vector<4x8x128xf32>
    %235 = arith.truncf %234 : vector<4x8x128xf32> to vector<4x8x128xbf16>
    "tpu.trace_start"() <{level = 10 : i32, message = "bqd,bkd->bqk"}> : () -> ()
    %cst_115 = arith.constant dense<0.000000e+00> : vector<4x8x8xf32>
    %236 = tpu.matmul %235, %231, %cst_115 {dimension_numbers = #tpu.dot_dimension_numbers<[2], [2], [1], [1], [0, 0, 0, 1, 1, 1], [0], [0]>} : vector<4x8x128xbf16>, vector<4x8x128xbf16>, vector<4x8x8xf32> -> vector<4x8x8xf32>
    "tpu.trace_stop"() : () -> ()
    %cst_116 = arith.constant 2.500000e-01 : f32
    %237 = vector.broadcast %cst_116 : f32 to vector<4x8x8xf32>
    %238 = arith.mulf %236, %237 : vector<4x8x8xf32>
    %239 = vector.broadcast %15 : vector<4x1x8xf32> to vector<4x8x8xf32>
    %240 = arith.addf %238, %239 : vector<4x8x8xf32>
    %cst_117 = arith.constant dense<0xFF800000> : vector<4x8xf32>
    %241 = vector.multi_reduction <maximumf>, %240, %cst_117 [2] : vector<4x8x8xf32> to vector<4x8xf32>
    %242 = vector.shape_cast %241 : vector<4x8xf32> to vector<4x8x1xf32>
    %243 = vector.broadcast %242 : vector<4x8x1xf32> to vector<4x8x8xf32>
    %244 = arith.subf %240, %243 : vector<4x8x8xf32>
    %245 = math.exp %244 : vector<4x8x8xf32>
    %cst_118 = arith.constant dense<0.000000e+00> : vector<4x8xf32>
    %246 = vector.multi_reduction <add>, %245, %cst_118 [2] : vector<4x8x8xf32> to vector<4x8xf32>
    %247 = vector.shape_cast %246 : vector<4x8xf32> to vector<4x8x1xf32>
    %248 = tpu.reciprocal %247 {approx = true} : vector<4x8x1xf32> -> vector<4x8x1xf32>
    %249 = vector.broadcast %248 : vector<4x8x1xf32> to vector<4x8x8xf32>
    %250 = arith.mulf %245, %249 : vector<4x8x8xf32>
    %251 = vector.broadcast %7 : vector<1x1x128xf32> to vector<4x8x128xf32>
    %252 = arith.mulf %230, %251 : vector<4x8x128xf32>
    %253 = arith.truncf %252 : vector<4x8x128xf32> to vector<4x8x128xbf16>
    %254 = arith.truncf %250 : vector<4x8x8xf32> to vector<4x8x8xbf16>
    "tpu.trace_start"() <{level = 10 : i32, message = "bqk,bkd->bqd"}> : () -> ()
    %cst_119 = arith.constant dense<0.000000e+00> : vector<4x8x128xf32>
    %255 = tpu.matmul %254, %253, %cst_119 {dimension_numbers = #tpu.dot_dimension_numbers<[2], [1], [1], [2], [0, 0, 0, 1, 1, 2], [0], [0]>} : vector<4x8x8xbf16>, vector<4x8x128xbf16>, vector<4x8x128xf32> -> vector<4x8x128xf32>
    "tpu.trace_stop"() : () -> ()
    %256 = arith.addf %232, %255 : vector<4x8x128xf32>
    %257 = vector.broadcast %14 : vector<1x1x128xf32> to vector<4x8x128xf32>
    %258 = arith.mulf %226, %257 : vector<4x8x128xf32>
    %259 = arith.truncf %258 : vector<4x8x128xf32> to vector<4x8x128xbf16>
    "tpu.trace_start"() <{level = 10 : i32, message = "bqd,bkd->bqk"}> : () -> ()
    %cst_120 = arith.constant dense<0.000000e+00> : vector<4x8x8xf32>
    %260 = tpu.matmul %259, %231, %cst_120 {dimension_numbers = #tpu.dot_dimension_numbers<[2], [2], [1], [1], [0, 0, 0, 1, 1, 1], [0], [0]>} : vector<4x8x128xbf16>, vector<4x8x128xbf16>, vector<4x8x8xf32> -> vector<4x8x8xf32>
    "tpu.trace_stop"() : () -> ()
    %cst_121 = arith.constant 2.500000e-01 : f32
    %261 = vector.broadcast %cst_121 : f32 to vector<4x8x8xf32>
    %262 = arith.mulf %260, %261 : vector<4x8x8xf32>
    %263 = vector.broadcast %15 : vector<4x1x8xf32> to vector<4x8x8xf32>
    %264 = arith.addf %262, %263 : vector<4x8x8xf32>
    %cst_122 = arith.constant dense<0xFF800000> : vector<4x8xf32>
    %265 = vector.multi_reduction <maximumf>, %264, %cst_122 [2] : vector<4x8x8xf32> to vector<4x8xf32>
    %266 = vector.shape_cast %265 : vector<4x8xf32> to vector<4x8x1xf32>
    %267 = vector.broadcast %266 : vector<4x8x1xf32> to vector<4x8x8xf32>
    %268 = arith.subf %264, %267 : vector<4x8x8xf32>
    %269 = math.exp %268 : vector<4x8x8xf32>
    %cst_123 = arith.constant dense<0.000000e+00> : vector<4x8xf32>
    %270 = vector.multi_reduction <add>, %269, %cst_123 [2] : vector<4x8x8xf32> to vector<4x8xf32>
    %271 = vector.shape_cast %270 : vector<4x8xf32> to vector<4x8x1xf32>
    %272 = tpu.reciprocal %271 {approx = true} : vector<4x8x1xf32> -> vector<4x8x1xf32>
    %273 = vector.broadcast %272 : vector<4x8x1xf32> to vector<4x8x8xf32>
    %274 = arith.mulf %269, %273 : vector<4x8x8xf32>
    %275 = vector.broadcast %14 : vector<1x1x128xf32> to vector<4x8x128xf32>
    %276 = arith.mulf %230, %275 : vector<4x8x128xf32>
    %277 = arith.truncf %276 : vector<4x8x128xf32> to vector<4x8x128xbf16>
    %278 = arith.truncf %274 : vector<4x8x8xf32> to vector<4x8x8xbf16>
    "tpu.trace_start"() <{level = 10 : i32, message = "bqk,bkd->bqd"}> : () -> ()
    %cst_124 = arith.constant dense<0.000000e+00> : vector<4x8x128xf32>
    %279 = tpu.matmul %278, %277, %cst_124 {dimension_numbers = #tpu.dot_dimension_numbers<[2], [1], [1], [2], [0, 0, 0, 1, 1, 2], [0], [0]>} : vector<4x8x8xbf16>, vector<4x8x128xbf16>, vector<4x8x128xf32> -> vector<4x8x128xf32>
    "tpu.trace_stop"() : () -> ()
    %280 = arith.addf %256, %279 : vector<4x8x128xf32>
    %281 = vector.shape_cast %280 : vector<4x8x128xf32> to vector<32x128xf32>
    %282 = arith.truncf %281 : vector<32x128xf32> to vector<32x128xbf16>
    %cst_125 = arith.constant dense<0.000000e+00> : vector<32x128xf32>
    %283 = tpu.matmul %282, %202, %cst_125 {dimension_numbers = #tpu.dot_dimension_numbers<[1], [0], [0], [1], [0, 0, 1, 1], [], []>} : vector<32x128xbf16>, vector<128x128xbf16>, vector<32x128xf32> -> vector<32x128xf32>
    %284 = vector.broadcast %204 : vector<1x128xf32> to vector<32x128xf32>
    %285 = arith.addf %283, %284 : vector<32x128xf32>
    %286 = arith.addf %196, %285 : vector<32x128xf32>
    %cst_126 = arith.constant dense<0.000000e+00> : vector<32xf32>
    %287 = vector.multi_reduction <add>, %286, %cst_126 [1] : vector<32x128xf32> to vector<32xf32>
    %288 = vector.shape_cast %287 : vector<32xf32> to vector<32x1xf32>
    %cst_127 = arith.constant 3.125000e-02 : f32
    %289 = vector.broadcast %cst_127 : f32 to vector<32x1xf32>
    %290 = arith.mulf %288, %289 : vector<32x1xf32>
    %291 = arith.mulf %286, %286 : vector<32x128xf32>
    %cst_128 = arith.constant dense<0.000000e+00> : vector<32xf32>
    %292 = vector.multi_reduction <add>, %291, %cst_128 [1] : vector<32x128xf32> to vector<32xf32>
    %293 = vector.shape_cast %292 : vector<32xf32> to vector<32x1xf32>
    %cst_129 = arith.constant 3.125000e-02 : f32
    %294 = vector.broadcast %cst_129 : f32 to vector<32x1xf32>
    %295 = arith.mulf %293, %294 : vector<32x1xf32>
    %296 = arith.mulf %290, %290 : vector<32x1xf32>
    %297 = arith.subf %295, %296 : vector<32x1xf32>
    %298 = vector.broadcast %290 : vector<32x1xf32> to vector<32x128xf32>
    %299 = arith.subf %286, %298 : vector<32x128xf32>
    %cst_130 = arith.constant 9.99999996E-13 : f32
    %300 = vector.broadcast %cst_130 : f32 to vector<32x1xf32>
    %301 = arith.addf %297, %300 : vector<32x1xf32>
    %302 = math.rsqrt %301 : vector<32x1xf32>
    %303 = vector.broadcast %302 : vector<32x1xf32> to vector<32x128xf32>
    %304 = arith.mulf %299, %303 : vector<32x128xf32>
    %305 = vector.broadcast %214 : vector<1x128xf32> to vector<32x128xf32>
    %306 = arith.mulf %304, %305 : vector<32x128xf32>
    %307 = vector.broadcast %216 : vector<1x128xf32> to vector<32x128xf32>
    %308 = arith.addf %306, %307 : vector<32x128xf32>
    %309 = arith.truncf %308 : vector<32x128xf32> to vector<32x128xbf16>
    %cst_131 = arith.constant dense<0.000000e+00> : vector<32x128xf32>
    %310 = tpu.matmul %309, %206, %cst_131 {dimension_numbers = #tpu.dot_dimension_numbers<[1], [0], [0], [1], [0, 0, 1, 1], [], []>} : vector<32x128xbf16>, vector<128x128xbf16>, vector<32x128xf32> -> vector<32x128xf32>
    %311 = vector.broadcast %208 : vector<1x128xf32> to vector<32x128xf32>
    %312 = arith.addf %310, %311 : vector<32x128xf32>
    %313 = arith.mulf %312, %312 : vector<32x128xf32>
    %314 = arith.mulf %312, %313 : vector<32x128xf32>
    %cst_132 = arith.constant 4.471500e-02 : f32
    %315 = vector.broadcast %cst_132 : f32 to vector<32x128xf32>
    %316 = arith.mulf %315, %314 : vector<32x128xf32>
    %317 = arith.addf %312, %316 : vector<32x128xf32>
    %cst_133 = arith.constant 0.797884583 : f32
    %318 = vector.broadcast %cst_133 : f32 to vector<32x128xf32>
    %319 = arith.mulf %318, %317 : vector<32x128xf32>
    %320 = math.tanh %319 : vector<32x128xf32>
    %cst_134 = arith.constant 1.000000e+00 : f32
    %321 = vector.broadcast %cst_134 : f32 to vector<32x128xf32>
    %322 = arith.addf %321, %320 : vector<32x128xf32>
    %cst_135 = arith.constant 5.000000e-01 : f32
    %323 = vector.broadcast %cst_135 : f32 to vector<32x128xf32>
    %324 = arith.mulf %323, %322 : vector<32x128xf32>
    %325 = arith.mulf %312, %324 : vector<32x128xf32>
    %326 = arith.truncf %325 : vector<32x128xf32> to vector<32x128xbf16>
    %cst_136 = arith.constant dense<0.000000e+00> : vector<32x128xf32>
    %327 = tpu.matmul %326, %210, %cst_136 {dimension_numbers = #tpu.dot_dimension_numbers<[1], [0], [0], [1], [0, 0, 1, 1], [], []>} : vector<32x128xbf16>, vector<128x128xbf16>, vector<32x128xf32> -> vector<32x128xf32>
    %328 = vector.broadcast %212 : vector<1x128xf32> to vector<32x128xf32>
    %329 = arith.addf %327, %328 : vector<32x128xf32>
    %330 = arith.addf %308, %329 : vector<32x128xf32>
    %cst_137 = arith.constant dense<0.000000e+00> : vector<32xf32>
    %331 = vector.multi_reduction <add>, %330, %cst_137 [1] : vector<32x128xf32> to vector<32xf32>
    %332 = vector.shape_cast %331 : vector<32xf32> to vector<32x1xf32>
    %cst_138 = arith.constant 3.125000e-02 : f32
    %333 = vector.broadcast %cst_138 : f32 to vector<32x1xf32>
    %334 = arith.mulf %332, %333 : vector<32x1xf32>
    %335 = arith.mulf %330, %330 : vector<32x128xf32>
    %cst_139 = arith.constant dense<0.000000e+00> : vector<32xf32>
    %336 = vector.multi_reduction <add>, %335, %cst_139 [1] : vector<32x128xf32> to vector<32xf32>
    %337 = vector.shape_cast %336 : vector<32xf32> to vector<32x1xf32>
    %cst_140 = arith.constant 3.125000e-02 : f32
    %338 = vector.broadcast %cst_140 : f32 to vector<32x1xf32>
    %339 = arith.mulf %337, %338 : vector<32x1xf32>
    %340 = arith.mulf %334, %334 : vector<32x1xf32>
    %341 = arith.subf %339, %340 : vector<32x1xf32>
    %342 = vector.broadcast %334 : vector<32x1xf32> to vector<32x128xf32>
    %343 = arith.subf %330, %342 : vector<32x128xf32>
    %cst_141 = arith.constant 9.99999996E-13 : f32
    %344 = vector.broadcast %cst_141 : f32 to vector<32x1xf32>
    %345 = arith.addf %341, %344 : vector<32x1xf32>
    %346 = math.rsqrt %345 : vector<32x1xf32>
    %347 = vector.broadcast %346 : vector<32x1xf32> to vector<32x128xf32>
    %348 = arith.mulf %343, %347 : vector<32x128xf32>
    %349 = vector.broadcast %218 : vector<1x128xf32> to vector<32x128xf32>
    %350 = arith.mulf %348, %349 : vector<32x128xf32>
    %351 = vector.broadcast %220 : vector<1x128xf32> to vector<32x128xf32>
    %352 = arith.addf %350, %351 : vector<32x128xf32>
    %353 = vector.shape_cast %352 : vector<32x128xf32> to vector<4x8x128xf32>
    %354 = vector.extract_strided_slice %353 {offsets = [0, 0, 0], sizes = [4, 1, 128], strides = [1, 1, 1]} : vector<4x8x128xf32> to vector<4x1x128xf32>
    %355 = vector.shape_cast %354 : vector<4x1x128xf32> to vector<4x128xf32>
    %356 = vector.extract_strided_slice %355 {offsets = [0, 0], sizes = [2, 128], strides = [1, 1]} : vector<4x128xf32> to vector<2x128xf32>
    %357 = vector.extract_strided_slice %355 {offsets = [2, 0], sizes = [2, 128], strides = [1, 1]} : vector<4x128xf32> to vector<2x128xf32>
    %358 = arith.mulf %356, %356 : vector<2x128xf32>
    %cst_142 = arith.constant dense<0.000000e+00> : vector<2xf32>
    %359 = vector.multi_reduction <add>, %358, %cst_142 [1] : vector<2x128xf32> to vector<2xf32>
    %360 = vector.shape_cast %359 : vector<2xf32> to vector<2x1xf32>
    %361 = math.sqrt %360 : vector<2x1xf32>
    %cst_143 = arith.constant 9.99999996E-13 : f32
    %362 = vector.broadcast %cst_143 : f32 to vector<2x1xf32>
    %363 = arith.maximumf %361, %362 : vector<2x1xf32>
    %364 = vector.broadcast %363 : vector<2x1xf32> to vector<2x128xf32>
    %365 = arith.divf %356, %364 : vector<2x128xf32>
    %366 = arith.mulf %357, %357 : vector<2x128xf32>
    %cst_144 = arith.constant dense<0.000000e+00> : vector<2xf32>
    %367 = vector.multi_reduction <add>, %366, %cst_144 [1] : vector<2x128xf32> to vector<2xf32>
    %368 = vector.shape_cast %367 : vector<2xf32> to vector<2x1xf32>
    %369 = math.sqrt %368 : vector<2x1xf32>
    %cst_145 = arith.constant 9.99999996E-13 : f32
    %370 = vector.broadcast %cst_145 : f32 to vector<2x1xf32>
    %371 = arith.maximumf %369, %370 : vector<2x1xf32>
    %372 = vector.broadcast %371 : vector<2x1xf32> to vector<2x128xf32>
    %373 = arith.divf %357, %372 : vector<2x128xf32>
    %374 = tpu.transpose %373, [1, 0] : vector<2x128xf32> -> vector<128x2xf32>
    %cst_146 = arith.constant dense<0.000000e+00> : vector<2x2xf32>
    %375 = tpu.matmul %365, %374, %cst_146 {dimension_numbers = #tpu.dot_dimension_numbers<[1], [0], [0], [1], [0, 0, 1, 1], [], []>} : vector<2x128xf32>, vector<128x2xf32>, vector<2x2xf32> -> vector<2x2xf32>
    %cst_147 = arith.constant 2.000000e+01 : f32
    %376 = vector.broadcast %cst_147 : f32 to vector<2x2xf32>
    %377 = arith.mulf %375, %376 : vector<2x2xf32>
    %c0_148 = arith.constant 0 : index
    %c0_149 = arith.constant 0 : index
    %378 = vector.load %arg16[%c0_148, %c0_149] : memref<2x2xf32, #tpu.memory_space<vmem>>, vector<2x2xf32>
    tpu.vector_store %arg16[%c0_148, %c0_149], %377 {strides = array<i32>} : memref<2x2xf32, #tpu.memory_space<vmem>>, vector<2x2xf32>,
    %cst_150 = arith.constant dense<0xFF800000> : vector<2xf32>
    %379 = vector.multi_reduction <maximumf>, %377, %cst_150 [1] : vector<2x2xf32> to vector<2xf32>
    %380 = vector.shape_cast %379 : vector<2xf32> to vector<2x1xf32>
    %381 = vector.broadcast %380 : vector<2x1xf32> to vector<2x2xf32>
    %382 = arith.subf %377, %381 : vector<2x2xf32>
    %383 = math.exp %382 : vector<2x2xf32>
    %cst_151 = arith.constant dense<0.000000e+00> : vector<2xf32>
    %384 = vector.multi_reduction <add>, %383, %cst_151 [1] : vector<2x2xf32> to vector<2xf32>
    %385 = vector.shape_cast %384 : vector<2xf32> to vector<2x1xf32>
    %386 = math.log %385 : vector<2x1xf32>
    %387 = arith.addf %386, %380 : vector<2x1xf32>
    %388 = tpu.iota {dimensions = array<i32: 0>} : vector<2x2xi32>
    %389 = tpu.iota {dimensions = array<i32: 1>} : vector<2x2xi32>
    %390 = arith.cmpi eq, %388, %389 : vector<2x2xi32>
    %cst_152 = arith.constant 0.000000e+00 : f32
    %391 = vector.broadcast %cst_152 : f32 to vector<2x2xf32>
    %392 = arith.select %390, %377, %391 : vector<2x2xi1>, vector<2x2xf32>
    %cst_153 = arith.constant dense<0.000000e+00> : vector<2xf32>
    %393 = vector.multi_reduction <add>, %392, %cst_153 [1] : vector<2x2xf32> to vector<2xf32>
    %394 = vector.shape_cast %393 : vector<2xf32> to vector<2x1xf32>
    %395 = arith.subf %387, %394 : vector<2x1xf32>
    %396 = vector.shape_cast %395 : vector<2x1xf32> to vector<1x2x1xf32>
    %cst_154 = arith.constant dense<0.000000e+00> : vector<1xf32>
    %397 = vector.multi_reduction <add>, %396, %cst_154 [1, 2] : vector<1x2x1xf32> to vector<1xf32>
    %398 = vector.shape_cast %397 : vector<1xf32> to vector<1x1x1xf32>
    %399 = vector.extract %398[0, 0, 0] : f32 from vector<1x1x1xf32>
    %cst_155 = arith.constant 5.000000e-01 : f32
    %400 = arith.mulf %399, %cst_155 : f32
    %c0_156 = arith.constant 0 : index
    %401 = memref.load %arg17[%c0_156] : memref<1xf32, #tpu.memory_space<smem>>
    memref.store %400, %arg17[%c0_156] : memref<1xf32, #tpu.memory_space<smem>>
    return
  }
}

</mosaic_0001>

<bundles_post_ra>
// kernel: contrastive_sentence_forward.1
= control target key start
LH: loop header
LB: loop body
LE: loop exit
PB: predicated region body
PF: predicated region fallthrough
CT: control target
= control target key end

     0   :  { %s5749_s0 = inlined_call_operand.vmem [shape: f32[32,128], index: 0, kind: input, shape index: {}]   ;;  %s5750_s1 = inlined_call_operand.vmem [shape: f32[4,1,8], index: 1, kind: input, shape index: {}]   ;;  %s5751_s2 = inlined_call_operand.vmem [shape: f32[1,128], index: 2, kind: input, shape index: {}]   ;;  %s5752_s3 = inlined_call_operand.vmem [shape: f32[1,128], index: 3, kind: input, shape index: {}]   ;;  %s5753_s4 = inlined_call_operand.vmem [shape: bf16[2,128,384], index: 4, kind: input, shape index: {}]   ;;  %s5754_s5 = inlined_call_operand.vmem [shape: f32[2,1,384], index: 5, kind: input, shape index: {}]   ;;  %s5755_s6 = inlined_call_operand.hbm [shape: bf16[2,128,128], index: 6, kind: input, shape index: {}]   ;;  %s5756_s7 = inlined_call_operand.vmem [shape: f32[2,1,128], index: 7, kind: input, shape index: {}]   ;;  %s5757_s8 = inlined_call_operand.vmem [shape: f32[2,1,128], index: 8, kind: input, shape index: {}]   ;;  %s5758_s9 = inlined_call_operand.vmem [shape: f32[2,1,128], index: 9, kind: input, shape index: {}]   ;;  %s5759_s10 = inlined_call_operand.hbm [shape: bf16[2,128,128], index: 10, kind: input, shape index: {}]   ;;  %s5760_s11 = inlined_call_operand.vmem [shape: f32[2,1,128], index: 11, kind: input, shape index: {}]   ;;  %s5761_s12 = inlined_call_operand.hbm [shape: bf16[2,128,128], index: 12, kind: input, shape index: {}]   ;;  %s5762_s13 = inlined_call_operand.vmem [shape: f32[2,1,128], index: 13, kind: input, shape index: {}]   ;;  %s5763_s14 = inlined_call_operand.vmem [shape: f32[2,1,128], index: 14, kind: input, shape index: {}]   ;;  %s5764_s15 = inlined_call_operand.vmem [shape: f32[2,1,128], index: 15, kind: input, shape index: {}]   ;;  %s5765_s16 = inlined_call_operand.hbm [shape: f32[2,2], index: 16, kind: output, shape index: {0}]   ;;  %s5766_s17 = inlined_call_operand.hbm [shape: f32[1], index: 17, kind: output, shape index: {1}]  }
   0x1   :  { %5769 = sst [smem:[#allocation15_spill]] %s5749_s0 }
   0x2   :  { %5770 = sst [smem:[#allocation16_spill]] %s5750_s1 }
   0x3   :  { %23 = vsyncpa [#allocation3], 0 }
   0x4   :  { %24 = vsyncpa [#allocation7], 0 }
   0x5   :  { %25 = vsyncpa [#allocation4], 0 }
   0x6   :  { %26 = vsyncpa [#allocation5], 0  ;;  %s4860_s24 = smov [#allocation6]   ;;  %s4861_s26 = smov [#allocation2]  }
   0x7   :  { %s62_s25 = sshll.u32 %s4860_s24, 4  ;;  %s44_s27 = sshll.u32 %s4861_s26, 4  ;;  %s63_s25 = int_to_ptr.vmem [resolvable:$true] %s62_s25  ;;  %s4960_s27 = int_to_ptr.vmem [resolvable:$true] %s44_s27 }
   0x8   :  { %s4754_s0 = scalar_lea.hbm %s5759_s10, 2048 }
   0x9   :  { %p4755_p0 = scmp.ne.s32.totalorder %s5759_s10, %s4754_s0  ;;  %p4758_p1 = scmp.lt.u32.totalorder %s4754_s0, %s5759_s10 }
   0xb   :  { %p4760_p2 = pnand %p4758_p1, %p4755_p0 }
   0xd   :  { %4763 = shalt.err (!%p4760_p2)
}
   0xe   :  { %s4764_s20 = scalar_lea.vmem %s63_s25, 2048  ;;  %p4769_p4 = scmp.lt.s32.totalorder %s63_s25, %s63_s25 }
   0xf   :  { %p4765_p3 = scmp.ne.s32.totalorder %s63_s25, %s4764_s20  ;;  %p4770_p5 = scmp.lt.s32.totalorder %s4764_s20, %s4764_s20 }
  0x11   :  { %p4771_p6 = por %p4770_p5, %p4769_p4 }
  0x13   :  { %p4772_p7 = pnand %p4771_p6, %p4765_p3 }
  0x15   :  { %4775 = shalt.err (!%p4772_p7)
}
  0x16   :  { %s4862_s21 = smov 64   ;;  %s4863_s22 = smov 4  }
  0x17   :  { %68 = dma.hbm_to_vmem [thread:$0]  %s5759_s10, 2048, %s63_s25, [#allocation7], %s4862_s21, %s4862_s21, %s4863_s22  }
  0x18   :  { %s4776_s29 = scalar_lea.hbm %s5755_s6, 2048 }
  0x19   :  { %p4777_p8 = scmp.ne.s32.totalorder %s5755_s6, %s4776_s29  ;;  %p4780_p9 = scmp.lt.u32.totalorder %s4776_s29, %s5755_s6 }
  0x1b   :  { %p4782_p10 = pnand %p4780_p9, %p4777_p8 }
  0x1d   :  { %4785 = shalt.err (!%p4782_p10)
}
  0x1e   :  { %s4786_s1 = scalar_lea.vmem %s4960_s27, 2048  ;;  %p4791_p12 = scmp.lt.s32.totalorder %s4960_s27, %s4960_s27 }
  0x1f   :  { %p4787_p11 = scmp.ne.s32.totalorder %s4960_s27, %s4786_s1  ;;  %p4792_p13 = scmp.lt.s32.totalorder %s4786_s1, %s4786_s1 }
  0x21   :  { %p4793_p0 = por %p4792_p13, %p4791_p12 }
  0x23   :  { %p4794_p1 = pnand %p4793_p0, %p4787_p11 }
  0x25   :  { %4797 = shalt.err (!%p4794_p1)
}
  0x26   :  { %50 = dma.hbm_to_vmem [thread:$0]  %s5755_s6, 2048, %s4960_s27, [#allocation3], %s4862_s21, %s4862_s21, %s4863_s22  }
  0x27   :  { %s4864_s20 = smov [#allocation8]   ;;  %s4798_s28 = scalar_lea.hbm %s5761_s12, 2048 }
  0x28   :  { %s76_s23 = sshll.u32 %s4864_s20, 4  ;;  %p4799_p2 = scmp.ne.s32.totalorder %s5761_s12, %s4798_s28  ;;  %s77_s23 = int_to_ptr.vmem [resolvable:$true] %s76_s23 }
  0x29   :  { %p4802_p3 = scmp.lt.u32.totalorder %s4798_s28, %s5761_s12 }
  0x2b   :  { %p4804_p4 = pnand %p4802_p3, %p4799_p2 }
  0x2d   :  { %4807 = shalt.err (!%p4804_p4)
}
  0x2e   :  { %s4808_s19 = scalar_lea.vmem %s77_s23, 2048  ;;  %p4813_p6 = scmp.lt.s32.totalorder %s77_s23, %s77_s23 }
  0x2f   :  { %p4809_p5 = scmp.ne.s32.totalorder %s77_s23, %s4808_s19  ;;  %p4814_p7 = scmp.lt.s32.totalorder %s4808_s19, %s4808_s19 }
  0x31   :  { %p4815_p8 = por %p4814_p7, %p4813_p6 }
  0x33   :  { %p4816_p9 = pnand %p4815_p8, %p4809_p5 }
  0x35   :  { %4819 = shalt.err (!%p4816_p9)
}
  0x36   :  { %82 = dma.hbm_to_vmem [thread:$0]  %s5761_s12, 2048, %s77_s23, [#allocation7], %s4862_s21, %s4862_s21, %s4863_s22  }
  0x37   :  { %4852 = dma.done.wait [#allocation3], 2048  }
  0x38   :  { %4853 = vsyncadd [#allocation3], 4294965248 }
  0x39   :  { %4854 = dma.done.wait [#allocation7], 4096  }
  0x3a   :  { %4855 = vsyncadd [#allocation7], 4294963200  ;;  %s5771_s25 = sld [smem:[#allocation15_spill]]  ;;  %v4502_v3 = vld [vmem:[%s5753_s4 + $0x4] ss:$12 sps:$4 sm:$0xff]   ;;  %v4865_v30 = vmov 0  }
  0x3b   :  { %427 = vmatprep.subr.bf16.mxu0 %v4502_v3  ;;  %v4504_v9 = vld [vmem:[%s5753_s4] ss:$12 sps:$4 sm:$0xff]   ;;  %v4505_v10 = vld [vmem:[%s5753_s4 + $0x1c] ss:$12 sps:$4 sm:$0xff]   ;;  %v4507_v11 = vld [vmem:[%s5753_s4 + $0x18] ss:$12 sps:$4 sm:$0xff]   ;;  %459 = vmatprep.mubr.bf16.mxu0 %v4865_v30 }
  0x3c   :  { %428 = vmatpush1.bf16.msra.mxu0 %v4504_v9  ;;  %v4508_v12 = vld [vmem:[%s5753_s4 + $0x34] ss:$12 sps:$4 sm:$0xff]   ;;  %v4511_v14 = vld [vmem:[%s5753_s4 + $0x30] ss:$12 sps:$4 sm:$0xff]   ;;  %v4512_v15 = vld [vmem:[%s5753_s4 + $0x4c] ss:$12 sps:$4 sm:$0xff]  }
  0x3d   :  { %429 = vmatprep.subr.bf16.mxu0 %v4505_v10  ;;  %v4510_v13 = vld [vmem:[%s5753_s4 + $0x8] ss:$12 sps:$4 sm:$0xff]   ;;  %v4514_v16 = vld [vmem:[%s5753_s4 + $0x20] ss:$12 sps:$4 sm:$0xff]   ;;  %v4516_v18 = vld [vmem:[%s5753_s4 + $0x64] ss:$12 sps:$4 sm:$0xff]  }
  0x3e   :  { %4101 = vmatprep.subr.bf16.mxu1 %v4510_v13  ;;  %v4515_v17 = vld [vmem:[%s5753_s4 + $0x48] ss:$12 sps:$4 sm:$0xff]   ;;  %v4518_v19 = vld [vmem:[%s5753_s4 + $0x38] ss:$12 sps:$4 sm:$0xff]   ;;  %v4519_v20 = vld [vmem:[%s5753_s4 + $0x60] ss:$12 sps:$4 sm:$0xff]  }
  0x3f   :  { %4102 = vmatpush3.bf16.msra.mxu1 %v4510_v13  ;;  %v4520_v21 = vld [vmem:[%s5753_s4 + $0x7c] ss:$12 sps:$4 sm:$0xff]   ;;  %v4523_v23 = vld [vmem:[%s5753_s4 + $0x78] ss:$12 sps:$4 sm:$0xff]   ;;  %v4524_v24 = vld [vmem:[%s5753_s4 + $0x94] ss:$12 sps:$4 sm:$0xff]  }
  0x40   :  { %v5015_v0 = vld [vmem:[%s5771_s25] sm:$0xff]  ;;  %v5020_v1 = vld [vmem:[%s5771_s25 + $0x8] sm:$0xff]  ;;  %v5033_v5 = vld [vmem:[%s5771_s25 + $0x10] sm:$0xff]  ;;  %430 = vmatpush1.bf16.msra.mxu0 %v4507_v11  ;;  %4103 = vmatprep.subr.bf16.mxu1 %v4514_v16  ;;  %v4866_v33 = vmov 0.0   ;;  %vm4867_vm0 = vmmov 0   ;;  %vm1025_vm5 = vcmask 1043456  }
  0x41   :  { %121 = vadd.xlane.f32.xlu0 %v5015_v0  ;;  %v133_v2 = vmul.f32 %v5015_v0, %v5015_v0  ;;  %v134_v4 = vmul.f32 %v5020_v1, %v5020_v1  ;;  %v5039_v6 = vld [vmem:[%s5771_s25 + $0x18] sm:$0xff]  ;;  %v135_v7 = vmul.f32 %v5033_v5, %v5033_v5  ;;  %431 = vmatprep.subr.bf16.mxu0 %v4508_v12  ;;  %v4526_v25 = vld [vmem:[%s5753_s4 + $0x68] ss:$12 sps:$4 sm:$0xff]   ;;  %v4530_v28 = vld [vmem:[%s5753_s4 + $0x80] ss:$12 sps:$4 sm:$0xff]   ;;  %s5772_s26 = sld [smem:[#allocation16_spill]] }
  0x42   :  { %v136_v8 = vmul.f32 %v5039_v6, %v5039_v6  ;;  %v4522_v22 = vld [vmem:[%s5753_s4 + $0x50] ss:$12 sps:$4 sm:$0xff]   ;;  %v4528_v27 = vld [vmem:[%s5753_s4 + $0xac] ss:$12 sps:$4 sm:$0xff]   ;;  %v4531_v29 = vld [vmem:[%s5753_s4 + $0xa8] ss:$12 sps:$4 sm:$0xff]  }
  0x43   :  { %137 = vadd.xlane.f32.xlu1 %v133_v2  ;;  %4104 = vmatpush3.bf16.msra.mxu1 %v4514_v16  ;;  %v4527_v26 = vld [vmem:[%s5753_s4 + $0x90] ss:$12 sps:$4 sm:$0xff]   ;;  %v4532_v31 = vld [vmem:[%s5753_s4 + $0x98] ss:$12 sps:$4 sm:$0xff]   ;;  %v3783_v3 = vld [vmem:[%s5751_s2] ss:$0 sm:$0xff] }
  0x44   :  { %432 = vmatpush1.bf16.msra.mxu0 %v4511_v14  ;;  %4105 = vmatprep.subr.bf16.mxu1 %v4518_v19  ;;  %v4533_v32 = vld [vmem:[%s5753_s4 + $0xb0] ss:$12 sps:$4 sm:$0xff]   ;;  %v3784_v10 = vld [vmem:[%s5752_s3] ss:$0 sm:$0xff]  ;;  %vm733_vm6 = vcmask 64512   ;;  %vm3586_vm7 = vcmask 1041409  }
  0x45   :  { %123 = vadd.xlane.f32.xlu0 %v5020_v1  ;;  %433 = vmatprep.subr.bf16.mxu0 %v4512_v15  ;;  %vm3589_vm8 = vcmask 1041408   ;;  %vm3716_vm13 = vcmask 9216   ;;  %vm3738_vm15 = vcmask 1024  }
  0x47   :  { %139 = vadd.xlane.f32.xlu1 %v134_v4  ;;  %4106 = vmatpush3.bf16.msra.mxu1 %v4518_v19 }
  0x48   :  { %434 = vmatpush1.bf16.msra.mxu0 %v4515_v17  ;;  %4107 = vmatprep.subr.bf16.mxu1 %v4522_v22 }
  0x49   :  { %125 = vadd.xlane.f32.xlu0 %v5033_v5  ;;  %435 = vmatprep.subr.bf16.mxu0 %v4516_v18 }
  0x4b   :  { %127 = vadd.xlane.f32.xlu1 %v5039_v6  ;;  %4108 = vmatpush3.bf16.msra.mxu1 %v4522_v22 }
  0x4c   :  { %436 = vmatpush1.bf16.msra.mxu0 %v4519_v20  ;;  %4109 = vmatprep.subr.bf16.mxu1 %v4526_v25 }
  0x4d   :  { %141 = vadd.xlane.f32.xlu0 %v135_v7  ;;  %437 = vmatprep.subr.bf16.mxu0 %v4520_v21 }
  0x4f   :  { %143 = vadd.xlane.f32.xlu1 %v136_v8  ;;  %4110 = vmatpush3.bf16.msra.mxu1 %v4526_v25  ;;  %v225_v25 = vld [vmem:[%s5754_s5] sm:$0x7] }
  0x50   :  { %438 = vmatpush1.bf16.msra.mxu0 %v4523_v23  ;;  %4111 = vmatprep.subr.bf16.mxu1 %v4530_v28 }
  0x51   :  { %439 = vmatprep.subr.bf16.mxu0 %v4524_v24 }
  0x53   :  { %4112 = vmatpush3.bf16.msra.mxu1 %v4530_v28 }
  0x54   :  { %440 = vmatpush1.bf16.msra.mxu0 %v4527_v26  ;;  %4113 = vmatprep.subr.bf16.mxu1 %v4532_v31 }
  0x55   :  { %441 = vmatprep.subr.bf16.mxu0 %v4528_v27 }
  0x57   :  { %4114 = vmatpush3.bf16.msra.mxu1 %v4532_v31 }
  0x58   :  { %442 = vmatpush1.bf16.msra.mxu0 %v4531_v29  ;;  %4115 = vmatprep.subr.bf16.mxu1 %v4533_v32 }
  0x59   :  { %4151 = vmatprep.subr.bf16.mxu0 %v4866_v33 }
  0x5b   :  { %4116 = vmatpush3.bf16.msra.mxu1 %v4533_v32 }
  0x5c   :  { %4121 = vmatprep.subr.bf16.mxu1 %v4866_v33 }
  0xce   :  { %v122_v34 = vpop.xlane.xlu0 %121 }
  0xcf   :  { %v129_v35 = vmul.f32 0.03125, %v122_v34 }
  0xd0   :  { %v138_v36 = vpop.xlane.xlu1 %137 }
  0xd1   :  { %v149_v37 = vmul.f32 %v129_v35, %v129_v35  ;;  %v145_v38 = vmul.f32 0.03125, %v138_v36  ;;  %v157_v61 = vsub.f32 %v5015_v0, %v129_v35 }
  0xd2   :  { %v124_v39 = vpop.xlane.xlu0 %123 }
  0xd3   :  { %v153_v40 = vsub.f32 %v145_v38, %v149_v37  ;;  %v130_v41 = vmul.f32 0.03125, %v124_v39 }
  0xd4   :  { %v140_v42 = vpop.xlane.xlu1 %139 }
  0xd5   :  { %v161_v43 = vadd.f32 1e-12, %v153_v40  ;;  %v150_v44 = vmul.f32 %v130_v41, %v130_v41  ;;  %v146_v45 = vmul.f32 0.03125, %v140_v42  ;;  %v158_v4 = vsub.f32 %v5020_v1, %v130_v41 }
  0xd6   :  { %v126_v46 = vpop.xlane.xlu0 %125 }
  0xd7   :  { %4614 = vrsqrt.f32 %v161_v43  ;;  %v154_v47 = vsub.f32 %v146_v45, %v150_v44  ;;  %v131_v48 = vmul.f32 0.03125, %v126_v46 }
  0xd8   :  { %v128_v49 = vpop.xlane.xlu1 %127 }
  0xd9   :  { %v162_v50 = vadd.f32 1e-12, %v154_v47  ;;  %v151_v51 = vmul.f32 %v131_v48, %v131_v48  ;;  %v132_v52 = vmul.f32 0.03125, %v128_v49  ;;  %v159_v0 = vsub.f32 %v5033_v5, %v131_v48 }
  0xda   :  { %v142_v53 = vpop.xlane.xlu0 %141 }
  0xdb   :  { %4616 = vrsqrt.f32 %v162_v50  ;;  %v152_v54 = vmul.f32 %v132_v52, %v132_v52  ;;  %v147_v55 = vmul.f32 0.03125, %v142_v53  ;;  %v160_v15 = vsub.f32 %v5039_v6, %v132_v52 }
  0xdc   :  { %v144_v56 = vpop.xlane.xlu1 %143  ;;  %v99_v6 = vlaneseq }
  0xdd   :  { %v155_v57 = vsub.f32 %v147_v55, %v151_v51  ;;  %v148_v58 = vmul.f32 0.03125, %v144_v56 }
  0xde   :  { %v5146_v23 = vshrl.u32 %v99_v6, 7  ;;  %v5153_v27 = vand.u32 127, %v99_v6 }
  0xdf   :  { %v163_v59 = vadd.f32 1e-12, %v155_v57  ;;  %v156_v60 = vsub.f32 %v148_v58, %v152_v54 }
  0xe0   :  { %v290_v24 = vsub.s32 1, %v5146_v23  ;;  %v286_v26 = vsub.s32 0, %v5146_v23  ;;  %vm102_vm1 = vcmp.lt.s32.totalorder %v5153_v27, 16  ;;  %v294_v34 = vsub.s32 2, %v5146_v23 }
  0xe1   :  { %v4615_v62 = vpop.eup %4614  ;;  %4618 = vrsqrt.f32 %v163_v59  ;;  %v164_v63 = vadd.f32 1e-12, %v156_v60  ;;  %vm106_vm2 = vcmp.ge.s32.totalorder %v5153_v27, 16  ;;  %vm107_vm3 = vcmp.lt.s32.totalorder %v5153_v27, 32 }
  0xe2   :  { %v169_v2 = vmul.f32 %v4615_v62, %v157_v61  ;;  %v291_v28 = vrot.slane %v225_v25, %v290_v24  ;;  %v287_v29 = vrot.slane %v225_v25, %v286_v26  ;;  %v5166_v39 = vsel %vm102_vm1, 1.0, %v4866_v33  ;;  %vm108_vm4 = vmand %vm106_vm2, %vm107_vm3 }
  0xe3   :  { %4620 = vrsqrt.f32 %v164_v63  ;;  %v5172_v43 = vrot.slane %v225_v25, %v294_v34  ;;  %v5179_v46 = vsel %vm108_vm4, 1.0, %v4866_v33  ;;  %vm3732_vm14 = vcmp.eq.s32.totalorder %v5146_v23, %v5153_v27 }
  0xe4   :  { %v179_v9 = vmul.f32 %v3783_v3, %v169_v2 }
  0xe5   :  { %v4617_v7 = vpop.eup %4616 }
  0xe6   :  { %v170_v8 = vmul.f32 %v4617_v7, %v158_v4  ;;  %v5128_v12 = vadd.f32 %v3784_v10, %v179_v9 }
  0xe8   :  { %v180_v11 = vmul.f32 %v3783_v3, %v170_v8 }
  0xea   :  { %v5130_v13 = vadd.f32 %v3784_v10, %v180_v11 }
  0xeb   :  { %v4619_v14 = vpop.eup %4618 }
  0xec   :  { %v281_v1 = vpack.c.bf16 %v5130_v13, %v5128_v12  ;;  %v171_v16 = vmul.f32 %v4619_v14, %v159_v0 }
  0xed   :  { %v4621_v17 = vpop.eup %4620 }
  0xee   :  { %460 = vmatmul.mubr.bf16.vlgmr.msra.gmra.mrb[0].mxu0 %v281_v1  ;;  %4117 = vmatprep.mubr.bf16.mxu1 %v281_v1  ;;  %v172_v18 = vmul.f32 %v4621_v17, %v160_v15  ;;  %v181_v19 = vmul.f32 %v3783_v3, %v171_v16 }
  0xef   :  { %469 = vmatprep.mubr.bf16.mxu0 %v4865_v30 }
  0xf0   :  { %v182_v20 = vmul.f32 %v3783_v3, %v172_v18  ;;  %v5136_v5 = vadd.f32 %v3784_v10, %v181_v19 }
  0xf2   :  { %v5138_v21 = vadd.f32 %v3784_v10, %v182_v20 }
  0xf4   :  { %v282_v22 = vpack.c.bf16 %v5138_v21, %v5136_v5 }
  0xf6   :  { %470 = vmatmul.mubr.bf16.gmra.mrb[4].mxu0 %v282_v22  ;;  %4118 = vmatmul.mubr.bf16.vlgmr.msra.gmra.mrb[0].mxu1 %v282_v22 }
  0xf7   :  { %4123 = vmatprep.mubr.msk.bf16.mxu1 %vm4867_vm0, %v4866_v33  ;;  %4153 = vmatprep.mubr.msk.bf16.mxu0 %vm4867_vm0, %v4866_v33 }
 0x1c1   :  { %v461_v31 = vpop.f32.mrb[0].mxu0 }
 0x1c2   :  { %v463_v32 = vpop.f32.mrb[1].mxu0  ;;  %v5163_v37 = vadd.f32 %v461_v31, %v287_v29 }
 0x1c3   :  { %v464_v35 = vadd.f32 %v463_v32, %v291_v28  ;;  %v465_v36 = vpop.f32.mrb[2].mxu0 }
 0x1c4   :  { %v467_v38 = vpop.f32.mrb[3].mxu0  ;;  %v466_v42 = vadd.f32 %v465_v36, %v287_v29  ;;  %v533_v45 = vmul.f32 %v5166_v39, %v5163_v37  ;;  %v790_v18 = vmul.f32 %v5179_v46, %v5163_v37  ;;  %v3810_v37 = vld [vmem:[%s5772_s26 + $0x1] ss:$0 sm:$0xff] }
 0x1c5   :  { %v5168_v40 = vpack.c.bf16 %v464_v35, %v464_v35  ;;  %v468_v41 = vadd.f32 %v467_v38, %v291_v28 }
 0x1c6   :  { %v791_v49 = vmul.f32 %v5179_v46, %v466_v42  ;;  %v537_v55 = vpack.c.bf16 %v533_v45, %v533_v45  ;;  %v534_v59 = vmul.f32 %v5166_v39, %v466_v42  ;;  %v794_v20 = vpack.c.bf16 %v790_v18, %v790_v18 }
 0x1c7   :  { %v530_v44 = vpack.c.bf16 %v468_v41, %v468_v41  ;;  %4122 = vmatpush3.bf16.xpose.msra.mxu1 %v5168_v40 }
 0x1c8   :  { %4127 = vmatprep.subr.bf16.mxu1 %v4866_v33  ;;  %v795_v58 = vpack.c.bf16 %v791_v49, %v791_v49  ;;  %v538_v7 = vpack.c.bf16 %v534_v59, %v534_v59 }
 0x1c9   :  { %v471_v47 = vpop.f32.mrb[4].mxu0  ;;  %v4119_v48 = vpop.f32.mrb[0].mxu1  ;;  %4152 = vmatpush3.bf16.xpose.msra.mxu0 %v530_v44 }
 0x1ca   :  { %v5183_v50 = vadd.f32 %v4119_v48, %v5172_v43  ;;  %v473_v51 = vpop.f32.mrb[5].mxu0  ;;  %v514_v52 = vpop.f32.mrb[1].mxu1  ;;  %4163 = vmatprep.subr.bf16.mxu0 %v4866_v33  ;;  %v472_v8 = vadd.f32 %v471_v47, %v287_v29 }
 0x1cb   :  { %v475_v53 = vpop.f32.mrb[6].mxu0  ;;  %v4120_v54 = vpop.f32.mrb[2].mxu1  ;;  %v474_v63 = vadd.f32 %v473_v51, %v291_v28  ;;  %v5221_v19 = vadd.f32 %v514_v52, %v5172_v43 }
 0x1cc   :  { %v477_v56 = vpop.f32.mrb[7].mxu0  ;;  %v517_v57 = vpop.f32.mrb[3].mxu1  ;;  %v5188_v60 = vadd.f32 %v4120_v54, %v5172_v43  ;;  %v476_v2 = vadd.f32 %v475_v53, %v287_v29  ;;  %v535_v0 = vmul.f32 %v5166_v39, %v472_v8  ;;  %v792_v6 = vmul.f32 %v5179_v46, %v472_v8  ;;  %v3812_v53 = vld [vmem:[%s5772_s26 + $0x3] ss:$0 sm:$0xff] }
 0x1cd   :  { %v478_v61 = vadd.f32 %v477_v56, %v291_v28  ;;  %v5191_v62 = vadd.f32 %v517_v57, %v5172_v43  ;;  %v531_v9 = vpack.c.bf16 %v474_v63, %v474_v63  ;;  %v1010_v22 = vmul.f32 %v5179_v46, %v5221_v19 }
 0x1ce   :  { %4124 = vmatmul.mubr.bf16.vlgmr.msra.gmra.mrb[4].mxu1 %v537_v55  ;;  %v793_v10 = vmul.f32 %v5179_v46, %v476_v2  ;;  %v539_v1 = vpack.c.bf16 %v535_v0, %v535_v0  ;;  %v536_v16 = vmul.f32 %v5166_v39, %v476_v2  ;;  %v796_v28 = vpack.c.bf16 %v792_v6, %v792_v6 }
 0x1cf   :  { %4128 = vmatpush3.bf16.xpose.msra.mxu1 %v530_v44  ;;  %4129 = vmatprep.mubr.msk.bf16.mxu1 %vm4867_vm0, %v4866_v33  ;;  %v532_v3 = vpack.c.bf16 %v478_v61, %v478_v61  ;;  %v1011_v4 = vmul.f32 %v5179_v46, %v5191_v62  ;;  %v1014_v25 = vpack.c.bf16 %v1010_v22, %v1010_v22  ;;  %v3809_v22 = vld [vmem:[%s5772_s26] ss:$0 sm:$0xff] }
 0x1d0   :  { %4154 = vmatmul.mubr.bf16.vlgmr.msra.gmra.mrb[8].mxu0 %v795_v58  ;;  %4133 = vmatprep.subr.bf16.mxu1 %v4866_v33  ;;  %v797_v14 = vpack.c.bf16 %v793_v10, %v793_v10  ;;  %v540_v17 = vpack.c.bf16 %v536_v16, %v536_v16 }
 0x1d1   :  { %4165 = vmatprep.mubr.msk.bf16.mxu0 %vm4867_vm0, %v4866_v33  ;;  %4164 = vmatpush3.bf16.xpose.msra.mxu0 %v532_v3  ;;  %v1015_v11 = vpack.c.bf16 %v1011_v4, %v1011_v4  ;;  %v1027_v29 = vsel %vm1025_vm5, %v1014_v25, 0 }
 0x1d2   :  { %4175 = vmatprep.subr.bf16.mxu0 %v4866_v33 }
 0x1d3   :  { %v1073_v15 = vsel %vm1025_vm5, %v1015_v11, 0 }
 0x1d6   :  { %4130 = vmatmul.mubr.bf16.vlgmr.msra.gmra.mrb[8].mxu1 %v538_v7 }
 0x1d7   :  { %4134 = vmatpush3.bf16.xpose.msra.mxu1 %v531_v9  ;;  %4135 = vmatprep.mubr.msk.bf16.mxu1 %vm4867_vm0, %v4866_v33 }
 0x1d8   :  { %4139 = vmatprep.subr.bf16.mxu1 %v4866_v33  ;;  %4166 = vmatmul.mubr.bf16.vlgmr.msra.gmra.mrb[12].mxu0 %v797_v14 }
 0x1d9   :  { %4176 = vmatpush3.bf16.msra.mxu0 %v1073_v15  ;;  %4177 = vmatprep.mubr.msk.bf16.mxu0 %vm4867_vm0, %v4866_v33 }
 0x1da   :  { %4187 = vmatprep.subr.bf16.mxu0 %v4866_v33 }
 0x1de   :  { %4136 = vmatmul.mubr.bf16.vlgmr.msra.gmra.mrb[12].mxu1 %v539_v1 }
 0x1df   :  { %4140 = vmatpush3.bf16.xpose.msra.mxu1 %v532_v3  ;;  %4141 = vmatprep.mubr.msk.bf16.mxu1 %vm4867_vm0, %v4866_v33 }
 0x1e0   :  { %4145 = vmatprep.subr.bf16.mxu1 %v4866_v33 }
 0x1e6   :  { %4142 = vmatmul.mubr.bf16.vlgmr.msra.gmra.mrb[16].mxu1 %v540_v17 }
 0x1e7   :  { %4146 = vmatpush3.bf16.xpose.msra.mxu1 %v5168_v40  ;;  %4147 = vmatprep.mubr.msk.bf16.mxu1 %vm4867_vm0, %v4866_v33 }
 0x1e8   :  { %4157 = vmatprep.subr.bf16.mxu1 %v4866_v33 }
 0x1ee   :  { %4148 = vmatmul.mubr.bf16.vlgmr.msra.gmra.mrb[20].mxu1 %v794_v20 }
 0x1ef   :  { %4158 = vmatpush3.bf16.xpose.msra.mxu1 %v531_v9  ;;  %4159 = vmatprep.mubr.msk.bf16.mxu1 %vm4867_vm0, %v4866_v33 }
 0x1f0   :  { %4169 = vmatprep.subr.bf16.mxu1 %v4866_v33 }
 0x1f6   :  { %4160 = vmatmul.mubr.bf16.vlgmr.msra.gmra.mrb[24].mxu1 %v796_v28 }
 0x1f7   :  { %4170 = vmatpush3.bf16.msra.mxu1 %v1027_v29  ;;  %4171 = vmatprep.mubr.msk.bf16.mxu1 %vm4867_vm0, %v4866_v33 }
 0x1f8   :  { %4181 = vmatprep.subr.bf16.mxu1 %v4866_v33 }
 0x2a1   :  { %v575_v31 = vpop.f32.mrb[4].mxu1 }
 0x2a2   :  { %v4125_v32 = vpop.f32.mrb[5].mxu1 }
 0x2a3   :  { %v578_v35 = vpop.f32.mrb[6].mxu1  ;;  %v872_v36 = vpop.f32.mrb[8].mxu0  ;;  %v701_v32 = vmul.f32 0.25, %v575_v31 }
 0x2a4   :  { %v959_v38 = vmul.f32 0.25, %v872_v36  ;;  %v4126_v40 = vpop.f32.mrb[7].mxu1  ;;  %v4155_v41 = vpop.f32.mrb[9].mxu0 }
 0x2a5   :  { %v875_v42 = vpop.f32.mrb[10].mxu0 }
 0x2a6   :  { %v4156_v43 = vpop.f32.mrb[11].mxu0  ;;  %v963_v44 = vadd.f32 %v3810_v37, %v959_v38  ;;  %v3811_v38 = vld [vmem:[%s5772_s26 + $0x2] ss:$0 sm:$0xff] }
 0x2a8   :  { %v969_v45 = vsel %vm733_vm6, %v963_v44, -inf }
 0x2a9   :  { %v615_v47 = vpop.f32.mrb[8].mxu1  ;;  %970 = vmax.xlane.f32.xlu1 %v969_v45  ;;  %v729_v45 = vadd.f32 %v3809_v22, %v701_v32 }
 0x2aa   :  { %v4131_v48 = vpop.f32.mrb[9].mxu1  ;;  %v702_v54 = vmul.f32 0.25, %v615_v47 }
 0x2ab   :  { %v618_v49 = vpop.f32.mrb[10].mxu1  ;;  %v952_v52 = vpop.f32.mrb[12].mxu0  ;;  %v734_v47 = vsel %vm733_vm6, %v729_v45, -inf }
 0x2ac   :  { %v4132_v51 = vpop.f32.mrb[11].mxu1  ;;  %v961_v55 = vmul.f32 0.25, %v952_v52  ;;  %v4167_v56 = vpop.f32.mrb[13].mxu0  ;;  %v730_v4 = vadd.f32 %v3810_v37, %v702_v54 }
 0x2ad   :  { %v955_v57 = vpop.f32.mrb[14].mxu0 }
 0x2ae   :  { %v4168_v58 = vpop.f32.mrb[15].mxu0  ;;  %v965_v61 = vadd.f32 %v3812_v53, %v961_v55  ;;  %v737_v8 = vsel %vm733_vm6, %v730_v4, -inf }
 0x2b0   :  { %v975_v2 = vsel %vm733_vm6, %v965_v61, -inf }
 0x2b1   :  { %v655_v59 = vpop.f32.mrb[12].mxu1  ;;  %976 = vmax.xlane.f32.xlu1 %v975_v2 }
 0x2b2   :  { %v4137_v63 = vpop.f32.mrb[13].mxu1  ;;  %v703_v42 = vmul.f32 0.25, %v655_v59 }
 0x2b3   :  { %v658_v3 = vpop.f32.mrb[14].mxu1 }
 0x2b4   :  { %v4138_v7 = vpop.f32.mrb[15].mxu1  ;;  %v731_v48 = vadd.f32 %v3811_v38, %v703_v42  ;;  %v1013_v42 = vmul.f32 %v5179_v46, %v5188_v60 }
 0x2b5   :  { %738 = vmax.xlane.f32.xlu1 %v737_v8 }
 0x2b6   :  { %v740_v31 = vsel %vm733_vm6, %v731_v48, -inf }
 0x2b9   :  { %v695_v9 = vpop.f32.mrb[16].mxu1 }
 0x2ba   :  { %v704_v10 = vmul.f32 0.25, %v695_v9  ;;  %v4143_v11 = vpop.f32.mrb[17].mxu1 }
 0x2bb   :  { %v698_v0 = vpop.f32.mrb[18].mxu1 }
 0x2bc   :  { %v4144_v14 = vpop.f32.mrb[19].mxu1  ;;  %v732_v15 = vadd.f32 %v3812_v53, %v704_v10 }
 0x2be   :  { %v743_v1 = vsel %vm733_vm6, %v732_v15, -inf }
 0x2bf   :  { %744 = vmax.xlane.f32.xlu1 %v743_v1 }
 0x2c1   :  { %v832_v16 = vpop.f32.mrb[20].mxu1 }
 0x2c2   :  { %v958_v17 = vmul.f32 0.25, %v832_v16  ;;  %v4149_v18 = vpop.f32.mrb[21].mxu1 }
 0x2c3   :  { %v835_v20 = vpop.f32.mrb[22].mxu1 }
 0x2c4   :  { %v4150_v6 = vpop.f32.mrb[23].mxu1  ;;  %v962_v25 = vadd.f32 %v3809_v22, %v958_v17 }
 0x2c6   :  { %v966_v28 = vsel %vm733_vm6, %v962_v25, -inf }
 0x2c7   :  { %967 = vmax.xlane.f32.xlu0 %v966_v28 }
 0x2c9   :  { %v912_v29 = vpop.f32.mrb[24].mxu1 }
 0x2ca   :  { %v960_v35 = vmul.f32 0.25, %v912_v29  ;;  %v4161_v36 = vpop.f32.mrb[25].mxu1 }
 0x2cb   :  { %v915_v37 = vpop.f32.mrb[26].mxu1 }
 0x2cc   :  { %v4162_v40 = vpop.f32.mrb[27].mxu1  ;;  %v964_v41 = vadd.f32 %v3811_v38, %v960_v35 }
 0x2ce   :  { %v972_v43 = vsel %vm733_vm6, %v964_v41, -inf }
 0x2cf   :  { %973 = vmax.xlane.f32.xlu0 %v972_v43 }
 0x2d3   :  { %735 = vmax.xlane.f32.xlu0 %v734_v47  ;;  %v1017_v47 = vpack.c.bf16 %v1013_v42, %v1013_v42  ;;  %v4534_v42 = vld [vmem:[#allocation2] sm:$0xff]  }
 0x2d7   :  { %741 = vmax.xlane.f32.xlu0 %v740_v31 }
 0x336   :  { %v971_v49 = vpop.xlane.xlu1 %970 }
 0x337   :  { %v979_v51 = vsub.f32 %v963_v44, %v971_v49 }
 0x339   :  { %v984_v52 = vmul.f32 1.442695, %v979_v51  ;;  %v1165_v51 = vsel %vm1025_vm5, %v1017_v47, 0  ;;  %v4538_v47 = vld [vmem:[#allocation2 + $0x20] sm:$0xff]  }
 0x33b   :  { %4622 = vpow2.f32 %v984_v52  ;;  %v779_v52 = vmul.f32 %v5166_v39, %v5191_v62 }
 0x33e   :  { %v977_v53 = vpop.xlane.xlu1 %976 }
 0x33f   :  { %v981_v54 = vsub.f32 %v965_v61, %v977_v53 }
 0x341   :  { %v988_v55 = vmul.f32 1.442695, %v981_v54 }
 0x342   :  { %v739_v57 = vpop.xlane.xlu1 %738 }
 0x343   :  { %4624 = vpow2.f32 %v988_v55  ;;  %v747_v58 = vsub.f32 %v730_v4, %v739_v57  ;;  %v783_v55 = vpack.c.bf16 %v779_v52, %v779_v52 }
 0x345   :  { %v4623_v56 = vpop.eup %4622  ;;  %v752_v63 = vmul.f32 1.442695, %v747_v58 }
 0x346   :  { %v993_v59 = vsel %vm733_vm6, %v4623_v56, 0.0 }
 0x347   :  { %994 = vadd.xlane.f32.xlu1 %v993_v59  ;;  %4626 = vpow2.f32 %v752_v63  ;;  %v781_v59 = vmul.f32 %v5166_v39, %v5188_v60  ;;  %v1257_v63 = vsel %vm1025_vm5, %v783_v55, 0 }
 0x34c   :  { %v745_v2 = vpop.xlane.xlu1 %744 }
 0x34d   :  { %v749_v3 = vsub.f32 %v732_v15, %v745_v2  ;;  %v4625_v8 = vpop.eup %4624 }
 0x34e   :  { %v999_v44 = vsel %vm733_vm6, %v4625_v8, 0.0 }
 0x34f   :  { %v756_v7 = vmul.f32 1.442695, %v749_v3  ;;  %1000 = vadd.xlane.f32.xlu1 %v999_v44  ;;  %v785_v3 = vpack.c.bf16 %v781_v59, %v781_v59 }
 0x351   :  { %4628 = vpow2.f32 %v756_v7  ;;  %v5255_v9 = vpop.eup %4626  ;;  %v1349_v60 = vsel %vm1025_vm5, %v785_v3, 0 }
 0x352   :  { %v761_v10 = vsel %vm733_vm6, %v5255_v9, 0.0 }
 0x353   :  { %762 = vadd.xlane.f32.xlu1 %v761_v10 }
 0x354   :  { %v968_v61 = vpop.xlane.xlu0 %967 }
 0x355   :  { %v978_v4 = vsub.f32 %v962_v25, %v968_v61 }
 0x357   :  { %v982_v11 = vmul.f32 1.442695, %v978_v4 }
 0x359   :  { %4630 = vpow2.f32 %v982_v11 }
 0x35b   :  { %v5259_v0 = vpop.eup %4628 }
 0x35c   :  { %v974_v14 = vpop.xlane.xlu0 %973  ;;  %v767_v15 = vsel %vm733_vm6, %v5259_v0, 0.0 }
 0x35d   :  { %v980_v1 = vsub.f32 %v964_v41, %v974_v14  ;;  %768 = vadd.xlane.f32.xlu1 %v767_v15 }
 0x35f   :  { %v986_v16 = vmul.f32 1.442695, %v980_v1 }
 0x360   :  { %v736_v17 = vpop.xlane.xlu0 %735 }
 0x361   :  { %4632 = vpow2.f32 %v986_v16  ;;  %v746_v18 = vsub.f32 %v729_v45, %v736_v17  ;;  %v778_v16 = vmul.f32 %v5166_v39, %v5221_v19  ;;  %v780_v19 = vmul.f32 %v5166_v39, %v5183_v50 }
 0x363   :  { %v5263_v20 = vpop.eup %4630  ;;  %v750_v22 = vmul.f32 1.442695, %v746_v18 }
 0x364   :  { %v742_v6 = vpop.xlane.xlu0 %741  ;;  %v990_v25 = vsel %vm733_vm6, %v5263_v20, 0.0 }
 0x365   :  { %4634 = vpow2.f32 %v750_v22  ;;  %v748_v28 = vsub.f32 %v731_v48, %v742_v6  ;;  %991 = vadd.xlane.f32.xlu0 %v990_v25 }
 0x367   :  { %v754_v29 = vmul.f32 1.442695, %v748_v28 }
 0x369   :  { %4636 = vpow2.f32 %v754_v29 }
 0x36b   :  { %v5267_v32 = vpop.eup %4632 }
 0x36c   :  { %v996_v35 = vsel %vm733_vm6, %v5267_v32, 0.0 }
 0x36d   :  { %997 = vadd.xlane.f32.xlu0 %v996_v35  ;;  %v784_v35 = vpack.c.bf16 %v780_v19, %v780_v19  ;;  %v4545_v19 = vld [vmem:[#allocation6 + $0x18] sm:$0xff]  }
 0x36f   :  { %v5271_v36 = vpop.eup %4634 }
 0x370   :  { %v758_v37 = vsel %vm733_vm6, %v5271_v36, 0.0 }
 0x371   :  { %759 = vadd.xlane.f32.xlu0 %v758_v37 }
 0x373   :  { %v5275_v38 = vpop.eup %4636 }
 0x374   :  { %v764_v40 = vsel %vm733_vm6, %v5275_v38, 0.0 }
 0x375   :  { %765 = vadd.xlane.f32.xlu0 %v764_v40  ;;  %v1303_v40 = vsel %vm1025_vm5, %v784_v35, 0  ;;  %v4548_v35 = vld [vmem:[#allocation6 + $0x30] sm:$0xff]  }
 0x3d4   :  { %v995_v41 = vpop.xlane.xlu1 %994 }
 0x3d5   :  { %4638 = vrcp.f32 %v995_v41 }
 0x3dc   :  { %v1001_v45 = vpop.xlane.xlu1 %1000 }
 0x3dd   :  { %4640 = vrcp.f32 %v1001_v45  ;;  %v4537_v45 = vld [vmem:[#allocation2 + $0x18] sm:$0xff]  }
 0x3df   :  { %v4639_v43 = vpop.eup %4638 }
 0x3e0   :  { %v1007_v48 = vmul.f32 %v4639_v43, %v4623_v56  ;;  %v763_v49 = vpop.xlane.xlu1 %762  ;;  %v4536_v43 = vld [vmem:[#allocation2 + $0x10] sm:$0xff]  }
 0x3e1   :  { %4642 = vrcp.f32 %v763_v49 }
 0x3e2   :  { %v1019_v31 = vpack.c.bf16 %v1007_v48, %v1007_v48  ;;  %v4539_v48 = vld [vmem:[#allocation2 + $0x28] sm:$0xff]  }
 0x3e4   :  { %4178 = vmatmul.mubr.msk.bf16.vlgmr.msra.gmra.mrb[16].mxu0 %vm733_vm6, %v1019_v31  ;;  %v4541_v31 = vld [vmem:[#allocation2 + $0x38] sm:$0xff]  }
 0x3e5   :  { %4188 = vmatpush3.bf16.msra.mxu0 %v1165_v51  ;;  %4189 = vmatprep.mubr.msk.bf16.mxu0 %vm4867_vm0, %v4866_v33 }
 0x3e6   :  { %4199 = vmatprep.subr.bf16.mxu0 %v4866_v33 }
 0x3e7   :  { %v4641_v53 = vpop.eup %4640 }
 0x3e8   :  { %v1009_v56 = vmul.f32 %v4641_v53, %v4625_v8 }
 0x3ea   :  { %v769_v54 = vpop.xlane.xlu1 %768  ;;  %v1021_v57 = vpack.c.bf16 %v1009_v56, %v1009_v56 }
 0x3eb   :  { %4644 = vrcp.f32 %v769_v54  ;;  %v4643_v58 = vpop.eup %4642 }
 0x3ec   :  { %4190 = vmatmul.mubr.msk.bf16.vlgmr.msra.gmra.mrb[20].mxu0 %vm733_vm6, %v1021_v57  ;;  %v775_v62 = vmul.f32 %v4643_v58, %v5255_v9  ;;  %v1012_v9 = vmul.f32 %v5179_v46, %v5183_v50 }
 0x3ed   :  { %4200 = vmatpush3.bf16.msra.mxu0 %v1257_v63  ;;  %4201 = vmatprep.mubr.msk.bf16.mxu0 %vm4867_vm0, %v4866_v33 }
 0x3ee   :  { %4211 = vmatprep.subr.bf16.mxu0 %v4866_v33  ;;  %v787_v7 = vpack.c.bf16 %v775_v62, %v775_v62  ;;  %v1016_v11 = vpack.c.bf16 %v1012_v9, %v1012_v9  ;;  %v3821_v9 = vld [vmem:[%s5756_s7] ss:$0 sm:$0xff] }
 0x3f2   :  { %v992_v2 = vpop.xlane.xlu0 %991 }
 0x3f3   :  { %4646 = vrcp.f32 %v992_v2 }
 0x3f4   :  { %4202 = vmatmul.mubr.msk.bf16.vlgmr.msra.gmra.mrb[16].mxu0 %vm733_vm6, %v787_v7 }
 0x3f5   :  { %v4645_v8 = vpop.eup %4644  ;;  %4212 = vmatpush3.bf16.msra.mxu0 %v1349_v60  ;;  %4213 = vmatprep.mubr.msk.bf16.mxu0 %vm4867_vm0, %v4866_v33 }
 0x3f6   :  { %v777_v44 = vmul.f32 %v4645_v8, %v5259_v0  ;;  %v1119_v0 = vsel %vm1025_vm5, %v1016_v11, 0 }
 0x3f8   :  { %v789_v4 = vpack.c.bf16 %v777_v44, %v777_v44 }
 0x3fa   :  { %v998_v61 = vpop.xlane.xlu0 %997 }
 0x3fb   :  { %4648 = vrcp.f32 %v998_v61 }
 0x3fc   :  { %4214 = vmatmul.mubr.msk.bf16.vlgmr.msra.gmra.mrb[20].mxu0 %vm733_vm6, %v789_v4 }
 0x3fd   :  { %v4647_v10 = vpop.eup %4646 }
 0x3fe   :  { %v1006_v14 = vmul.f32 %v4647_v10, %v5263_v20  ;;  %v760_v15 = vpop.xlane.xlu0 %759  ;;  %v782_v20 = vpack.c.bf16 %v778_v16, %v778_v16 }
 0x3ff   :  { %4650 = vrcp.f32 %v760_v15 }
 0x400   :  { %v1018_v1 = vpack.c.bf16 %v1006_v14, %v1006_v14  ;;  %v1211_v28 = vsel %vm1025_vm5, %v782_v20, 0 }
 0x402   :  { %4172 = vmatmul.mubr.msk.bf16.vlgmr.msra.gmra.mrb[28].mxu1 %vm733_vm6, %v1018_v1  ;;  %v766_v17 = vpop.xlane.xlu0 %765 }
 0x403   :  { %4182 = vmatpush3.bf16.msra.mxu1 %v1119_v0  ;;  %4183 = vmatprep.mubr.msk.bf16.mxu1 %vm4867_vm0, %v4866_v33  ;;  %4652 = vrcp.f32 %v766_v17 }
 0x404   :  { %4193 = vmatprep.subr.bf16.mxu1 %v4866_v33 }
 0x405   :  { %v4649_v18 = vpop.eup %4648 }
 0x406   :  { %v1008_v22 = vmul.f32 %v4649_v18, %v5267_v32 }
 0x408   :  { %v1020_v6 = vpack.c.bf16 %v1008_v22, %v1008_v22  ;;  %v4542_v22 = vld [vmem:[#allocation6] sm:$0xff]  }
 0x409   :  { %v4651_v25 = vpop.eup %4650  ;;  %4237 = vmatprep.subr.bf16.mxu0 %v4542_v22 }
 0x40a   :  { %4184 = vmatmul.mubr.msk.bf16.vlgmr.msra.gmra.mrb[32].mxu1 %vm733_vm6, %v1020_v6  ;;  %v774_v29 = vmul.f32 %v4651_v25, %v5271_v36  ;;  %v4535_v36 = vld [vmem:[#allocation2 + $0x8] sm:$0xff]   ;;  %4238 = vmatpush3.bf16.msra.mxu0 %v4542_v22  ;;  %v4544_v25 = vld [vmem:[#allocation6 + $0x10] sm:$0xff]  }
 0x40b   :  { %4194 = vmatpush3.bf16.msra.mxu1 %v1211_v28  ;;  %4195 = vmatprep.mubr.msk.bf16.mxu1 %vm4867_vm0, %v4866_v33  ;;  %v4543_v6 = vld [vmem:[#allocation6 + $0x8] sm:$0xff]   ;;  %v4546_v28 = vld [vmem:[#allocation6 + $0x20] sm:$0xff]  }
 0x40c   :  { %4205 = vmatprep.subr.bf16.mxu1 %v4866_v33  ;;  %v786_v32 = vpack.c.bf16 %v774_v29, %v774_v29  ;;  %4239 = vmatprep.subr.bf16.mxu0 %v4543_v6  ;;  %v4547_v29 = vld [vmem:[#allocation6 + $0x28] sm:$0xff]  }
 0x40d   :  { %v4653_v37 = vpop.eup %4652 }
 0x40e   :  { %v776_v50 = vmul.f32 %v4653_v37, %v5275_v38  ;;  %v4540_v38 = vld [vmem:[#allocation2 + $0x30] sm:$0xff]   ;;  %4240 = vmatpush3.bf16.msra.mxu0 %v4543_v6 }
 0x40f   :  { %4241 = vmatprep.subr.bf16.mxu0 %v4544_v25 }
 0x410   :  { %v788_v41 = vpack.c.bf16 %v776_v50, %v776_v50 }
 0x412   :  { %4196 = vmatmul.mubr.msk.bf16.vlgmr.msra.gmra.mrb[28].mxu1 %vm733_vm6, %v786_v32  ;;  %4242 = vmatpush3.bf16.msra.mxu0 %v4544_v25  ;;  %v4549_v32 = vld [vmem:[#allocation6 + $0x38] sm:$0xff]  }
 0x413   :  { %4206 = vmatpush3.bf16.msra.mxu1 %v1303_v40  ;;  %4207 = vmatprep.mubr.msk.bf16.mxu1 %vm4867_vm0, %v4866_v33 }
 0x414   :  { %4217 = vmatprep.subr.bf16.mxu1 %v4534_v42  ;;  %4243 = vmatprep.subr.bf16.mxu0 %v4545_v19 }
 0x416   :  { %4244 = vmatpush3.bf16.msra.mxu0 %v4545_v19 }
 0x417   :  { %4245 = vmatprep.subr.bf16.mxu0 %v4546_v28 }
 0x41a   :  { %4208 = vmatmul.mubr.msk.bf16.vlgmr.msra.gmra.mrb[32].mxu1 %vm733_vm6, %v788_v41  ;;  %4246 = vmatpush3.bf16.msra.mxu0 %v4546_v28 }
 0x41b   :  { %4218 = vmatpush3.bf16.msra.mxu1 %v4534_v42  ;;  %4247 = vmatprep.subr.bf16.mxu0 %v4547_v29 }
 0x41c   :  { %4219 = vmatprep.subr.bf16.mxu1 %v4535_v36 }
 0x41e   :  { %4248 = vmatpush3.bf16.msra.mxu0 %v4547_v29  ;;  %v4550_v29 = vld [vmem:[#allocation8] sm:$0xff]  }
 0x41f   :  { %4220 = vmatpush3.bf16.msra.mxu1 %v4535_v36  ;;  %4249 = vmatprep.subr.bf16.mxu0 %v4548_v35 }
 0x420   :  { %4221 = vmatprep.subr.bf16.mxu1 %v4536_v43 }
 0x422   :  { %4250 = vmatpush3.bf16.msra.mxu0 %v4548_v35  ;;  %v4551_v35 = vld [vmem:[#allocation8 + $0x8] sm:$0xff]  }
 0x423   :  { %4222 = vmatpush3.bf16.msra.mxu1 %v4536_v43  ;;  %4251 = vmatprep.subr.bf16.mxu0 %v4549_v32 }
 0x424   :  { %4223 = vmatprep.subr.bf16.mxu1 %v4537_v45 }
 0x426   :  { %4252 = vmatpush3.bf16.msra.mxu0 %v4549_v32  ;;  %v4552_v32 = vld [vmem:[#allocation8 + $0x10] sm:$0xff]  }
 0x427   :  { %4224 = vmatpush3.bf16.msra.mxu1 %v4537_v45 }
 0x428   :  { %4225 = vmatprep.subr.bf16.mxu1 %v4538_v47 }
 0x42b   :  { %4226 = vmatpush3.bf16.msra.mxu1 %v4538_v47 }
 0x42c   :  { %4227 = vmatprep.subr.bf16.mxu1 %v4539_v48 }
 0x42f   :  { %4228 = vmatpush3.bf16.msra.mxu1 %v4539_v48 }
 0x430   :  { %4229 = vmatprep.subr.bf16.mxu1 %v4540_v38 }
 0x433   :  { %4230 = vmatpush3.bf16.msra.mxu1 %v4540_v38 }
 0x434   :  { %4231 = vmatprep.subr.bf16.mxu1 %v4541_v31 }
 0x437   :  { %4232 = vmatpush3.bf16.msra.mxu1 %v4541_v31 }
 0x438   :  { %4257 = vmatprep.subr.bf16.mxu1 %v4550_v29 }
 0x4c7   :  { %v1293_v49 = vpop.f32.mrb[16].mxu0 }
 0x4c8   :  { %v4203_v51 = vpop.f32.mrb[17].mxu0 }
 0x4c9   :  { %v1296_v52 = vpop.f32.mrb[18].mxu0 }
 0x4ca   :  { %v4204_v53 = vpop.f32.mrb[19].mxu0 }
 0x4cf   :  { %v1385_v54 = vpop.f32.mrb[20].mxu0 }
 0x4d0   :  { %v4215_v55 = vpop.f32.mrb[21].mxu0 }
 0x4d1   :  { %v1388_v56 = vpop.f32.mrb[22].mxu0 }
 0x4d2   :  { %v4216_v57 = vpop.f32.mrb[23].mxu0 }
 0x4e5   :  { %v1247_v58 = vpop.f32.mrb[28].mxu1 }
 0x4e6   :  { %v1391_v59 = vpack.c.bf16 %v1293_v49, %v1247_v58  ;;  %v4197_v63 = vpop.f32.mrb[29].mxu1 }
 0x4e7   :  { %v1250_v62 = vpop.f32.mrb[30].mxu1 }
 0x4e8   :  { %v4198_v2 = vpop.f32.mrb[31].mxu1  ;;  %4233 = vmatprep.mubr.bf16.mxu1 %v1391_v59 }
 0x4ed   :  { %v1339_v3 = vpop.f32.mrb[32].mxu1 }
 0x4ee   :  { %v1392_v7 = vpack.c.bf16 %v1385_v54, %v1339_v3  ;;  %v4209_v8 = vpop.f32.mrb[33].mxu1 }
 0x4ef   :  { %v1342_v60 = vpop.f32.mrb[34].mxu1 }
 0x4f0   :  { %v4210_v44 = vpop.f32.mrb[35].mxu1  ;;  %4234 = vmatmul.mubr.bf16.vlgmr.msra.gmra.mrb[36].mxu1 %v1392_v7 }
 0x4f1   :  { %4258 = vmatpush3.bf16.msra.mxu1 %v4550_v29 }
 0x4f2   :  { %4259 = vmatprep.subr.bf16.mxu1 %v4551_v35 }
 0x4f5   :  { %4260 = vmatpush3.bf16.msra.mxu1 %v4551_v35 }
 0x4f6   :  { %4261 = vmatprep.subr.bf16.mxu1 %v4552_v32 }
 0x4f9   :  { %4262 = vmatpush3.bf16.msra.mxu1 %v4552_v32 }
 0x5c3   :  { %v4235_v61 = vpop.f32.mrb[36].mxu1 }
 0x5c4   :  { %v1490_v10 = vadd.f32 %v4235_v61, %v3821_v9  ;;  %v1481_v4 = vpop.f32.mrb[37].mxu1 }
 0x5c5   :  { %v4236_v11 = vpop.f32.mrb[38].mxu1  ;;  %v1482_v15 = vadd.f32 %v3821_v9, %v1481_v4 }
 0x5c6   :  { %v5331_v14 = vadd.f32 %v1490_v10, %v5136_v5  ;;  %v1493_v1 = vadd.f32 %v4236_v11, %v3821_v9  ;;  %v1484_v16 = vpop.f32.mrb[39].mxu1 }
 0x5c7   :  { %v1485_v17 = vadd.f32 %v3821_v9, %v1484_v16  ;;  %v5338_v18 = vadd.f32 %v1482_v15, %v5128_v12  ;;  %v3830_v9 = vld [vmem:[%s5757_s8] ss:$0 sm:$0xff] }
 0x5c8   :  { %v5334_v0 = vadd.f32 %v1493_v1, %v5138_v21  ;;  %1504 = vadd.xlane.f32.xlu0 %v5331_v14  ;;  %v1514_v12 = vmul.f32 %v5331_v14, %v5331_v14 }
 0x5c9   :  { %v5342_v20 = vadd.f32 %v1485_v17, %v5130_v13  ;;  %v1512_v5 = vmul.f32 %v5338_v18, %v5338_v18  ;;  %v3831_v17 = vld [vmem:[%s5758_s9] ss:$0 sm:$0xff] }
 0x5ca   :  { %1506 = vadd.xlane.f32.xlu1 %v5334_v0  ;;  %v1515_v13 = vmul.f32 %v5334_v0, %v5334_v0 }
 0x5cb   :  { %v1513_v21 = vmul.f32 %v5342_v20, %v5342_v20 }
 0x5cc   :  { %1500 = vadd.xlane.f32.xlu0 %v5338_v18 }
 0x5ce   :  { %1502 = vadd.xlane.f32.xlu1 %v5342_v20 }
 0x5d0   :  { %1516 = vadd.xlane.f32.xlu0 %v1512_v5 }
 0x5d2   :  { %1518 = vadd.xlane.f32.xlu1 %v1513_v21 }
 0x5d4   :  { %1520 = vadd.xlane.f32.xlu0 %v1514_v12 }
 0x5d6   :  { %1522 = vadd.xlane.f32.xlu1 %v1515_v13 }
 0x655   :  { %v1505_v37 = vpop.xlane.xlu0 %1504 }
 0x656   :  { %v1510_v45 = vmul.f32 0.03125, %v1505_v37  ;;  %v4553_v37 = vld [vmem:[#allocation8 + $0x18] sm:$0xff]  }
 0x657   :  { %v1507_v40 = vpop.xlane.xlu1 %1506  ;;  %4263 = vmatprep.subr.bf16.mxu1 %v4553_v37 }
 0x658   :  { %v1511_v38 = vmul.f32 0.03125, %v1507_v40  ;;  %v1530_v54 = vmul.f32 %v1510_v45, %v1510_v45  ;;  %v1538_v11 = vsub.f32 %v5331_v14, %v1510_v45  ;;  %4264 = vmatpush3.bf16.msra.mxu1 %v4553_v37  ;;  %v4554_v40 = vld [vmem:[#allocation8 + $0x20] sm:$0xff]  }
 0x659   :  { %v1501_v50 = vpop.xlane.xlu0 %1500  ;;  %4265 = vmatprep.subr.bf16.mxu1 %v4554_v40 }
 0x65a   :  { %v1508_v41 = vmul.f32 0.03125, %v1501_v50  ;;  %v1531_v58 = vmul.f32 %v1511_v38, %v1511_v38  ;;  %v4555_v50 = vld [vmem:[#allocation8 + $0x28] sm:$0xff]  }
 0x65b   :  { %v1503_v42 = vpop.xlane.xlu1 %1502 }
 0x65c   :  { %v1509_v36 = vmul.f32 0.03125, %v1503_v42  ;;  %v1528_v47 = vmul.f32 %v1508_v41, %v1508_v41  ;;  %v1536_v60 = vsub.f32 %v5338_v18, %v1508_v41  ;;  %v1539_v18 = vsub.f32 %v5334_v0, %v1511_v38  ;;  %4266 = vmatpush3.bf16.msra.mxu1 %v4554_v40  ;;  %v4556_v41 = vld [vmem:[#allocation8 + $0x30] sm:$0xff]   ;;  %v4557_v42 = vld [vmem:[#allocation8 + $0x38] sm:$0xff]   ;;  %v4558_v40 = vld [vmem:[%s5753_s4 + $0xc0] ss:$12 sps:$4 sm:$0xff]  }
 0x65d   :  { %v1517_v43 = vpop.xlane.xlu0 %1516  ;;  %4267 = vmatprep.subr.bf16.mxu1 %v4555_v50 }
 0x65e   :  { %v1524_v48 = vmul.f32 0.03125, %v1517_v43  ;;  %v1529_v49 = vmul.f32 %v1509_v36, %v1509_v36  ;;  %v1537_v61 = vsub.f32 %v5342_v20, %v1509_v36  ;;  %v3832_v36 = vld [vmem:[%s5760_s11] ss:$0 sm:$0xff] }
 0x65f   :  { %v1519_v31 = vpop.xlane.xlu1 %1518 }
 0x660   :  { %v1532_v51 = vsub.f32 %v1524_v48, %v1528_v47  ;;  %v1525_v52 = vmul.f32 0.03125, %v1519_v31  ;;  %4268 = vmatpush3.bf16.msra.mxu1 %v4555_v50  ;;  %v4560_v50 = vld [vmem:[%s5753_s4 + $0xc4] ss:$12 sps:$4 sm:$0xff]  }
 0x661   :  { %v1521_v53 = vpop.xlane.xlu0 %1520  ;;  %4269 = vmatprep.subr.bf16.mxu1 %v4556_v41  ;;  %2140 = vmatprep.subr.bf16.mxu0 %v4560_v50 }
 0x662   :  { %v1540_v55 = vadd.f32 1e-12, %v1532_v51  ;;  %v1533_v56 = vsub.f32 %v1525_v52, %v1529_v49  ;;  %v1526_v57 = vmul.f32 0.03125, %v1521_v53 }
 0x663   :  { %v1523_v59 = vpop.xlane.xlu1 %1522 }
 0x664   :  { %4654 = vrsqrt.f32 %v1540_v55  ;;  %v1541_v63 = vadd.f32 1e-12, %v1533_v56  ;;  %v1534_v62 = vsub.f32 %v1526_v57, %v1530_v54  ;;  %v1527_v2 = vmul.f32 0.03125, %v1523_v59  ;;  %4270 = vmatpush3.bf16.msra.mxu1 %v4556_v41  ;;  %v3841_v41 = vld [vmem:[%s5762_s13] ss:$0 sm:$0xff] }
 0x665   :  { %4271 = vmatprep.subr.bf16.mxu1 %v4557_v42 }
 0x666   :  { %4656 = vrsqrt.f32 %v1541_v63  ;;  %v1542_v3 = vadd.f32 1e-12, %v1534_v62  ;;  %v1535_v7 = vsub.f32 %v1527_v2, %v1531_v58 }
 0x668   :  { %4658 = vrsqrt.f32 %v1542_v3  ;;  %v1543_v8 = vadd.f32 1e-12, %v1535_v7  ;;  %4272 = vmatpush3.bf16.msra.mxu1 %v4557_v42 }
 0x66a   :  { %4660 = vrsqrt.f32 %v1543_v8 }
 0x66e   :  { %v4655_v44 = vpop.eup %4654 }
 0x66f   :  { %v1548_v10 = vmul.f32 %v4655_v44, %v1536_v60 }
 0x670   :  { %v4657_v4 = vpop.eup %4656 }
 0x671   :  { %v1549_v15 = vmul.f32 %v4657_v4, %v1537_v61  ;;  %v1558_v1 = vmul.f32 %v3830_v9, %v1548_v10 }
 0x672   :  { %v4659_v16 = vpop.eup %4658 }
 0x673   :  { %v1559_v5 = vmul.f32 %v3830_v9, %v1549_v15  ;;  %v1550_v21 = vmul.f32 %v4659_v16, %v1538_v11  ;;  %v5364_v13 = vadd.f32 %v3831_v17, %v1558_v1 }
 0x674   :  { %v4661_v12 = vpop.eup %4660 }
 0x675   :  { %v5366_v22 = vadd.f32 %v3831_v17, %v1559_v5  ;;  %v1551_v20 = vmul.f32 %v4661_v12, %v1539_v18  ;;  %v1560_v6 = vmul.f32 %v3830_v9, %v1550_v21 }
 0x677   :  { %v1572_v14 = vpack.c.bf16 %v5366_v22, %v5364_v13  ;;  %v1561_v25 = vmul.f32 %v3830_v9, %v1551_v20  ;;  %v5370_v19 = vadd.f32 %v3831_v17, %v1560_v6 }
 0x679   :  { %4253 = vmatprep.mubr.bf16.mxu0 %v1572_v14  ;;  %v5372_v28 = vadd.f32 %v3831_v17, %v1561_v25 }
 0x67b   :  { %v1573_v0 = vpack.c.bf16 %v5372_v28, %v5370_v19 }
 0x67d   :  { %4254 = vmatmul.mubr.bf16.vlgmr.msra.gmra.mrb[24].mxu0 %v1573_v0 }
 0x67e   :  { %2172 = vmatprep.mubr.bf16.mxu0 %v4865_v30  ;;  %2141 = vmatpush1.bf16.msra.mxu0 %v4558_v40 }
 0x750   :  { %v4255_v43 = vpop.f32.mrb[24].mxu0 }
 0x751   :  { %v1671_v45 = vadd.f32 %v4255_v43, %v3832_v36  ;;  %v1662_v47 = vpop.f32.mrb[25].mxu0 }
 0x752   :  { %v1663_v48 = vadd.f32 %v3832_v36, %v1662_v47  ;;  %v4256_v38 = vpop.f32.mrb[26].mxu0 }
 0x753   :  { %v1679_v31 = vmul.f32 %v1671_v45, %v1671_v45  ;;  %v1674_v49 = vadd.f32 %v4256_v38, %v3832_v36  ;;  %v1665_v51 = vpop.f32.mrb[27].mxu0 }
 0x754   :  { %v1677_v52 = vmul.f32 %v1663_v48, %v1663_v48  ;;  %v1666_v53 = vadd.f32 %v3832_v36, %v1665_v51 }
 0x755   :  { %v1683_v54 = vmul.f32 %v1679_v31, %v1671_v45  ;;  %v1680_v55 = vmul.f32 %v1674_v49, %v1674_v49 }
 0x756   :  { %v1681_v56 = vmul.f32 %v1677_v52, %v1663_v48  ;;  %v1678_v57 = vmul.f32 %v1666_v53, %v1666_v53 }
 0x757   :  { %v1687_v58 = vmul.f32 0.044715, %v1683_v54  ;;  %v1684_v59 = vmul.f32 %v1680_v55, %v1674_v49 }
 0x758   :  { %v1685_v63 = vmul.f32 0.044715, %v1681_v56  ;;  %v1682_v62 = vmul.f32 %v1678_v57, %v1666_v53  ;;  %v4566_v56 = vld [vmem:[%s5753_s4 + $0xf4] ss:$12 sps:$4 sm:$0xff]  }
 0x759   :  { %v1691_v2 = vadd.f32 %v1687_v58, %v1671_v45  ;;  %v1688_v3 = vmul.f32 0.044715, %v1684_v59  ;;  %v4567_v57 = vld [vmem:[%s5753_s4 + $0xc8] ss:$12 sps:$4 sm:$0xff]   ;;  %v4564_v58 = vld [vmem:[%s5753_s4 + $0xf0] ss:$12 sps:$4 sm:$0xff]  }
 0x75a   :  { %v1689_v7 = vadd.f32 %v1685_v63, %v1663_v48  ;;  %v1686_v8 = vmul.f32 0.044715, %v1682_v62  ;;  %4277 = vmatprep.subr.bf16.mxu1 %v4567_v57  ;;  %v4568_v59 = vld [vmem:[%s5753_s4 + $0x108] ss:$12 sps:$4 sm:$0xff]   ;;  %v4570_v63 = vld [vmem:[%s5753_s4 + $0x10c] ss:$12 sps:$4 sm:$0xff]  }
 0x75b   :  { %v1695_v60 = vmul.f32 0.7978846, %v1691_v2  ;;  %v1692_v44 = vadd.f32 %v1688_v3, %v1674_v49  ;;  %v4571_v62 = vld [vmem:[%s5753_s4 + $0xe0] ss:$12 sps:$4 sm:$0xff]   ;;  %v4574_v2 = vld [vmem:[%s5753_s4 + $0x124] ss:$12 sps:$4 sm:$0xff]  }
 0x75c   :  { %v1693_v9 = vmul.f32 0.7978846, %v1689_v7  ;;  %v1690_v61 = vadd.f32 %v1686_v8, %v1666_v53  ;;  %v4575_v3 = vld [vmem:[%s5753_s4 + $0xf8] ss:$12 sps:$4 sm:$0xff]   ;;  %v4572_v7 = vld [vmem:[%s5753_s4 + $0x120] ss:$12 sps:$4 sm:$0xff]  }
 0x75d   :  { %4662 = vtanh.f32 %v1695_v60  ;;  %v1696_v10 = vmul.f32 0.7978846, %v1692_v44  ;;  %v4576_v8 = vld [vmem:[%s5753_s4 + $0x138] ss:$12 sps:$4 sm:$0xff]   ;;  %v4578_v60 = vld [vmem:[%s5753_s4 + $0x13c] ss:$12 sps:$4 sm:$0xff]  }
 0x75e   :  { %4664 = vtanh.f32 %v1693_v9  ;;  %v1694_v4 = vmul.f32 0.7978846, %v1690_v61  ;;  %v4579_v44 = vld [vmem:[%s5753_s4 + $0x110] ss:$12 sps:$4 sm:$0xff]   ;;  %v4582_v9 = vld [vmem:[%s5753_s4 + $0x154] ss:$12 sps:$4 sm:$0xff]  }
 0x75f   :  { %4666 = vtanh.f32 %v1696_v10  ;;  %v4583_v61 = vld [vmem:[%s5753_s4 + $0x128] ss:$12 sps:$4 sm:$0xff]   ;;  %v4580_v10 = vld [vmem:[%s5753_s4 + $0x150] ss:$12 sps:$4 sm:$0xff]  }
 0x760   :  { %4668 = vtanh.f32 %v1694_v4  ;;  %v4586_v4 = vld [vmem:[%s5753_s4 + $0x16c] ss:$12 sps:$4 sm:$0xff]  }
 0x767   :  { %v4663_v11 = vpop.eup %4662 }
 0x768   :  { %v4665_v15 = vpop.eup %4664  ;;  %v1703_v1 = vadd.f32 1.0, %v4663_v11  ;;  %v4587_v11 = vld [vmem:[%s5753_s4 + $0x140] ss:$12 sps:$4 sm:$0xff]  }
 0x769   :  { %v4667_v16 = vpop.eup %4666  ;;  %v1701_v17 = vadd.f32 1.0, %v4665_v15  ;;  %v4584_v15 = vld [vmem:[%s5753_s4 + $0x168] ss:$12 sps:$4 sm:$0xff]  }
 0x76a   :  { %v4669_v18 = vpop.eup %4668  ;;  %v1707_v5 = vmul.f32 0.5, %v1703_v1  ;;  %v1704_v21 = vadd.f32 1.0, %v4667_v16  ;;  %v4588_v1 = vld [vmem:[%s5753_s4 + $0x158] ss:$12 sps:$4 sm:$0xff]   ;;  %v4589_v16 = vld [vmem:[%s5753_s4 + $0x170] ss:$12 sps:$4 sm:$0xff]  }
 0x76b   :  { %v1702_v12 = vadd.f32 1.0, %v4669_v18  ;;  %v1705_v20 = vmul.f32 0.5, %v1701_v17 }
 0x76c   :  { %v1708_v6 = vmul.f32 0.5, %v1704_v21  ;;  %v1711_v25 = vmul.f32 %v1707_v5, %v1671_v45 }
 0x76d   :  { %v1706_v14 = vmul.f32 0.5, %v1702_v12  ;;  %v1709_v29 = vmul.f32 %v1705_v20, %v1663_v48 }
 0x76e   :  { %v1712_v0 = vmul.f32 %v1708_v6, %v1674_v49 }
 0x76f   :  { %v1710_v35 = vmul.f32 %v1706_v14, %v1666_v53 }
 0x770   :  { %v1714_v32 = vpack.c.bf16 %v1712_v0, %v1711_v25 }
 0x771   :  { %v1713_v37 = vpack.c.bf16 %v1710_v35, %v1709_v29 }
 0x773   :  { %4273 = vmatprep.mubr.bf16.mxu1 %v1713_v37 }
 0x774   :  { %4274 = vmatmul.mubr.bf16.vlgmr.msra.gmra.mrb[40].mxu1 %v1714_v32 }
 0x775   :  { %4278 = vmatpush3.bf16.msra.mxu1 %v4567_v57 }
 0x776   :  { %4279 = vmatprep.subr.bf16.mxu1 %v4571_v62 }
 0x779   :  { %4280 = vmatpush3.bf16.msra.mxu1 %v4571_v62  ;;  %v3851_v62 = vld [vmem:[%s5764_s15] ss:$0 sm:$0xff] }
 0x77a   :  { %4281 = vmatprep.subr.bf16.mxu1 %v4575_v3 }
 0x77d   :  { %4282 = vmatpush3.bf16.msra.mxu1 %v4575_v3 }
 0x77e   :  { %4283 = vmatprep.subr.bf16.mxu1 %v4579_v44 }
 0x781   :  { %4284 = vmatpush3.bf16.msra.mxu1 %v4579_v44 }
 0x782   :  { %4285 = vmatprep.subr.bf16.mxu1 %v4583_v61 }
 0x785   :  { %4286 = vmatpush3.bf16.msra.mxu1 %v4583_v61 }
 0x786   :  { %4287 = vmatprep.subr.bf16.mxu1 %v4587_v11 }
 0x789   :  { %4288 = vmatpush3.bf16.msra.mxu1 %v4587_v11 }
 0x78a   :  { %4289 = vmatprep.subr.bf16.mxu1 %v4588_v1 }
 0x78d   :  { %4290 = vmatpush3.bf16.msra.mxu1 %v4588_v1 }
 0x78e   :  { %4291 = vmatprep.subr.bf16.mxu1 %v4589_v16 }
 0x791   :  { %4292 = vmatpush3.bf16.msra.mxu1 %v4589_v16 }
 0x792   :  { %4315 = vmatprep.subr.bf16.mxu1 %v4866_v33 }
 0x847   :  { %v4275_v42 = vpop.f32.mrb[40].mxu1 }
 0x848   :  { %v1803_v36 = vpop.f32.mrb[41].mxu1  ;;  %v1812_v49 = vadd.f32 %v4275_v42, %v3841_v41 }
 0x849   :  { %v1804_v43 = vadd.f32 %v3841_v41, %v1803_v36  ;;  %v4276_v45 = vpop.f32.mrb[42].mxu1 }
 0x84a   :  { %v1806_v47 = vpop.f32.mrb[43].mxu1  ;;  %v1815_v52 = vadd.f32 %v4276_v45, %v3841_v41 }
 0x84b   :  { %v5390_v48 = vadd.f32 %v1804_v43, %v5364_v13  ;;  %v1807_v38 = vadd.f32 %v3841_v41, %v1806_v47  ;;  %v5402_v13 = vadd.f32 %v1812_v49, %v5370_v19  ;;  %v4561_v19 = vld [vmem:[%s5753_s4 + $0xd8] ss:$12 sps:$4 sm:$0xff]  }
 0x84d   :  { %v5393_v31 = vadd.f32 %v1807_v38, %v5366_v22  ;;  %1822 = vadd.xlane.f32.xlu0 %v5390_v48  ;;  %v1834_v51 = vmul.f32 %v5390_v48, %v5390_v48  ;;  %v5405_v22 = vadd.f32 %v1815_v52, %v5372_v28  ;;  %v1836_v54 = vmul.f32 %v5402_v13, %v5402_v13  ;;  %v4563_v28 = vld [vmem:[%s5753_s4 + $0xdc] ss:$12 sps:$4 sm:$0xff]  }
 0x84e   :  { %2142 = vmatprep.subr.bf16.mxu0 %v4563_v28  ;;  %v3850_v28 = vld [vmem:[%s5763_s14] ss:$0 sm:$0xff] }
 0x84f   :  { %1824 = vadd.xlane.f32.xlu1 %v5393_v31  ;;  %v1835_v53 = vmul.f32 %v5393_v31, %v5393_v31  ;;  %v1837_v55 = vmul.f32 %v5405_v22, %v5405_v22  ;;  %2143 = vmatpush1.bf16.msra.mxu0 %v4561_v19 }
 0x850   :  { %2144 = vmatprep.subr.bf16.mxu0 %v4566_v56 }
 0x851   :  { %1838 = vadd.xlane.f32.xlu0 %v1834_v51 }
 0x853   :  { %1840 = vadd.xlane.f32.xlu1 %v1835_v53  ;;  %2145 = vmatpush1.bf16.msra.mxu0 %v4564_v58 }
 0x854   :  { %2146 = vmatprep.subr.bf16.mxu0 %v4570_v63 }
 0x855   :  { %1826 = vadd.xlane.f32.xlu0 %v5402_v13 }
 0x857   :  { %1828 = vadd.xlane.f32.xlu1 %v5405_v22  ;;  %2147 = vmatpush1.bf16.msra.mxu0 %v4568_v59 }
 0x858   :  { %2148 = vmatprep.subr.bf16.mxu0 %v4574_v2 }
 0x859   :  { %1842 = vadd.xlane.f32.xlu0 %v1836_v54 }
 0x85b   :  { %1844 = vadd.xlane.f32.xlu1 %v1837_v55  ;;  %2149 = vmatpush1.bf16.msra.mxu0 %v4572_v7 }
 0x85c   :  { %2150 = vmatprep.subr.bf16.mxu0 %v4578_v60 }
 0x85f   :  { %2151 = vmatpush1.bf16.msra.mxu0 %v4576_v8 }
 0x860   :  { %2152 = vmatprep.subr.bf16.mxu0 %v4582_v9 }
 0x863   :  { %2153 = vmatpush1.bf16.msra.mxu0 %v4580_v10 }
 0x864   :  { %2154 = vmatprep.subr.bf16.mxu0 %v4586_v4 }
 0x867   :  { %2155 = vmatpush1.bf16.msra.mxu0 %v4584_v15 }
 0x868   :  { %4297 = vmatprep.subr.bf16.mxu0 %v4866_v33 }
 0x8da   :  { %v1823_v17 = vpop.xlane.xlu0 %1822 }
 0x8db   :  { %v1830_v18 = vmul.f32 0.03125, %v1823_v17 }
 0x8dc   :  { %v1825_v5 = vpop.xlane.xlu1 %1824 }
 0x8dd   :  { %v1831_v21 = vmul.f32 0.03125, %v1825_v5  ;;  %v1850_v20 = vmul.f32 %v1830_v18, %v1830_v18  ;;  %v1858_v55 = vsub.f32 %v5390_v48, %v1830_v18 }
 0x8de   :  { %v1839_v12 = vpop.xlane.xlu0 %1838 }
 0x8df   :  { %v1846_v6 = vmul.f32 0.03125, %v1839_v12  ;;  %v1851_v25 = vmul.f32 %v1831_v21, %v1831_v21  ;;  %v1859_v56 = vsub.f32 %v5393_v31, %v1831_v21 }
 0x8e0   :  { %v1841_v14 = vpop.xlane.xlu1 %1840 }
 0x8e1   :  { %v1854_v0 = vsub.f32 %v1846_v6, %v1850_v20  ;;  %v1847_v29 = vmul.f32 0.03125, %v1841_v14 }
 0x8e2   :  { %v1827_v35 = vpop.xlane.xlu0 %1826 }
 0x8e3   :  { %v1862_v32 = vadd.f32 1e-12, %v1854_v0  ;;  %v1855_v37 = vsub.f32 %v1847_v29, %v1851_v25  ;;  %v1832_v40 = vmul.f32 0.03125, %v1827_v35 }
 0x8e4   :  { %v1829_v50 = vpop.xlane.xlu1 %1828 }
 0x8e5   :  { %4670 = vrsqrt.f32 %v1862_v32  ;;  %v1863_v41 = vadd.f32 1e-12, %v1855_v37  ;;  %v1833_v42 = vmul.f32 0.03125, %v1829_v50  ;;  %v1852_v43 = vmul.f32 %v1832_v40, %v1832_v40 }
 0x8e6   :  { %v1843_v36 = vpop.xlane.xlu0 %1842  ;;  %v1860_v3 = vsub.f32 %v5402_v13, %v1832_v40 }
 0x8e7   :  { %4672 = vrsqrt.f32 %v1863_v41  ;;  %v1848_v45 = vmul.f32 0.03125, %v1843_v36  ;;  %v1853_v38 = vmul.f32 %v1833_v42, %v1833_v42  ;;  %v1861_v60 = vsub.f32 %v5405_v22, %v1833_v42 }
 0x8e8   :  { %v1845_v47 = vpop.xlane.xlu1 %1844 }
 0x8e9   :  { %v1856_v49 = vsub.f32 %v1848_v45, %v1852_v43  ;;  %v1849_v51 = vmul.f32 0.03125, %v1845_v47 }
 0x8eb   :  { %v1864_v52 = vadd.f32 1e-12, %v1856_v49  ;;  %v1857_v53 = vsub.f32 %v1849_v51, %v1853_v38 }
 0x8ed   :  { %4674 = vrsqrt.f32 %v1864_v52  ;;  %v1865_v54 = vadd.f32 1e-12, %v1857_v53 }
 0x8ef   :  { %v4671_v19 = vpop.eup %4670  ;;  %4676 = vrsqrt.f32 %v1865_v54 }
 0x8f0   :  { %v1870_v57 = vmul.f32 %v4671_v19, %v1858_v55 }
 0x8f1   :  { %v4673_v58 = vpop.eup %4672 }
 0x8f2   :  { %v1871_v59 = vmul.f32 %v4673_v58, %v1859_v56  ;;  %v1880_v63 = vmul.f32 %v3850_v28, %v1870_v57 }
 0x8f4   :  { %v1881_v2 = vmul.f32 %v3850_v28, %v1871_v59  ;;  %v5490_v48 = vadd.f32 %v3851_v62, %v1880_v63 }
 0x8f6   :  { %v5492_v7 = vadd.f32 %v3851_v62, %v1881_v2 }
 0x8f7   :  { %v4675_v8 = vpop.eup %4674 }
 0x8f8   :  { %v1994_v31 = vpack.c.bf16 %v5492_v7, %v5490_v48  ;;  %v1872_v44 = vmul.f32 %v4675_v8, %v1860_v3 }
 0x8f9   :  { %v4677_v9 = vpop.eup %4676 }
 0x8fa   :  { %2173 = vmatmul.mubr.bf16.vlgmr.msra.gmra.mrb[28].mxu0 %v1994_v31  ;;  %4293 = vmatprep.mubr.bf16.mxu1 %v1994_v31  ;;  %v1873_v61 = vmul.f32 %v4677_v9, %v1861_v60  ;;  %v1882_v10 = vmul.f32 %v3850_v28, %v1872_v44 }
 0x8fb   :  { %2182 = vmatprep.mubr.bf16.mxu0 %v4865_v30  ;;  %v3884_v30 = vld [vmem:[%s5754_s5 + $0x3] sm:$0x7] }
 0x8fc   :  { %v1883_v4 = vmul.f32 %v3850_v28, %v1873_v61  ;;  %v5498_v13 = vadd.f32 %v3851_v62, %v1882_v10  ;;  %v2004_v22 = vrot.slane %v3884_v30, %v290_v24  ;;  %v2000_v1 = vrot.slane %v3884_v30, %v286_v26 }
 0x8fd   :  { %v2008_v6 = vrot.slane %v3884_v30, %v294_v34 }
 0x8fe   :  { %v5500_v11 = vadd.f32 %v3851_v62, %v1883_v4 }
 0x900   :  { %v1995_v15 = vpack.c.bf16 %v5500_v11, %v5498_v13 }
 0x902   :  { %2183 = vmatmul.mubr.bf16.gmra.mrb[32].mxu0 %v1995_v15  ;;  %4294 = vmatmul.mubr.bf16.vlgmr.msra.gmra.mrb[44].mxu1 %v1995_v15 }
 0x903   :  { %4299 = vmatprep.mubr.msk.bf16.mxu0 %vm4867_vm0, %v4866_v33  ;;  %4317 = vmatprep.mubr.msk.bf16.mxu1 %vm4867_vm0, %v4866_v33 }
 0x9cd   :  { %v2174_v16 = vpop.f32.mrb[28].mxu0 }
 0x9ce   :  { %v2176_v17 = vpop.f32.mrb[29].mxu0  ;;  %v2175_v21 = vadd.f32 %v2174_v16, %v2000_v1 }
 0x9cf   :  { %v2177_v18 = vadd.f32 %v2176_v17, %v2004_v22  ;;  %v2178_v5 = vpop.f32.mrb[30].mxu0 }
 0x9d0   :  { %v2180_v12 = vpop.f32.mrb[31].mxu0  ;;  %v2246_v14 = vmul.f32 %v5166_v39, %v2175_v21  ;;  %v2179_v50 = vadd.f32 %v2178_v5, %v2000_v1  ;;  %v2478_v58 = vmul.f32 %v5179_v46, %v2175_v21 }
 0x9d1   :  { %v2242_v20 = vpack.c.bf16 %v2177_v18, %v2177_v18  ;;  %v2181_v25 = vadd.f32 %v2180_v12, %v2004_v22 }
 0x9d2   :  { %v2250_v40 = vpack.c.bf16 %v2246_v14, %v2246_v14  ;;  %v2247_v34 = vmul.f32 %v5166_v39, %v2179_v50  ;;  %v2479_v56 = vmul.f32 %v5179_v46, %v2179_v50  ;;  %v2482_v2 = vpack.c.bf16 %v2478_v58, %v2478_v58  ;;  %v4750_v50 = vld [vmem:[%s5772_s26 + $0x1] ss:$0 sm:$0xff]  ;;  %v4752_v58 = vld [vmem:[%s5772_s26 + $0x3] ss:$0 sm:$0xff] }
 0x9d3   :  { %4298 = vmatpush3.bf16.xpose.msra.mxu0 %v2242_v20  ;;  %v2243_v36 = vpack.c.bf16 %v2181_v25, %v2181_v25 }
 0x9d4   :  { %4303 = vmatprep.subr.bf16.mxu0 %v4866_v33  ;;  %v2251_v51 = vpack.c.bf16 %v2247_v34, %v2247_v34  ;;  %v2483_v59 = vpack.c.bf16 %v2479_v56, %v2479_v56 }
 0x9d5   :  { %v2184_v24 = vpop.f32.mrb[32].mxu0  ;;  %v4295_v0 = vpop.f32.mrb[44].mxu1 }
 0x9d6   :  { %v5519_v29 = vadd.f32 %v4295_v0, %v2008_v6  ;;  %v2186_v26 = vpop.f32.mrb[33].mxu0  ;;  %v2227_v35 = vpop.f32.mrb[45].mxu1  ;;  %v2185_v52 = vadd.f32 %v2184_v24, %v2000_v1 }
 0x9d7   :  { %v2188_v32 = vpop.f32.mrb[34].mxu0  ;;  %v4296_v37 = vpop.f32.mrb[46].mxu1  ;;  %v2187_v47 = vadd.f32 %v2186_v26, %v2004_v22  ;;  %v5543_v63 = vadd.f32 %v2227_v35, %v2008_v6 }
 0x9d8   :  { %v2190_v41 = vpop.f32.mrb[35].mxu0  ;;  %v2230_v42 = vpop.f32.mrb[47].mxu1  ;;  %v5522_v43 = vadd.f32 %v4296_v37, %v2008_v6  ;;  %v2189_v38 = vadd.f32 %v2188_v32, %v2000_v1  ;;  %v2248_v55 = vmul.f32 %v5166_v39, %v2185_v52  ;;  %v2480_v31 = vmul.f32 %v5179_v46, %v2185_v52 }
 0x9d9   :  { %v2191_v45 = vadd.f32 %v2190_v41, %v2004_v22  ;;  %v2244_v53 = vpack.c.bf16 %v2187_v47, %v2187_v47  ;;  %v5537_v57 = vadd.f32 %v2230_v42, %v2008_v6  ;;  %v2698_v8 = vmul.f32 %v5179_v46, %v5543_v63 }
 0x9da   :  { %4300 = vmatmul.mubr.bf16.vlgmr.msra.gmra.mrb[36].mxu0 %v2250_v40  ;;  %v2249_v54 = vmul.f32 %v5166_v39, %v2189_v38  ;;  %v2252_v28 = vpack.c.bf16 %v2248_v55, %v2248_v55  ;;  %v2481_v3 = vmul.f32 %v5179_v46, %v2189_v38  ;;  %v2484_v10 = vpack.c.bf16 %v2480_v31, %v2480_v31 }
 0x9db   :  { %4304 = vmatpush3.bf16.xpose.msra.mxu0 %v2243_v36  ;;  %4305 = vmatprep.mubr.msk.bf16.mxu0 %vm4867_vm0, %v4866_v33  ;;  %v2245_v49 = vpack.c.bf16 %v2191_v45, %v2191_v45  ;;  %v2699_v62 = vmul.f32 %v5179_v46, %v5537_v57  ;;  %v2702_v9 = vpack.c.bf16 %v2698_v8, %v2698_v8 }
 0x9dc   :  { %4309 = vmatprep.subr.bf16.mxu0 %v4866_v33  ;;  %v2253_v19 = vpack.c.bf16 %v2249_v54, %v2249_v54  ;;  %v2485_v44 = vpack.c.bf16 %v2481_v3, %v2481_v3 }
 0x9dd   :  { %4316 = vmatpush3.bf16.xpose.msra.mxu1 %v2245_v49  ;;  %v2703_v60 = vpack.c.bf16 %v2699_v62, %v2699_v62  ;;  %v2714_v4 = vsel %vm1025_vm5, %v2702_v9, 0 }
 0x9de   :  { %4327 = vmatprep.subr.bf16.mxu1 %v4866_v33 }
 0x9df   :  { %v2760_v61 = vsel %vm1025_vm5, %v2703_v60, 0 }
 0x9e2   :  { %4306 = vmatmul.mubr.bf16.vlgmr.msra.gmra.mrb[40].mxu0 %v2251_v51 }
 0x9e3   :  { %4310 = vmatpush3.bf16.xpose.msra.mxu0 %v2244_v53  ;;  %4311 = vmatprep.mubr.msk.bf16.mxu0 %vm4867_vm0, %v4866_v33 }
 0x9e4   :  { %4321 = vmatprep.subr.bf16.mxu0 %v4866_v33  ;;  %4318 = vmatmul.mubr.bf16.vlgmr.msra.gmra.mrb[48].mxu1 %v2253_v19 }
 0x9e5   :  { %4328 = vmatpush3.bf16.xpose.msra.mxu1 %v2243_v36  ;;  %4329 = vmatprep.mubr.msk.bf16.mxu1 %vm4867_vm0, %v4866_v33 }
 0x9e6   :  { %4339 = vmatprep.subr.bf16.mxu1 %v4866_v33 }
 0x9ea   :  { %4312 = vmatmul.mubr.bf16.vlgmr.msra.gmra.mrb[44].mxu0 %v2252_v28 }
 0x9eb   :  { %4322 = vmatpush3.bf16.xpose.msra.mxu0 %v2242_v20  ;;  %4323 = vmatprep.mubr.msk.bf16.mxu0 %vm4867_vm0, %v4866_v33 }
 0x9ec   :  { %4333 = vmatprep.subr.bf16.mxu0 %v4866_v33  ;;  %4330 = vmatmul.mubr.bf16.vlgmr.msra.gmra.mrb[52].mxu1 %v2483_v59 }
 0x9ed   :  { %4340 = vmatpush3.bf16.xpose.msra.mxu1 %v2245_v49  ;;  %4341 = vmatprep.mubr.msk.bf16.mxu1 %vm4867_vm0, %v4866_v33  ;;  %v4751_v49 = vld [vmem:[%s5772_s26] ss:$0 sm:$0xff] }
 0x9ee   :  { %4351 = vmatprep.subr.bf16.mxu1 %v4866_v33 }
 0x9f2   :  { %4324 = vmatmul.mubr.bf16.vlgmr.msra.gmra.mrb[48].mxu0 %v2482_v2 }
 0x9f3   :  { %4334 = vmatpush3.bf16.xpose.msra.mxu0 %v2244_v53  ;;  %4335 = vmatprep.mubr.msk.bf16.mxu0 %vm4867_vm0, %v4866_v33 }
 0x9f4   :  { %4345 = vmatprep.subr.bf16.mxu0 %v4866_v33  ;;  %4342 = vmatmul.mubr.bf16.vlgmr.msra.gmra.mrb[56].mxu1 %v2485_v44 }
 0x9f5   :  { %4352 = vmatpush3.bf16.msra.mxu1 %v2760_v61  ;;  %4353 = vmatprep.mubr.msk.bf16.mxu1 %vm4867_vm0, %v4866_v33 }
 0x9f6   :  { %4363 = vmatprep.subr.bf16.mxu1 %v4866_v33 }
 0x9fa   :  { %4336 = vmatmul.mubr.bf16.vlgmr.msra.gmra.mrb[52].mxu0 %v2484_v10  ;;  %v4753_v10 = vld [vmem:[%s5772_s26 + $0x2] ss:$0 sm:$0xff] }
 0x9fb   :  { %4346 = vmatpush3.bf16.msra.mxu0 %v2714_v4  ;;  %4347 = vmatprep.mubr.msk.bf16.mxu0 %vm4867_vm0, %v4866_v33 }
 0x9fc   :  { %4357 = vmatprep.subr.bf16.mxu0 %v4866_v33 }
 0xaad   :  { %v2288_v15 = vpop.f32.mrb[36].mxu0 }
 0xaae   :  { %v4301_v30 = vpop.f32.mrb[37].mxu0  ;;  %v2414_v2 = vmul.f32 0.25, %v2288_v15 }
 0xaaf   :  { %v2291_v22 = vpop.f32.mrb[38].mxu0 }
 0xab0   :  { %v4302_v1 = vpop.f32.mrb[39].mxu0 }
 0xab1   :  { %v2418_v1 = vadd.f32 %v4751_v49, %v2414_v2 }
 0xab5   :  { %v2328_v16 = vpop.f32.mrb[40].mxu0 }
 0xab6   :  { %v4307_v17 = vpop.f32.mrb[41].mxu0  ;;  %v2415_v54 = vmul.f32 0.25, %v2328_v16 }
 0xab7   :  { %v2331_v18 = vpop.f32.mrb[42].mxu0  ;;  %v2408_v21 = vpop.f32.mrb[48].mxu1  ;;  %v2422_v17 = vsel %vm733_vm6, %v2418_v1, -inf }
 0xab8   :  { %v4308_v5 = vpop.f32.mrb[43].mxu0  ;;  %v4319_v12 = vpop.f32.mrb[49].mxu1  ;;  %v2417_v60 = vmul.f32 0.25, %v2408_v21  ;;  %v2419_v9 = vadd.f32 %v4750_v50, %v2415_v54 }
 0xab9   :  { %v2411_v20 = vpop.f32.mrb[50].mxu1 }
 0xaba   :  { %v4320_v6 = vpop.f32.mrb[51].mxu1  ;;  %v2425_v15 = vsel %vm733_vm6, %v2419_v9, -inf  ;;  %v2421_v16 = vadd.f32 %v4752_v58, %v2417_v60 }
 0xabc   :  { %v2431_v5 = vsel %vm733_vm6, %v2421_v16, -inf }
 0xabd   :  { %v2368_v14 = vpop.f32.mrb[44].mxu0 }
 0xabe   :  { %v4313_v25 = vpop.f32.mrb[45].mxu0  ;;  %v2416_v30 = vmul.f32 0.25, %v2368_v14 }
 0xabf   :  { %v2371_v24 = vpop.f32.mrb[46].mxu0  ;;  %v2560_v26 = vpop.f32.mrb[52].mxu1 }
 0xac0   :  { %v4314_v0 = vpop.f32.mrb[47].mxu0  ;;  %v2647_v35 = vmul.f32 0.25, %v2560_v26  ;;  %v4331_v32 = vpop.f32.mrb[53].mxu1  ;;  %v2420_v18 = vadd.f32 %v4753_v10, %v2416_v30  ;;  %v2701_v30 = vmul.f32 %v5179_v46, %v5522_v43 }
 0xac1   :  { %v2563_v37 = vpop.f32.mrb[54].mxu1 }
 0xac2   :  { %v4332_v40 = vpop.f32.mrb[55].mxu1  ;;  %v2651_v41 = vadd.f32 %v4750_v50, %v2647_v35  ;;  %v2428_v21 = vsel %vm733_vm6, %v2420_v18, -inf }
 0xac4   :  { %v2657_v45 = vsel %vm733_vm6, %v2651_v41, -inf }
 0xac5   :  { %v2520_v42 = vpop.f32.mrb[48].mxu0  ;;  %2658 = vmax.xlane.f32.xlu1 %v2657_v45 }
 0xac6   :  { %v2646_v36 = vmul.f32 0.25, %v2520_v42  ;;  %v4325_v34 = vpop.f32.mrb[49].mxu0 }
 0xac7   :  { %v2523_v47 = vpop.f32.mrb[50].mxu0  ;;  %v2640_v52 = vpop.f32.mrb[56].mxu1 }
 0xac8   :  { %v4326_v38 = vpop.f32.mrb[51].mxu0  ;;  %v2650_v51 = vadd.f32 %v4751_v49, %v2646_v36  ;;  %v2649_v55 = vmul.f32 0.25, %v2640_v52  ;;  %v4343_v19 = vpop.f32.mrb[57].mxu1 }
 0xac9   :  { %v2643_v28 = vpop.f32.mrb[58].mxu1 }
 0xaca   :  { %v2654_v53 = vsel %vm733_vm6, %v2650_v51, -inf  ;;  %v4344_v56 = vpop.f32.mrb[59].mxu1  ;;  %v2653_v59 = vadd.f32 %v4752_v58, %v2649_v55 }
 0xacb   :  { %2655 = vmax.xlane.f32.xlu0 %v2654_v53 }
 0xacc   :  { %v2663_v31 = vsel %vm733_vm6, %v2653_v59, -inf }
 0xacd   :  { %v2600_v62 = vpop.f32.mrb[52].mxu0  ;;  %2664 = vmax.xlane.f32.xlu1 %v2663_v31 }
 0xace   :  { %v2648_v3 = vmul.f32 0.25, %v2600_v62  ;;  %v4337_v8 = vpop.f32.mrb[53].mxu0 }
 0xacf   :  { %v2603_v44 = vpop.f32.mrb[54].mxu0 }
 0xad0   :  { %v4338_v61 = vpop.f32.mrb[55].mxu0  ;;  %v2652_v4 = vadd.f32 %v4753_v10, %v2648_v3 }
 0xad1   :  { %2426 = vmax.xlane.f32.xlu1 %v2425_v15  ;;  %v2700_v15 = vmul.f32 %v5179_v46, %v5519_v29 }
 0xad2   :  { %v2660_v22 = vsel %vm733_vm6, %v2652_v4, -inf }
 0xad3   :  { %2661 = vmax.xlane.f32.xlu0 %v2660_v22 }
 0xad5   :  { %2432 = vmax.xlane.f32.xlu1 %v2431_v5 }
 0xad7   :  { %2423 = vmax.xlane.f32.xlu0 %v2422_v17  ;;  %v2705_v17 = vpack.c.bf16 %v2701_v30, %v2701_v30 }
 0xadb   :  { %2429 = vmax.xlane.f32.xlu0 %v2428_v21 }
 0xb52   :  { %v2659_v12 = vpop.xlane.xlu1 %2658 }
 0xb53   :  { %v2667_v20 = vsub.f32 %v2651_v41, %v2659_v12 }
 0xb55   :  { %v2672_v6 = vmul.f32 1.442695, %v2667_v20  ;;  %v2704_v20 = vpack.c.bf16 %v2700_v15, %v2700_v15 }
 0xb57   :  { %4678 = vpow2.f32 %v2672_v6 }
 0xb58   :  { %v2656_v14 = vpop.xlane.xlu0 %2655 }
 0xb59   :  { %v2666_v25 = vsub.f32 %v2650_v51, %v2656_v14 }
 0xb5a   :  { %v2665_v0 = vpop.xlane.xlu1 %2664 }
 0xb5b   :  { %v2670_v24 = vmul.f32 1.442695, %v2666_v25  ;;  %v2669_v26 = vsub.f32 %v2653_v59, %v2665_v0  ;;  %v2467_v25 = vmul.f32 %v5166_v39, %v5537_v57  ;;  %v2806_v57 = vsel %vm1025_vm5, %v2704_v20, 0 }
 0xb5d   :  { %4680 = vpow2.f32 %v2670_v24  ;;  %v2676_v35 = vmul.f32 1.442695, %v2669_v26  ;;  %v2852_v24 = vsel %vm1025_vm5, %v2705_v17, 0 }
 0xb5e   :  { %v2427_v37 = vpop.xlane.xlu1 %2426 }
 0xb5f   :  { %4682 = vpow2.f32 %v2676_v35  ;;  %v2435_v50 = vsub.f32 %v2419_v9, %v2427_v37  ;;  %v2466_v35 = vmul.f32 %v5166_v39, %v5543_v63  ;;  %v2469_v63 = vmul.f32 %v5166_v39, %v5522_v43 }
 0xb60   :  { %v2662_v32 = vpop.xlane.xlu0 %2661 }
 0xb61   :  { %v2668_v40 = vsub.f32 %v2652_v4, %v2662_v32  ;;  %v4679_v36 = vpop.eup %4678  ;;  %v2440_v34 = vmul.f32 1.442695, %v2435_v50  ;;  %v2471_v32 = vpack.c.bf16 %v2467_v25, %v2467_v25 }
 0xb62   :  { %v2433_v41 = vpop.xlane.xlu1 %2432  ;;  %v2681_v47 = vsel %vm733_vm6, %v4679_v36, 0.0 }
 0xb63   :  { %v2674_v42 = vmul.f32 1.442695, %v2668_v40  ;;  %v2437_v49 = vsub.f32 %v2421_v16, %v2433_v41  ;;  %2682 = vadd.xlane.f32.xlu1 %v2681_v47  ;;  %v2944_v41 = vsel %vm1025_vm5, %v2471_v32, 0 }
 0xb64   :  { %v2424_v45 = vpop.xlane.xlu0 %2423 }
 0xb65   :  { %4684 = vpow2.f32 %v2674_v42  ;;  %v2434_v38 = vsub.f32 %v2418_v1, %v2424_v45  ;;  %v2444_v53 = vmul.f32 1.442695, %v2437_v49 }
 0xb66   :  { %4686 = vpow2.f32 %v2440_v34  ;;  %v2470_v34 = vpack.c.bf16 %v2466_v35, %v2466_v35 }
 0xb67   :  { %v4681_v51 = vpop.eup %4680  ;;  %v2438_v52 = vmul.f32 1.442695, %v2434_v38 }
 0xb68   :  { %v2430_v54 = vpop.xlane.xlu0 %2429  ;;  %v2678_v55 = vsel %vm733_vm6, %v4681_v51, 0.0  ;;  %v2898_v43 = vsel %vm1025_vm5, %v2470_v34, 0 }
 0xb69   :  { %4688 = vpow2.f32 %v2438_v52  ;;  %v2436_v19 = vsub.f32 %v2420_v18, %v2430_v54  ;;  %2679 = vadd.xlane.f32.xlu0 %v2678_v55  ;;  %v4683_v56 = vpop.eup %4682  ;;  %v2473_v52 = vpack.c.bf16 %v2469_v63, %v2469_v63 }
 0xb6a   :  { %4690 = vpow2.f32 %v2444_v53  ;;  %v2687_v58 = vsel %vm733_vm6, %v4683_v56, 0.0 }
 0xb6b   :  { %v2442_v28 = vmul.f32 1.442695, %v2436_v19  ;;  %2688 = vadd.xlane.f32.xlu1 %v2687_v58 }
 0xb6d   :  { %4692 = vpow2.f32 %v2442_v28  ;;  %v4590_v28 = vld [vmem:[#allocation2 + $0x40] sm:$0xff]  }
 0xb6f   :  { %v4685_v59 = vpop.eup %4684 }
 0xb70   :  { %v5588_v62 = vpop.eup %4686  ;;  %v2684_v2 = vsel %vm733_vm6, %v4685_v59, 0.0 }
 0xb71   :  { %v2449_v3 = vsel %vm733_vm6, %v5588_v62, 0.0  ;;  %2685 = vadd.xlane.f32.xlu0 %v2684_v2 }
 0xb72   :  { %2450 = vadd.xlane.f32.xlu1 %v2449_v3 }
 0xb73   :  { %v5593_v8 = vpop.eup %4688 }
 0xb74   :  { %v5595_v60 = vpop.eup %4690  ;;  %v2446_v31 = vsel %vm733_vm6, %v5593_v8, 0.0 }
 0xb75   :  { %v2455_v44 = vsel %vm733_vm6, %v5595_v60, 0.0  ;;  %2447 = vadd.xlane.f32.xlu0 %v2446_v31  ;;  %v4593_v31 = vld [vmem:[#allocation2 + $0x58] sm:$0xff]  }
 0xb76   :  { %2456 = vadd.xlane.f32.xlu1 %v2455_v44  ;;  %v4594_v44 = vld [vmem:[#allocation2 + $0x60] sm:$0xff]  }
 0xb77   :  { %v5601_v9 = vpop.eup %4692 }
 0xb78   :  { %v2452_v61 = vsel %vm733_vm6, %v5601_v9, 0.0 }
 0xb79   :  { %2453 = vadd.xlane.f32.xlu0 %v2452_v61  ;;  %v4596_v61 = vld [vmem:[#allocation2 + $0x70] sm:$0xff]  }
 0xbf0   :  { %v2683_v10 = vpop.xlane.xlu1 %2682 }
 0xbf1   :  { %4694 = vrcp.f32 %v2683_v10  ;;  %v4597_v10 = vld [vmem:[#allocation2 + $0x78] sm:$0xff]  }
 0xbf6   :  { %v2680_v4 = vpop.xlane.xlu0 %2679 }
 0xbf7   :  { %4696 = vrcp.f32 %v2680_v4 }
 0xbf8   :  { %v2689_v22 = vpop.xlane.xlu1 %2688 }
 0xbf9   :  { %4698 = vrcp.f32 %v2689_v22 }
 0xbfb   :  { %v4695_v1 = vpop.eup %4694 }
 0xbfc   :  { %v2695_v18 = vmul.f32 %v4695_v1, %v4679_v36 }
 0xbfe   :  { %v2686_v16 = vpop.xlane.xlu0 %2685  ;;  %v2707_v12 = vpack.c.bf16 %v2695_v18, %v2695_v18 }
 0xbff   :  { %v2451_v5 = vpop.xlane.xlu1 %2450  ;;  %4700 = vrcp.f32 %v2686_v16 }
 0xc00   :  { %4702 = vrcp.f32 %v2451_v5  ;;  %4354 = vmatmul.mubr.msk.bf16.vlgmr.msra.gmra.mrb[60].mxu1 %vm733_vm6, %v2707_v12 }
 0xc01   :  { %v4697_v21 = vpop.eup %4696  ;;  %4364 = vmatpush3.bf16.msra.mxu1 %v2852_v24  ;;  %4365 = vmatprep.mubr.msk.bf16.mxu1 %vm4867_vm0, %v4866_v33 }
 0xc02   :  { %v2694_v6 = vmul.f32 %v4697_v21, %v4681_v51  ;;  %v2448_v14 = vpop.xlane.xlu0 %2447  ;;  %4375 = vmatprep.subr.bf16.mxu1 %v4866_v33  ;;  %v2468_v51 = vmul.f32 %v5166_v39, %v5519_v29  ;;  %v3036_v39 = vsel %vm1025_vm5, %v2473_v52, 0  ;;  %v4603_v52 = vld [vmem:[#allocation6 + $0x68] sm:$0xff]  }
 0xc03   :  { %4704 = vrcp.f32 %v2448_v14  ;;  %v2457_v0 = vpop.xlane.xlu1 %2456  ;;  %v4699_v26 = vpop.eup %4698 }
 0xc04   :  { %v2706_v46 = vpack.c.bf16 %v2694_v6, %v2694_v6  ;;  %v2697_v37 = vmul.f32 %v4699_v26, %v4683_v56  ;;  %4706 = vrcp.f32 %v2457_v0  ;;  %v2472_v19 = vpack.c.bf16 %v2468_v51, %v2468_v51  ;;  %v3924_v26 = vld [vmem:[%s5756_s7 + $0x1] ss:$0 sm:$0xff]  ;;  %v4601_v51 = vld [vmem:[#allocation6 + $0x58] sm:$0xff]  }
 0xc06   :  { %4348 = vmatmul.mubr.msk.bf16.vlgmr.msra.gmra.mrb[56].mxu0 %vm733_vm6, %v2706_v46  ;;  %v2454_v40 = vpop.xlane.xlu0 %2453  ;;  %v2709_v42 = vpack.c.bf16 %v2697_v37, %v2697_v37 }
 0xc07   :  { %4358 = vmatpush3.bf16.msra.mxu0 %v2806_v57  ;;  %4359 = vmatprep.mubr.msk.bf16.mxu0 %vm4867_vm0, %v4866_v33  ;;  %4708 = vrcp.f32 %v2454_v40 }
 0xc08   :  { %4369 = vmatprep.subr.bf16.mxu0 %v4866_v33  ;;  %4366 = vmatmul.mubr.msk.bf16.vlgmr.msra.gmra.mrb[64].mxu1 %vm733_vm6, %v2709_v42 }
 0xc09   :  { %v4701_v50 = vpop.eup %4700  ;;  %4376 = vmatpush3.bf16.msra.mxu1 %v2944_v41  ;;  %4377 = vmatprep.mubr.msk.bf16.mxu1 %vm4867_vm0, %v4866_v33 }
 0xc0a   :  { %v4703_v36 = vpop.eup %4702  ;;  %v2696_v45 = vmul.f32 %v4701_v50, %v4685_v59  ;;  %4387 = vmatprep.subr.bf16.mxu1 %v4866_v33  ;;  %v2990_v59 = vsel %vm1025_vm5, %v2472_v19, 0 }
 0xc0b   :  { %v2463_v49 = vmul.f32 %v4703_v36, %v5588_v62 }
 0xc0c   :  { %v2708_v47 = vpack.c.bf16 %v2696_v45, %v2696_v45 }
 0xc0d   :  { %v4705_v38 = vpop.eup %4704  ;;  %v2475_v54 = vpack.c.bf16 %v2463_v49, %v2463_v49  ;;  %v4600_v49 = vld [vmem:[#allocation6 + $0x50] sm:$0xff]  }
 0xc0e   :  { %4360 = vmatmul.mubr.msk.bf16.vlgmr.msra.gmra.mrb[60].mxu0 %vm733_vm6, %v2708_v47  ;;  %v2462_v53 = vmul.f32 %v4705_v38, %v5593_v8  ;;  %v4707_v55 = vpop.eup %4706  ;;  %v4591_v8 = vld [vmem:[#allocation2 + $0x48] sm:$0xff]   ;;  %v4598_v47 = vld [vmem:[#allocation6 + $0x40] sm:$0xff]  }
 0xc0f   :  { %4370 = vmatpush3.bf16.msra.mxu0 %v2898_v43  ;;  %4371 = vmatprep.mubr.msk.bf16.mxu0 %vm4867_vm0, %v4866_v33  ;;  %v2465_v58 = vmul.f32 %v4707_v55, %v5595_v60  ;;  %v4592_v60 = vld [vmem:[#allocation2 + $0x50] sm:$0xff]   ;;  %v4599_v38 = vld [vmem:[#allocation6 + $0x48] sm:$0xff]   ;;  %v4602_v43 = vld [vmem:[#allocation6 + $0x60] sm:$0xff]  }
 0xc10   :  { %4381 = vmatprep.subr.bf16.mxu0 %v4866_v33  ;;  %4378 = vmatmul.mubr.msk.bf16.vlgmr.msra.gmra.mrb[60].mxu1 %vm733_vm6, %v2475_v54  ;;  %v2474_v29 = vpack.c.bf16 %v2462_v53, %v2462_v53  ;;  %v4604_v53 = vld [vmem:[#allocation6 + $0x70] sm:$0xff]   ;;  %v4605_v54 = vld [vmem:[#allocation6 + $0x78] sm:$0xff]  }
 0xc11   :  { %4388 = vmatpush3.bf16.msra.mxu1 %v3036_v39  ;;  %4389 = vmatprep.mubr.msk.bf16.mxu1 %vm4867_vm0, %v4866_v33  ;;  %v4709_v56 = vpop.eup %4708  ;;  %v2477_v2 = vpack.c.bf16 %v2465_v58, %v2465_v58 }
 0xc12   :  { %v2464_v62 = vmul.f32 %v4709_v56, %v5601_v9  ;;  %v4595_v9 = vld [vmem:[#allocation2 + $0x68] sm:$0xff]   ;;  %4413 = vmatprep.subr.bf16.mxu1 %v4598_v47 }
 0xc14   :  { %v2476_v3 = vpack.c.bf16 %v2464_v62, %v2464_v62 }
 0xc16   :  { %4372 = vmatmul.mubr.msk.bf16.vlgmr.msra.gmra.mrb[56].mxu0 %vm733_vm6, %v2474_v29 }
 0xc17   :  { %4382 = vmatpush3.bf16.msra.mxu0 %v2990_v59  ;;  %4383 = vmatprep.mubr.msk.bf16.mxu0 %vm4867_vm0, %v4866_v33 }
 0xc18   :  { %4393 = vmatprep.subr.bf16.mxu0 %v4590_v28  ;;  %4390 = vmatmul.mubr.msk.bf16.vlgmr.msra.gmra.mrb[64].mxu1 %vm733_vm6, %v2477_v2 }
 0xc19   :  { %4414 = vmatpush3.bf16.msra.mxu1 %v4598_v47  ;;  %v4607_v47 = vld [vmem:[#allocation8 + $0x48] sm:$0xff]  }
 0xc1a   :  { %4415 = vmatprep.subr.bf16.mxu1 %v4599_v38 }
 0xc1d   :  { %4416 = vmatpush3.bf16.msra.mxu1 %v4599_v38  ;;  %v4608_v38 = vld [vmem:[#allocation8 + $0x50] sm:$0xff]  }
 0xc1e   :  { %4384 = vmatmul.mubr.msk.bf16.vlgmr.msra.gmra.mrb[60].mxu0 %vm733_vm6, %v2476_v3  ;;  %4417 = vmatprep.subr.bf16.mxu1 %v4600_v49 }
 0xc1f   :  { %4394 = vmatpush3.bf16.msra.mxu0 %v4590_v28 }
 0xc20   :  { %4395 = vmatprep.subr.bf16.mxu0 %v4591_v8 }
 0xc21   :  { %4418 = vmatpush3.bf16.msra.mxu1 %v4600_v49  ;;  %v4609_v49 = vld [vmem:[#allocation8 + $0x58] sm:$0xff]  }
 0xc22   :  { %4419 = vmatprep.subr.bf16.mxu1 %v4601_v51 }
 0xc23   :  { %4396 = vmatpush3.bf16.msra.mxu0 %v4591_v8 }
 0xc24   :  { %4397 = vmatprep.subr.bf16.mxu0 %v4592_v60 }
 0xc25   :  { %4420 = vmatpush3.bf16.msra.mxu1 %v4601_v51  ;;  %v4610_v51 = vld [vmem:[#allocation8 + $0x60] sm:$0xff]  }
 0xc26   :  { %4421 = vmatprep.subr.bf16.mxu1 %v4602_v43 }
 0xc27   :  { %4398 = vmatpush3.bf16.msra.mxu0 %v4592_v60 }
 0xc28   :  { %4399 = vmatprep.subr.bf16.mxu0 %v4593_v31 }
 0xc29   :  { %4422 = vmatpush3.bf16.msra.mxu1 %v4602_v43  ;;  %v4611_v43 = vld [vmem:[#allocation8 + $0x68] sm:$0xff]  }
 0xc2a   :  { %4423 = vmatprep.subr.bf16.mxu1 %v4603_v52 }
 0xc2b   :  { %4400 = vmatpush3.bf16.msra.mxu0 %v4593_v31 }
 0xc2c   :  { %4401 = vmatprep.subr.bf16.mxu0 %v4594_v44 }
 0xc2d   :  { %4424 = vmatpush3.bf16.msra.mxu1 %v4603_v52  ;;  %v4612_v52 = vld [vmem:[#allocation8 + $0x70] sm:$0xff]  }
 0xc2e   :  { %4425 = vmatprep.subr.bf16.mxu1 %v4604_v53 }
 0xc2f   :  { %4402 = vmatpush3.bf16.msra.mxu0 %v4594_v44 }
 0xc30   :  { %4403 = vmatprep.subr.bf16.mxu0 %v4595_v9 }
 0xc31   :  { %4426 = vmatpush3.bf16.msra.mxu1 %v4604_v53  ;;  %v3935_v53 = vld [vmem:[%s5760_s11 + $0x1] ss:$0 sm:$0xff] }
 0xc32   :  { %4427 = vmatprep.subr.bf16.mxu1 %v4605_v54 }
 0xc33   :  { %4404 = vmatpush3.bf16.msra.mxu0 %v4595_v9 }
 0xc34   :  { %4405 = vmatprep.subr.bf16.mxu0 %v4596_v61 }
 0xc35   :  { %4428 = vmatpush3.bf16.msra.mxu1 %v4605_v54 }
 0xc36   :  { %4453 = vmatprep.subr.mxu1 %v4866_v33 }
 0xc37   :  { %4406 = vmatpush3.bf16.msra.mxu0 %v4596_v61 }
 0xc38   :  { %4407 = vmatprep.subr.bf16.mxu0 %v4597_v10 }
 0xc3b   :  { %4408 = vmatpush3.bf16.msra.mxu0 %v4597_v10 }
 0xce3   :  { %v2980_v4 = vpop.f32.mrb[60].mxu1 }
 0xce4   :  { %v4379_v30 = vpop.f32.mrb[61].mxu1 }
 0xce5   :  { %v2983_v22 = vpop.f32.mrb[62].mxu1 }
 0xce6   :  { %v4380_v1 = vpop.f32.mrb[63].mxu1 }
 0xce9   :  { %v2934_v15 = vpop.f32.mrb[56].mxu0 }
 0xcea   :  { %v3078_v16 = vpack.c.bf16 %v2980_v4, %v2934_v15  ;;  %v4373_v17 = vpop.f32.mrb[57].mxu0 }
 0xceb   :  { %v2937_v18 = vpop.f32.mrb[58].mxu0  ;;  %v3072_v21 = vpop.f32.mrb[64].mxu1 }
 0xcec   :  { %v4374_v5 = vpop.f32.mrb[59].mxu0  ;;  %4409 = vmatprep.mubr.bf16.mxu0 %v3078_v16  ;;  %v4391_v12 = vpop.f32.mrb[65].mxu1 }
 0xced   :  { %v3075_v20 = vpop.f32.mrb[66].mxu1 }
 0xcee   :  { %v4392_v6 = vpop.f32.mrb[67].mxu1 }
 0xcef   :  { %v3933_v6 = vld [vmem:[%s5757_s8 + $0x1] ss:$0 sm:$0xff] }
 0xcf1   :  { %v3026_v14 = vpop.f32.mrb[60].mxu0 }
 0xcf2   :  { %v3079_v25 = vpack.c.bf16 %v3072_v21, %v3026_v14  ;;  %v4385_v24 = vpop.f32.mrb[61].mxu0 }
 0xcf3   :  { %v3029_v46 = vpop.f32.mrb[62].mxu0 }
 0xcf4   :  { %v4386_v0 = vpop.f32.mrb[63].mxu0  ;;  %4410 = vmatmul.mubr.bf16.vlgmr.msra.gmra.mrb[64].mxu0 %v3079_v25 }
 0xdc7   :  { %v4411_v35 = vpop.f32.mrb[64].mxu0 }
 0xdc8   :  { %v3177_v57 = vadd.f32 %v4411_v35, %v3924_v26  ;;  %v3168_v32 = vpop.f32.mrb[65].mxu0 }
 0xdc9   :  { %v4412_v37 = vpop.f32.mrb[66].mxu0  ;;  %v3169_v50 = vadd.f32 %v3924_v26, %v3168_v32 }
 0xdca   :  { %v5655_v40 = vadd.f32 %v3177_v57, %v5498_v13  ;;  %v3180_v42 = vadd.f32 %v4412_v37, %v3924_v26  ;;  %v3171_v36 = vpop.f32.mrb[67].mxu0  ;;  %v3934_v57 = vld [vmem:[%s5758_s9 + $0x1] ss:$0 sm:$0xff] }
 0xdcb   :  { %v3172_v45 = vadd.f32 %v3924_v26, %v3171_v36  ;;  %v5662_v63 = vadd.f32 %v3169_v50, %v5490_v48 }
 0xdcc   :  { %v5658_v34 = vadd.f32 %v3180_v42, %v5500_v11  ;;  %3191 = vadd.xlane.f32.xlu0 %v5655_v40  ;;  %v3201_v48 = vmul.f32 %v5655_v40, %v5655_v40 }
 0xdcd   :  { %v5666_v41 = vadd.f32 %v3172_v45, %v5492_v7  ;;  %v3199_v13 = vmul.f32 %v5662_v63, %v5662_v63 }
 0xdce   :  { %3193 = vadd.xlane.f32.xlu1 %v5658_v34  ;;  %v3202_v7 = vmul.f32 %v5658_v34, %v5658_v34 }
 0xdcf   :  { %v3200_v11 = vmul.f32 %v5666_v41, %v5666_v41 }
 0xdd0   :  { %3187 = vadd.xlane.f32.xlu0 %v5662_v63 }
 0xdd2   :  { %3189 = vadd.xlane.f32.xlu1 %v5666_v41 }
 0xdd4   :  { %3203 = vadd.xlane.f32.xlu0 %v3199_v13 }
 0xdd6   :  { %3205 = vadd.xlane.f32.xlu1 %v3200_v11 }
 0xdd8   :  { %3207 = vadd.xlane.f32.xlu0 %v3201_v48 }
 0xdda   :  { %3209 = vadd.xlane.f32.xlu1 %v3202_v7  ;;  %v4606_v7 = vld [vmem:[#allocation8 + $0x40] sm:$0xff]  }
 0xddb   :  { %4433 = vmatprep.subr.bf16.mxu0 %v4606_v7 }
 0xddc   :  { %4434 = vmatpush3.bf16.msra.mxu0 %v4606_v7 }
 0xddd   :  { %4435 = vmatprep.subr.bf16.mxu0 %v4607_v47 }
 0xde0   :  { %4436 = vmatpush3.bf16.msra.mxu0 %v4607_v47 }
 0xde1   :  { %4437 = vmatprep.subr.bf16.mxu0 %v4608_v38 }
 0xde4   :  { %4438 = vmatpush3.bf16.msra.mxu0 %v4608_v38 }
 0xde5   :  { %4439 = vmatprep.subr.bf16.mxu0 %v4609_v49 }
 0xde8   :  { %4440 = vmatpush3.bf16.msra.mxu0 %v4609_v49 }
 0xde9   :  { %4441 = vmatprep.subr.bf16.mxu0 %v4610_v51 }
 0xdec   :  { %4442 = vmatpush3.bf16.msra.mxu0 %v4610_v51 }
 0xded   :  { %4443 = vmatprep.subr.bf16.mxu0 %v4611_v43 }
 0xdf0   :  { %4444 = vmatpush3.bf16.msra.mxu0 %v4611_v43 }
 0xdf1   :  { %4445 = vmatprep.subr.bf16.mxu0 %v4612_v52 }
 0xdf4   :  { %4446 = vmatpush3.bf16.msra.mxu0 %v4612_v52 }
 0xe59   :  { %v3192_v55 = vpop.xlane.xlu0 %3191 }
 0xe5a   :  { %v3197_v59 = vmul.f32 0.03125, %v3192_v55 }
 0xe5b   :  { %v3194_v19 = vpop.xlane.xlu1 %3193 }
 0xe5c   :  { %v3198_v3 = vmul.f32 0.03125, %v3194_v19  ;;  %v3217_v61 = vmul.f32 %v3197_v59, %v3197_v59  ;;  %v3225_v46 = vsub.f32 %v5655_v40, %v3197_v59 }
 0xe5d   :  { %v3188_v39 = vpop.xlane.xlu0 %3187 }
 0xe5e   :  { %v3195_v29 = vmul.f32 0.03125, %v3188_v39  ;;  %v3218_v22 = vmul.f32 %v3198_v3, %v3198_v3  ;;  %v3226_v32 = vsub.f32 %v5658_v34, %v3198_v3 }
 0xe5f   :  { %v3190_v28 = vpop.xlane.xlu1 %3189 }
 0xe60   :  { %v3196_v56 = vmul.f32 0.03125, %v3190_v28  ;;  %v3215_v62 = vmul.f32 %v3195_v29, %v3195_v29  ;;  %v3223_v12 = vsub.f32 %v5662_v63, %v3195_v29 }
 0xe61   :  { %v3204_v58 = vpop.xlane.xlu0 %3203 }
 0xe62   :  { %v3211_v2 = vmul.f32 0.03125, %v3204_v58  ;;  %v3216_v60 = vmul.f32 %v3196_v56, %v3196_v56  ;;  %v3224_v14 = vsub.f32 %v5666_v41, %v3196_v56 }
 0xe63   :  { %v3206_v8 = vpop.xlane.xlu1 %3205 }
 0xe64   :  { %v3219_v31 = vsub.f32 %v3211_v2, %v3215_v62  ;;  %v3212_v44 = vmul.f32 0.03125, %v3206_v8 }
 0xe65   :  { %v3208_v9 = vpop.xlane.xlu0 %3207 }
 0xe66   :  { %v3227_v10 = vadd.f32 1e-12, %v3219_v31  ;;  %v3220_v4 = vsub.f32 %v3212_v44, %v3216_v60  ;;  %v3213_v30 = vmul.f32 0.03125, %v3208_v9 }
 0xe67   :  { %v3210_v1 = vpop.xlane.xlu1 %3209 }
 0xe68   :  { %4710 = vrsqrt.f32 %v3227_v10  ;;  %v3228_v15 = vadd.f32 1e-12, %v3220_v4  ;;  %v3221_v16 = vsub.f32 %v3213_v30, %v3217_v61  ;;  %v3214_v17 = vmul.f32 0.03125, %v3210_v1 }
 0xe6a   :  { %4712 = vrsqrt.f32 %v3228_v15  ;;  %v3229_v18 = vadd.f32 1e-12, %v3221_v16  ;;  %v3222_v5 = vsub.f32 %v3214_v17, %v3218_v22 }
 0xe6c   :  { %4714 = vrsqrt.f32 %v3229_v18  ;;  %v3230_v21 = vadd.f32 1e-12, %v3222_v5 }
 0xe6e   :  { %4716 = vrsqrt.f32 %v3230_v21 }
 0xe72   :  { %v4711_v20 = vpop.eup %4710 }
 0xe73   :  { %v3235_v25 = vmul.f32 %v4711_v20, %v3223_v12 }
 0xe74   :  { %v4713_v24 = vpop.eup %4712 }
 0xe75   :  { %v3236_v0 = vmul.f32 %v4713_v24, %v3224_v14  ;;  %v3245_v26 = vmul.f32 %v3933_v6, %v3235_v25 }
 0xe76   :  { %v4715_v35 = vpop.eup %4714 }
 0xe77   :  { %v3246_v37 = vmul.f32 %v3933_v6, %v3236_v0  ;;  %v3237_v50 = vmul.f32 %v4715_v35, %v3225_v46  ;;  %v5689_v36 = vadd.f32 %v3934_v57, %v3245_v26 }
 0xe78   :  { %v4717_v42 = vpop.eup %4716 }
 0xe79   :  { %v5691_v45 = vadd.f32 %v3934_v57, %v3246_v37  ;;  %v3238_v63 = vmul.f32 %v4717_v42, %v3226_v32  ;;  %v3247_v41 = vmul.f32 %v3933_v6, %v3237_v50 }
 0xe7b   :  { %v3259_v40 = vpack.c.bf16 %v5691_v45, %v5689_v36  ;;  %v3248_v13 = vmul.f32 %v3933_v6, %v3238_v63  ;;  %v5695_v11 = vadd.f32 %v3934_v57, %v3247_v41 }
 0xe7d   :  { %4429 = vmatprep.mubr.bf16.mxu1 %v3259_v40  ;;  %v5697_v48 = vadd.f32 %v3934_v57, %v3248_v13  ;;  %v3944_v40 = vld [vmem:[%s5762_s13 + $0x1] ss:$0 sm:$0xff] }
 0xe7f   :  { %v3260_v34 = vpack.c.bf16 %v5697_v48, %v5695_v11 }
 0xe81   :  { %4430 = vmatmul.mubr.bf16.vlgmr.msra.gmra.mrb[68].mxu1 %v3260_v34 }
 0xe82   :  { %4455 = vmatprep.mubr.msk.f32.mxu1 %vm4867_vm0, %v4866_v33  ;;  %v4613_v33 = vld [vmem:[#allocation8 + $0x78] sm:$0xff]  }
 0xe83   :  { %4447 = vmatprep.subr.bf16.mxu0 %v4613_v33 }
 0xe84   :  { %4448 = vmatpush3.bf16.msra.mxu0 %v4613_v33 }
 0xf54   :  { %v4431_v54 = vpop.f32.mrb[68].mxu1 }
 0xf55   :  { %v3358_v55 = vadd.f32 %v4431_v54, %v3935_v53  ;;  %v3349_v19 = vpop.f32.mrb[69].mxu1 }
 0xf56   :  { %v3350_v39 = vadd.f32 %v3935_v53, %v3349_v19  ;;  %v4432_v29 = vpop.f32.mrb[70].mxu1 }
 0xf57   :  { %v3366_v28 = vmul.f32 %v3358_v55, %v3358_v55  ;;  %v3361_v56 = vadd.f32 %v4432_v29, %v3935_v53  ;;  %v3352_v58 = vpop.f32.mrb[71].mxu1 }
 0xf58   :  { %v3364_v59 = vmul.f32 %v3350_v39, %v3350_v39  ;;  %v3353_v62 = vadd.f32 %v3935_v53, %v3352_v58 }
 0xf59   :  { %v3370_v2 = vmul.f32 %v3366_v28, %v3358_v55  ;;  %v3367_v3 = vmul.f32 %v3361_v56, %v3361_v56 }
 0xf5a   :  { %v3368_v8 = vmul.f32 %v3364_v59, %v3350_v39  ;;  %v3365_v60 = vmul.f32 %v3353_v62, %v3353_v62 }
 0xf5b   :  { %v3374_v31 = vmul.f32 0.044715, %v3370_v2  ;;  %v3371_v44 = vmul.f32 %v3367_v3, %v3361_v56 }
 0xf5c   :  { %v3372_v9 = vmul.f32 0.044715, %v3368_v8  ;;  %v3369_v61 = vmul.f32 %v3365_v60, %v3353_v62 }
 0xf5d   :  { %v3378_v10 = vadd.f32 %v3374_v31, %v3358_v55  ;;  %v3375_v4 = vmul.f32 0.044715, %v3371_v44 }
 0xf5e   :  { %v3376_v30 = vadd.f32 %v3372_v9, %v3350_v39  ;;  %v3373_v22 = vmul.f32 0.044715, %v3369_v61 }
 0xf5f   :  { %v3382_v1 = vmul.f32 0.7978846, %v3378_v10  ;;  %v3379_v15 = vadd.f32 %v3375_v4, %v3361_v56 }
 0xf60   :  { %v3380_v16 = vmul.f32 0.7978846, %v3376_v30  ;;  %v3377_v17 = vadd.f32 %v3373_v22, %v3353_v62 }
 0xf61   :  { %4718 = vtanh.f32 %v3382_v1  ;;  %v3383_v18 = vmul.f32 0.7978846, %v3379_v15 }
 0xf62   :  { %4720 = vtanh.f32 %v3380_v16  ;;  %v3381_v5 = vmul.f32 0.7978846, %v3377_v17 }
 0xf63   :  { %4722 = vtanh.f32 %v3383_v18 }
 0xf64   :  { %4724 = vtanh.f32 %v3381_v5 }
 0xf6b   :  { %v4719_v21 = vpop.eup %4718 }
 0xf6c   :  { %v4721_v12 = vpop.eup %4720  ;;  %v3390_v20 = vadd.f32 1.0, %v4719_v21 }
 0xf6d   :  { %v4723_v6 = vpop.eup %4722  ;;  %v3388_v14 = vadd.f32 1.0, %v4721_v12 }
 0xf6e   :  { %v4725_v25 = vpop.eup %4724  ;;  %v3394_v24 = vmul.f32 0.5, %v3390_v20  ;;  %v3391_v46 = vadd.f32 1.0, %v4723_v6 }
 0xf6f   :  { %v3389_v0 = vadd.f32 1.0, %v4725_v25  ;;  %v3392_v26 = vmul.f32 0.5, %v3388_v14  ;;  %v3953_v14 = vld [vmem:[%s5763_s14 + $0x1] ss:$0 sm:$0xff]  ;;  %s4868_s14 = smov [#allocation9]  }
 0xf70   :  { %v3395_v35 = vmul.f32 0.5, %v3391_v46  ;;  %v3398_v32 = vmul.f32 %v3394_v24, %v3358_v55 }
 0xf71   :  { %v3393_v57 = vmul.f32 0.5, %v3389_v0  ;;  %v3396_v50 = vmul.f32 %v3392_v26, %v3350_v39 }
 0xf72   :  { %v3399_v37 = vmul.f32 %v3395_v35, %v3361_v56 }
 0xf73   :  { %v3397_v42 = vmul.f32 %v3393_v57, %v3353_v62  ;;  %v3954_v57 = vld [vmem:[%s5764_s15 + $0x1] ss:$0 sm:$0xff]  ;;  %s3758_s15 = sshll.u32 %s4868_s14, 4  ;;  %s3759_s15 = int_to_ptr.vmem [resolvable:$true] %s3758_s15 }
 0xf74   :  { %v3401_v63 = vpack.c.bf16 %v3399_v37, %v3398_v32  ;;  %s4820_s27 = scalar_lea.vmem %s3759_s15, 32  ;;  %p4825_p11 = scmp.lt.s32.totalorder %s3759_s15, %s3759_s15 }
 0xf75   :  { %v3400_v41 = vpack.c.bf16 %v3397_v42, %v3396_v50  ;;  %p4821_p10 = scmp.ne.s32.totalorder %s3759_s15, %s4820_s27  ;;  %p4826_p12 = scmp.lt.s32.totalorder %s4820_s27, %s4820_s27 }
 0xf77   :  { %4449 = vmatprep.mubr.bf16.mxu0 %v3400_v41  ;;  %p4827_p13 = por %p4826_p12, %p4825_p11 }
 0xf78   :  { %4450 = vmatmul.mubr.bf16.vlgmr.msra.gmra.mrb[68].mxu0 %v3401_v63 }
 0xf79   :  { %p4828_p0 = pnand %p4827_p13, %p4821_p10 }
0x104b   :  { %v4451_v13 = vpop.f32.mrb[68].mxu0 }
0x104c   :  { %v3499_v34 = vadd.f32 %v4451_v13, %v3944_v40  ;;  %v3490_v7 = vpop.f32.mrb[69].mxu0 }
0x104d   :  { %v4452_v47 = vpop.f32.mrb[70].mxu0  ;;  %v3491_v49 = vadd.f32 %v3944_v40, %v3490_v7 }
0x104e   :  { %v3507_v38 = vadd.f32 %v3499_v34, %v5695_v11  ;;  %v3502_v51 = vadd.f32 %v4452_v47, %v3944_v40  ;;  %v3493_v43 = vpop.f32.mrb[71].mxu0 }
0x104f   :  { %v3505_v33 = vadd.f32 %v3491_v49, %v5689_v36  ;;  %v3494_v53 = vadd.f32 %v3944_v40, %v3493_v43 }
0x1050   :  { %v3508_v52 = vadd.f32 %v3502_v51, %v5697_v48  ;;  %3513 = vadd.xlane.f32.xlu1 %v3507_v38  ;;  %v3523_v54 = vmul.f32 %v3507_v38, %v3507_v38 }
0x1051   :  { %v3506_v55 = vadd.f32 %v3494_v53, %v5691_v45  ;;  %v3521_v39 = vmul.f32 %v3505_v33, %v3505_v33 }
0x1052   :  { %3515 = vadd.xlane.f32.xlu0 %v3508_v52  ;;  %v3524_v19 = vmul.f32 %v3508_v52, %v3508_v52 }
0x1053   :  { %v3522_v11 = vmul.f32 %v3506_v55, %v3506_v55 }
0x1054   :  { %3509 = vadd.xlane.f32.xlu1 %v3505_v33 }
0x1056   :  { %3529 = vadd.xlane.f32.xlu0 %v3523_v54 }
0x1058   :  { %3511 = vadd.xlane.f32.xlu1 %v3506_v55 }
0x105a   :  { %3531 = vadd.xlane.f32.xlu0 %v3524_v19 }
0x105c   :  { %3525 = vadd.xlane.f32.xlu1 %v3521_v39 }
0x105e   :  { %3527 = vadd.xlane.f32.xlu0 %v3522_v11 }
0x10dd   :  { %v3514_v29 = vpop.xlane.xlu1 %3513 }
0x10de   :  { %v3519_v48 = vmul.f32 0.03125, %v3514_v29 }
0x10df   :  { %v3516_v28 = vpop.xlane.xlu0 %3515 }
0x10e0   :  { %v3539_v36 = vmul.f32 %v3519_v48, %v3519_v48  ;;  %v3520_v59 = vmul.f32 0.03125, %v3516_v28  ;;  %v3547_v12 = vsub.f32 %v3507_v38, %v3519_v48 }
0x10e1   :  { %v3510_v56 = vpop.xlane.xlu1 %3509 }
0x10e2   :  { %v3517_v3 = vmul.f32 0.03125, %v3510_v56  ;;  %v3540_v60 = vmul.f32 %v3520_v59, %v3520_v59  ;;  %v3548_v25 = vsub.f32 %v3508_v52, %v3520_v59 }
0x10e3   :  { %v3530_v58 = vpop.xlane.xlu0 %3529 }
0x10e4   :  { %v3535_v62 = vmul.f32 0.03125, %v3530_v58  ;;  %v3537_v10 = vmul.f32 %v3517_v3, %v3517_v3  ;;  %v3545_v46 = vsub.f32 %v3505_v33, %v3517_v3 }
0x10e5   :  { %v3512_v2 = vpop.xlane.xlu1 %3511 }
0x10e6   :  { %v3543_v8 = vsub.f32 %v3535_v62, %v3539_v36  ;;  %v3518_v44 = vmul.f32 0.03125, %v3512_v2 }
0x10e7   :  { %v3532_v45 = vpop.xlane.xlu0 %3531 }
0x10e8   :  { %v3551_v31 = vadd.f32 1e-12, %v3543_v8  ;;  %v3536_v9 = vmul.f32 0.03125, %v3532_v45  ;;  %v3538_v1 = vmul.f32 %v3518_v44, %v3518_v44  ;;  %v3546_v32 = vsub.f32 %v3506_v55, %v3518_v44 }
0x10e9   :  { %v3526_v61 = vpop.xlane.xlu1 %3525 }
0x10ea   :  { %4726 = vrsqrt.f32 %v3551_v31  ;;  %v3544_v4 = vsub.f32 %v3536_v9, %v3540_v60  ;;  %v3533_v30 = vmul.f32 0.03125, %v3526_v61 }
0x10eb   :  { %v3528_v22 = vpop.xlane.xlu0 %3527 }
0x10ec   :  { %v3552_v15 = vadd.f32 1e-12, %v3544_v4  ;;  %v3541_v16 = vsub.f32 %v3533_v30, %v3537_v10  ;;  %v3534_v17 = vmul.f32 0.03125, %v3528_v22 }
0x10ee   :  { %4728 = vrsqrt.f32 %v3552_v15  ;;  %v3549_v18 = vadd.f32 1e-12, %v3541_v16  ;;  %v3542_v5 = vsub.f32 %v3534_v17, %v3538_v1 }
0x10f0   :  { %4730 = vrsqrt.f32 %v3549_v18  ;;  %v3550_v21 = vadd.f32 1e-12, %v3542_v5 }
0x10f2   :  { %4732 = vrsqrt.f32 %v3550_v21 }
0x10f4   :  { %v4727_v20 = vpop.eup %4726 }
0x10f5   :  { %v3559_v6 = vmul.f32 %v4727_v20, %v3547_v12 }
0x10f7   :  { %v3569_v26 = vmul.f32 %v3953_v14, %v3559_v6 }
0x10f8   :  { %v4729_v24 = vpop.eup %4728 }
0x10f9   :  { %v3560_v0 = vmul.f32 %v4729_v24, %v3548_v25  ;;  %v3579_v63 = vadd.f32 %v3954_v57, %v3569_v26 }
0x10fa   :  { %v4731_v35 = vpop.eup %4730 }
0x10fb   :  { %v3570_v37 = vmul.f32 %v3953_v14, %v3560_v0  ;;  %v3557_v50 = vmul.f32 %v4731_v35, %v3545_v46  ;;  %v3609_v47 = vmul.f32 %v3579_v63, %v3579_v63 }
0x10fc   :  { %v4733_v42 = vpop.eup %4732 }
0x10fd   :  { %v3580_v41 = vadd.f32 %v3954_v57, %v3570_v37  ;;  %v3558_v40 = vmul.f32 %v4733_v42, %v3546_v32  ;;  %v3567_v13 = vmul.f32 %v3953_v14, %v3557_v50 }
0x10ff   :  { %v3610_v34 = vmul.f32 %v3580_v41, %v3580_v41  ;;  %v3568_v7 = vmul.f32 %v3953_v14, %v3558_v40  ;;  %v3577_v49 = vadd.f32 %v3954_v57, %v3567_v13 }
0x1101   :  { %v3613_v38 = vrot.slane %v3610_v34, 7  ;;  %v3578_v51 = vadd.f32 %v3954_v57, %v3568_v7  ;;  %v3581_v53 = vmul.f32 %v3577_v49, %v3577_v49 }
0x1103   :  { %v3614_v43 = vsel %vm3586_vm7, %v3613_v38, %v3609_v47  ;;  %v3582_v52 = vmul.f32 %v3578_v51, %v3578_v51 }
0x1104   :  { %v3616_v33 = vsel %vm3589_vm8, %v3614_v43, 0.0 }
0x1105   :  { %3617 = vadd.xlane.f32.xlu0 %v3616_v33  ;;  %v3585_v54 = vrot.slane %v3582_v52, 7 }
0x1107   :  { %v3587_v55 = vsel %vm3586_vm7, %v3585_v54, %v3581_v53 }
0x1108   :  { %v3590_v19 = vsel %vm3589_vm8, %v3587_v55, 0.0 }
0x1109   :  { %3591 = vadd.xlane.f32.xlu1 %v3590_v19 }
0x1192   :  { %v3618_v39 = vpop.xlane.xlu0 %3617 }
0x1193   :  { %4734 = vrsqrt.f32 %v3618_v39  ;;  %vm3621_vm9 = vcmp.eq.f32.partialorder %v3618_v39, inf  ;;  %v3624_v48 = vand.u32 2147483648, %v3618_v39  ;;  %vm3623_vm10 = vcmp.eq.f32.partialorder %v3618_v39, 0.0 }
0x1196   :  { %v3592_v11 = vpop.xlane.xlu1 %3591 }
0x1197   :  { %4736 = vrsqrt.f32 %v3592_v11  ;;  %vm3595_vm11 = vcmp.eq.f32.partialorder %v3592_v11, inf  ;;  %v3598_v2 = vand.u32 2147483648, %v3592_v11  ;;  %vm3597_vm12 = vcmp.eq.f32.partialorder %v3592_v11, 0.0 }
0x119d   :  { %v4735_v29 = vpop.eup %4734 }
0x119e   :  { %v3620_v28 = vmul.f32 %v4735_v29, %v3618_v39 }
0x11a0   :  { %v3622_v56 = vsel %vm3621_vm9, %v3618_v39, %v3620_v28 }
0x11a1   :  { %v4737_v58 = vpop.eup %4736  ;;  %v3625_v36 = vsel %vm3623_vm10, %v3624_v48, %v3622_v56 }
0x11a2   :  { %v3626_v59 = vmax.f32 %v3625_v36, 1e-12  ;;  %v3594_v62 = vmul.f32 %v4737_v58, %v3592_v11 }
0x11a4   :  { %v3628_v3 = vrot.slane %v3626_v59, 1  ;;  %v3596_v8 = vsel %vm3595_vm11, %v3592_v11, %v3594_v62  ;;  %4738 = vrcp.f32 %v3626_v59 }
0x11a5   :  { %v3599_v45 = vsel %vm3597_vm12, %v3598_v2, %v3596_v8 }
0x11a6   :  { %4740 = vrcp.f32 %v3628_v3  ;;  %v3600_v60 = vmax.f32 %v3599_v45, 1e-12 }
0x11a8   :  { %v3602_v31 = vrot.slane %v3600_v60, 1  ;;  %4742 = vrcp.f32 %v3600_v60 }
0x11aa   :  { %4744 = vrcp.f32 %v3602_v31 }
0x11ae   :  { %v4739_v44 = vpop.eup %4738 }
0x11af   :  { %v3632_v4 = vmul.f32 %v4739_v44, %v3579_v63 }
0x11b0   :  { %v4741_v9 = vpop.eup %4740 }
0x11b1   :  { %v3634_v61 = vmul.f32 %v4741_v9, %v3580_v41 }
0x11b2   :  { %v4743_v10 = vpop.eup %4742 }
0x11b3   :  { %v3642_v30 = vrot.slane %v3634_v61, 7  ;;  %v3606_v16 = vmul.f32 %v4743_v10, %v3577_v49 }
0x11b4   :  { %v4745_v22 = vpop.eup %4744 }
0x11b5   :  { %v3643_v1 = vsel %vm3586_vm7, %v3642_v30, %v3632_v4  ;;  %v3608_v15 = vmul.f32 %v4745_v22, %v3578_v51 }
0x11b6   :  { %4454 = vmatpush3.xpose.msra.mxu1 %v3643_v1 }
0x11b7   :  { %v3637_v17 = vrot.slane %v3608_v15, 7 }
0x11b9   :  { %v3638_v18 = vsel %vm3586_vm7, %v3637_v17, %v3606_v16 }
0x11ba   :  { %4456 = vmatmul.mubr.f32.vlgmr.msra.gmra.mrb[72].mxu1 %v3638_v18 }
0x128d   :  { %v3711_v5 = vpop.f32.mrb[72].mxu1 }
0x128e   :  { %v3715_v21 = vmul.f32 20.0, %v3711_v5  ;;  %v4457_v12 = vpop.f32.mrb[73].mxu1 }
0x1290   :  { %v3718_v20 = vsel %vm3716_vm13, %v3715_v21, -inf  ;;  %3717 = vst.msk [vmem:[#allocation9] sm:$0x3] %vm3716_vm13, %v3715_v21  ;;  %v3733_v6 = vsel %vm3732_vm14, %v3715_v21, 0.0 }
0x1291   :  { %3719 = vmax.xlane.f32.xlu0 %v3718_v20  ;;  %v3734_v14 = vsel %vm3716_vm13, %v3733_v6, 0.0 }
0x1295   :  { %3735 = vadd.xlane.f32.xlu0 %v3734_v14 }
0x131e   :  { %v3720_v25 = vpop.xlane.xlu0 %3719 }
0x131f   :  { %v3721_v24 = vsub.f32 %v3715_v21, %v3720_v25 }
0x1321   :  { %v3722_v46 = vmul.f32 1.442695, %v3721_v24 }
0x1322   :  { %v3736_v50 = vpop.xlane.xlu0 %3735 }
0x1323   :  { %4746 = vpow2.f32 %v3722_v46 }
0x132d   :  { %v4747_v0 = vpop.eup %4746 }
0x132e   :  { %v3724_v26 = vsel %vm3716_vm13, %v4747_v0, 0.0 }
0x132f   :  { %3725 = vadd.xlane.f32.xlu1 %v3724_v26 }
0x13bc   :  { %v3726_v35 = vpop.xlane.xlu1 %3725 }
0x13bd   :  { %4748 = vlog2.f32 %v3726_v35 }
0x13c7   :  { %v4749_v57 = vpop.eup %4748 }
0x13c8   :  { %v3728_v32 = vmul.f32 0.6931472, %v4749_v57 }
0x13ca   :  { %v3729_v37 = vadd.f32 %v3728_v32, %v3720_v25 }
0x13cc   :  { %v3737_v23 = vsub.f32 %v3729_v37, %v3736_v50 }
0x13ce   :  { %v3739_v27 = vsel %vm3738_vm15, %v3737_v23, 0.0 }
0x13cf   :  { %3740 = vadd.xlane.f32.xlu1 %v3739_v27 }
0x13d0   :  { %4831 = shalt.err (!%p4828_p0)
}
0x13d1   :  { %s4832_s25 = scalar_lea.hbm %s5765_s16, 32 }
0x13d2   :  { %p4833_p1 = scmp.ne.s32.totalorder %s5765_s16, %s4832_s25  ;;  %p4836_p2 = scmp.lt.u32.totalorder %s4832_s25, %s5765_s16 }
0x13d4   :  { %p4838_p3 = pnand %p4836_p2, %p4833_p1 }
0x13d6   :  { %4841 = shalt.err (!%p4838_p3)
}
0x13d7   :  { %3761 = dma.vmem_to_hbm [thread:$0]  %s3759_s15, 32, %s5765_s16, [#allocation4]  }
0x13d8   :  { %s4842_s28 = scalar_lea.hbm %s5766_s17, 16 }
0x13d9   :  { %p4843_p4 = scmp.ne.s32.totalorder %s5766_s17, %s4842_s28  ;;  %p4846_p5 = scmp.lt.u32.totalorder %s4842_s28, %s5766_s17 }
0x13db   :  { %p4848_p6 = pnand %p4846_p5, %p4843_p4 }
0x145c   :  { %v3741_v42 = vpop.xlane.xlu1 %3740 }
0x145d   :  { %v3742_v63 = vrot.slane %v3741_v42, 4 }
0x145f   :  { %v3743_v41 = vadd.f32 %v3742_v63, %v3741_v42 }
0x1461   :  { %v3744_v40 = vrot.slane %v3743_v41, 2 }
0x1463   :  { %v3745_v13 = vadd.f32 %v3744_v40, %v3743_v41 }
0x1465   :  { %v3746_v34 = vrot.slane %v3745_v13, 1 }
0x1467   :  { %v3747_v7 = vadd.f32 %v3746_v34, %v3745_v13 }
0x1469   :  { %4490 = vpush %v3747_v7 }
0x149a   :  { %s4491_s3 = spop %4490 }
0x149b   :  { %s3749_s22 = smul.f32 0.5, %s4491_s3 }
0x149d   :  { %3751 = sst [smem:[#allocation10]] %s3749_s22 }
0x149e   :  { %4851 = shalt.err (!%p4848_p6)
}
0x149f   :  { %s4869_s30 = smov [#allocation10]  }
0x14a0   :  { %3769 = dma.smem_to_hbm %s4869_s30, 16, %s5766_s17, [#allocation5]  }
0x14a1   :  { %4856 = dma.done.wait [#allocation4], 32  }
0x14a2   :  { %4857 = vsyncadd [#allocation4], 4294967264 }
0x14a3   :  { %4858 = dma.done.wait [#allocation5], 16  }
0x14a4   :  { %4859 = vsyncadd [#allocation5], 4294967280 }
0x14a5   :  { %3776 = sfence }
0x14a6   :  { %3777 = vsyncpa [#allocation3], 1 }
0x14a7   :  { %3778 = vsyncpa [#allocation7], 1 }
0x14a8   :  { %3779 = vsyncpa [#allocation4], 1 }
0x14a9   :  { %3780 = vsyncpa [#allocation5], 1 }

</bundles_post_ra>
